<compile_context>
chip_gen: v7x
topology: tpu7x:2x2x1
jax: 0.10.0
libtpu: 0.0.40
codegen_flags: <defaults>
</compile_context>

<pallas_src>
import jax
import jax.numpy as jnp
from jax import lax
from jax.experimental import pallas as pl
from jax.experimental.pallas import tpu as pltpu

H = 100     # hidden_layer_size
HP = 128    # hidden padded to lane width
IN = 5      # input_size
INP = 8     # input padded to sublane width
OUT = 1     # output_size
OUTP = 128  # output padded to lane width (lane-dense stores)

# torch gate layout is [i, f, g, o]; kernel uses [i, f, o, g] so the three
# sigmoid gates form one contiguous 3*HP slab.
GATE_ORDER = (0, 1, 3, 2)


def _sigmoid(x):
    # sigmoid(x) = 0.5 * tanh(0.5 * x) + 0.5 : one EUP issue per vreg; the
    # extra mul/add land in spare VALU slots.
    return 0.5 * jnp.tanh(0.5 * x) + 0.5


def _lstm_kernel(x_ref, wih0_ref, b0_ref, whh0_ref, wih1_ref, whh1_ref,
                 b1_ref, wlin_ref, blin_ref, out_ref, xproj, hs):
    hp = HP
    T = x_ref.shape[0]

    # Hoisted layer-0 input projection: one well-shaped MXU matmul outside the
    # serial recurrence (removes T tiny K=5, M=1 matmuls + bias adds).
    xproj[...] = (jnp.dot(x_ref[...], wih0_ref[...],
                          preferred_element_type=jnp.float32) + b0_ref[...])

    whh0 = whh0_ref[...]      # (HP, 4*HP) bf16 recurrent weights, layer 0
    wih1 = wih1_ref[...]      # (HP, 4*HP) bf16 input weights,     layer 1
    whh1 = whh1_ref[...]      # (HP, 4*HP) bf16 recurrent weights, layer 1
    b1 = b1_ref[...]          # (1, 4*HP)  f32

    def gates(g):
        # Gate layout [i, f, o, g]: tanh-form sigmoid over 3*HP lanes + tanh.
        sig = _sigmoid(g[:, :3 * hp])
        i = sig[:, 0 * hp:1 * hp]
        f = sig[:, 1 * hp:2 * hp]
        o = sig[:, 2 * hp:3 * hp]
        gg = jnp.tanh(g[:, 3 * hp:])
        return i, f, o, gg

    def step(t, carry):
        h0, c0, h1, c1 = carry   # h* bf16, c* f32

        # Layer-1 recurrent half depends only on h1_{t-1}: can issue before
        # layer-0 of this step completes (shortens the serial chain).
        r1 = jnp.dot(h1, whh1, preferred_element_type=jnp.float32)

        # ---- layer 0: only the recurrent matmul is on the critical path ----
        g0 = xproj[pl.ds(t, 1), :] + jnp.dot(
            h0, whh0, preferred_element_type=jnp.float32)
        i0, f0, o0, gg0 = gates(g0)
        c0 = f0 * c0 + i0 * gg0
        h0f = o0 * jnp.tanh(c0)
        h0 = h0f.astype(jnp.bfloat16)

        # ---- layer 1 ----
        # TODO(synk): inter-layer dropout(p=0.4) applies only in training mode;
        # eval-mode semantics (no dropout) are implemented here.
        g1 = r1 + jnp.dot(h0, wih1, preferred_element_type=jnp.float32) + b1
        i1, f1, o1, gg1 = gates(g1)
        c1 = f1 * c1 + i1 * gg1
        h1f = o1 * jnp.tanh(c1)
        h1 = h1f.astype(jnp.bfloat16)

        hs[pl.ds(t, 1), :] = h1f
        return h0, c0, h1, c1

    zf = jnp.zeros((1, hp), jnp.float32)
    zb = jnp.zeros((1, hp), jnp.bfloat16)
    # Full unroll for short sequences (layer-0 of t+1 overlaps layer-1 of t);
    # cap unroll for long T to bound code size / vreg live ranges.
    unroll = True if T <= 32 else 4
    lax.fori_loop(0, T, step, (zb, zf, zb, zf), unroll=unroll)

    # Epilogue: single bf16 (T, HP) @ (HP, OUTP) matmul (f32 accumulate);
    # lane-dense output store.
    y = jnp.dot(hs[...].astype(jnp.bfloat16), wlin_ref[...],
                preferred_element_type=jnp.float32) + blin_ref[...]
    out_ref[...] = _sigmoid(y)


def lstm_forward(x, kparams):
    T = x.shape[0]
    x_pad = jnp.pad(x, ((0, 0), (0, INP - IN)))
    vmem = pl.BlockSpec(memory_space=pltpu.MemorySpace.VMEM)
    out = pl.pallas_call(
        _lstm_kernel,
        out_shape=jax.ShapeDtypeStruct((T, OUTP), jnp.float32),
        in_specs=[vmem] * 9,
        out_specs=vmem,
        scratch_shapes=[
            pltpu.VMEM((T, 4 * HP), jnp.float32),   # hoisted x-projection
            pltpu.VMEM((T, HP), jnp.float32),       # per-step h1 history
        ],
        compiler_params=pltpu.CompilerParams(
            # ~3 KB/step of T-scaling scratch; 32 MiB is safe on v5e/v6e/v7x
            # and gives headroom for longer sequences.
            vmem_limit_bytes=32 * 1024 * 1024),
    )(x_pad,
      kparams["wih0"], kparams["b0"], kparams["whh0"],
      kparams["wih1"], kparams["whh1"], kparams["b1"],
      kparams["wlin"], kparams["blin"])
    return out[:, :OUT]


# ---------------- parameter setup (deterministic, PyTorch-like init) ---------

def init_raw_params(key):
    k = 1.0 / jnp.sqrt(jnp.float32(H))
    keys = jax.random.split(key, 10)
    u = lambda kk, shape: jax.random.uniform(kk, shape, jnp.float32, -k, k)
    return dict(
        w_ih_l0=u(keys[0], (4 * H, IN)), w_hh_l0=u(keys[1], (4 * H, H)),
        b_ih_l0=u(keys[2], (4 * H,)),    b_hh_l0=u(keys[3], (4 * H,)),
        w_ih_l1=u(keys[4], (4 * H, H)),  w_hh_l1=u(keys[5], (4 * H, H)),
        b_ih_l1=u(keys[6], (4 * H,)),    b_hh_l1=u(keys[7], (4 * H,)),
        w_lin=u(keys[8], (OUT, H)),      b_lin=u(keys[9], (OUT,)),
    )


def _pad_gate_weight(w, in_dim_pad, dtype):
    # w: (4H, in_dim) torch layout -> (in_dim_pad, 4*HP) kernel layout,
    # gates reordered to [i, f, o, g]; pad rows/columns are zero.
    wt = w.T                                      # (in_dim, 4H)
    in_dim = wt.shape[0]
    g = jnp.split(wt, 4, axis=1)                  # torch order [i, f, g, o]
    g = [g[i] for i in GATE_ORDER]
    padded = [jnp.pad(x, ((0, in_dim_pad - in_dim), (0, HP - H))) for x in g]
    return jnp.concatenate(padded, axis=1).astype(dtype)


def _pad_gate_bias(b_ih, b_hh):
    b = (b_ih + b_hh).reshape(4, H)
    b = b[jnp.array(GATE_ORDER), :]
    b = jnp.pad(b, ((0, 0), (0, HP - H)))
    return b.reshape(1, 4 * HP)


def prepare_kernel_params(raw):
    return dict(
        wih0=_pad_gate_weight(raw["w_ih_l0"], INP, jnp.float32),   # (INP, 4HP)
        b0=_pad_gate_bias(raw["b_ih_l0"], raw["b_hh_l0"]),         # (1, 4HP)
        whh0=_pad_gate_weight(raw["w_hh_l0"], HP, jnp.bfloat16),   # (HP, 4HP)
        wih1=_pad_gate_weight(raw["w_ih_l1"], HP, jnp.bfloat16),   # (HP, 4HP)
        whh1=_pad_gate_weight(raw["w_hh_l1"], HP, jnp.bfloat16),   # (HP, 4HP)
        b1=_pad_gate_bias(raw["b_ih_l1"], raw["b_hh_l1"]),         # (1, 4HP)
        wlin=jnp.pad(raw["w_lin"].T,
                     ((0, HP - H), (0, OUTP - OUT))).astype(jnp.bfloat16),
        blin=jnp.pad(raw["b_lin"].reshape(1, OUT), ((0, 0), (0, OUTP - OUT))),
    )


# ---------------- pure-JAX reference (eval-mode PyTorch semantics) -----------

def lstm_ref(x, raw):
    def layer(xs, w_ih, w_hh, b_ih, b_hh):
        def step(carry, x_t):
            h, c = carry
            g = x_t @ w_ih.T + h @ w_hh.T + b_ih + b_hh
            i, f, gg, o = jnp.split(g, 4)
            i = jax.nn.sigmoid(i)
            f = jax.nn.sigmoid(f)
            gg = jnp.tanh(gg)
            o = jax.nn.sigmoid(o)
            c = f * c + i * gg
            h = o * jnp.tanh(c)
            return (h, c), h
        (_, _), hs = lax.scan(step, (jnp.zeros(H), jnp.zeros(H)), xs)
        return hs

    h0s = layer(x, raw["w_ih_l0"], raw["w_hh_l0"], raw["b_ih_l0"], raw["b_hh_l0"])
    h1s = layer(h0s, raw["w_ih_l1"], raw["w_hh_l1"], raw["b_ih_l1"], raw["b_hh_l1"])
    y = h1s @ raw["w_lin"].T + raw["b_lin"]
    return jax.nn.sigmoid(y)


if __name__ == "__main__":
    key = jax.random.PRNGKey(0)
    k_x, k_p = jax.random.split(key)

    seq_len = 8
    x = jax.random.normal(k_x, (seq_len, IN), jnp.float32)  # torch view: (8,1,5)

    raw = init_raw_params(k_p)
    kparams = prepare_kernel_params(raw)

    out = lstm_forward(x, kparams)
    out = jax.block_until_ready(out)

    ref = lstm_ref(x, raw)
    assert out.shape == (seq_len, OUT)
    # bf16 recurrent weights + bf16 hidden-state carries -> loosened tolerance
    # vs the f32 reference.
    assert jnp.allclose(out, ref, atol=3e-2, rtol=3e-2), (out, ref)

    print("KERNEL_OK")
</pallas_src>

<mosaic_0001>
module attributes {stable_mosaic.version = 11 : i64} {
  func.func @_lstm_kernel(%arg0: memref<8x8xf32, #tpu.memory_space<vmem>>, %arg1: memref<8x512xf32, #tpu.memory_space<vmem>>, %arg2: memref<1x512xf32, #tpu.memory_space<vmem>>, %arg3: memref<128x512xbf16, #tpu.memory_space<vmem>>, %arg4: memref<128x512xbf16, #tpu.memory_space<vmem>>, %arg5: memref<128x512xbf16, #tpu.memory_space<vmem>>, %arg6: memref<1x512xf32, #tpu.memory_space<vmem>>, %arg7: memref<128x128xbf16, #tpu.memory_space<vmem>>, %arg8: memref<1x128xf32, #tpu.memory_space<vmem>>, %arg9: memref<8x128xf32, #tpu.memory_space<vmem>>, %arg10: memref<8x512xf32, #tpu.memory_space<vmem>>, %arg11: memref<8x128xf32, #tpu.memory_space<vmem>>) attributes {dimension_semantics = [], scalar_prefetch = 0 : i64, scratch_operands = 2 : i64, tpu.core_type = #tpu.core_type<tc>} {
    %c0 = arith.constant 0 : index
    %c0_0 = arith.constant 0 : index
    %0 = vector.load %arg0[%c0, %c0_0] : memref<8x8xf32, #tpu.memory_space<vmem>>, vector<8x8xf32>
    %c0_1 = arith.constant 0 : index
    %c0_2 = arith.constant 0 : index
    %1 = vector.load %arg1[%c0_1, %c0_2] : memref<8x512xf32, #tpu.memory_space<vmem>>, vector<8x512xf32>
    %cst = arith.constant dense<0.000000e+00> : vector<8x512xf32>
    %2 = tpu.matmul %0, %1, %cst {dimension_numbers = #tpu.dot_dimension_numbers<[1], [0], [0], [1], [0, 0, 1, 1], [], []>} : vector<8x8xf32>, vector<8x512xf32>, vector<8x512xf32> -> vector<8x512xf32>
    %c0_3 = arith.constant 0 : index
    %c0_4 = arith.constant 0 : index
    %3 = vector.load %arg2[%c0_3, %c0_4] : memref<1x512xf32, #tpu.memory_space<vmem>>, vector<1x512xf32>
    %4 = vector.broadcast %3 : vector<1x512xf32> to vector<8x512xf32>
    %5 = arith.addf %2, %4 : vector<8x512xf32>
    %c0_5 = arith.constant 0 : index
    %c0_6 = arith.constant 0 : index
    %6 = vector.load %arg10[%c0_5, %c0_6] : memref<8x512xf32, #tpu.memory_space<vmem>>, vector<8x512xf32>
    tpu.vector_store %arg10[%c0_5, %c0_6], %5 {strides = array<i32>} : memref<8x512xf32, #tpu.memory_space<vmem>>, vector<8x512xf32>,
    %c0_7 = arith.constant 0 : index
    %c0_8 = arith.constant 0 : index
    %7 = vector.load %arg3[%c0_7, %c0_8] : memref<128x512xbf16, #tpu.memory_space<vmem>>, vector<128x512xbf16>
    %c0_9 = arith.constant 0 : index
    %c0_10 = arith.constant 0 : index
    %8 = vector.load %arg4[%c0_9, %c0_10] : memref<128x512xbf16, #tpu.memory_space<vmem>>, vector<128x512xbf16>
    %c0_11 = arith.constant 0 : index
    %c0_12 = arith.constant 0 : index
    %9 = vector.load %arg5[%c0_11, %c0_12] : memref<128x512xbf16, #tpu.memory_space<vmem>>, vector<128x512xbf16>
    %c0_13 = arith.constant 0 : index
    %c0_14 = arith.constant 0 : index
    %10 = vector.load %arg6[%c0_13, %c0_14] : memref<1x512xf32, #tpu.memory_space<vmem>>, vector<1x512xf32>
    %cst_15 = arith.constant 0.000000e+00 : f32
    %11 = vector.broadcast %cst_15 : f32 to vector<1x128xf32>
    %cst_16 = arith.constant 0.000000e+00 : bf16
    %12 = vector.broadcast %cst_16 : bf16 to vector<1x128xbf16>
    %c0_i32 = arith.constant 0 : i32
    %cst_17 = arith.constant dense<0.000000e+00> : vector<1x512xf32>
    %13 = tpu.matmul %12, %9, %cst_17 {dimension_numbers = #tpu.dot_dimension_numbers<[1], [0], [0], [1], [0, 0, 1, 1], [], []>} : vector<1x128xbf16>, vector<128x512xbf16>, vector<1x512xf32> -> vector<1x512xf32>
    %14 = arith.index_cast %c0_i32 : i32 to index
    %c0_18 = arith.constant 0 : index
    %15 = vector.load %arg10[%14, %c0_18] : memref<8x512xf32, #tpu.memory_space<vmem>>, vector<1x512xf32>
    %cst_19 = arith.constant dense<0.000000e+00> : vector<1x512xf32>
    %16 = tpu.matmul %12, %7, %cst_19 {dimension_numbers = #tpu.dot_dimension_numbers<[1], [0], [0], [1], [0, 0, 1, 1], [], []>} : vector<1x128xbf16>, vector<128x512xbf16>, vector<1x512xf32> -> vector<1x512xf32>
    %17 = arith.addf %15, %16 : vector<1x512xf32>
    %18 = vector.extract_strided_slice %17 {offsets = [0, 0], sizes = [1, 384], strides = [1, 1]} : vector<1x512xf32> to vector<1x384xf32>
    %cst_20 = arith.constant 5.000000e-01 : f32
    %19 = vector.broadcast %cst_20 : f32 to vector<1x384xf32>
    %20 = arith.mulf %19, %18 : vector<1x384xf32>
    %21 = math.tanh %20 : vector<1x384xf32>
    %cst_21 = arith.constant 5.000000e-01 : f32
    %22 = vector.broadcast %cst_21 : f32 to vector<1x384xf32>
    %23 = arith.mulf %22, %21 : vector<1x384xf32>
    %cst_22 = arith.constant 5.000000e-01 : f32
    %24 = vector.broadcast %cst_22 : f32 to vector<1x384xf32>
    %25 = arith.addf %23, %24 : vector<1x384xf32>
    %26 = vector.extract_strided_slice %25 {offsets = [0, 0], sizes = [1, 128], strides = [1, 1]} : vector<1x384xf32> to vector<1x128xf32>
    %27 = vector.extract_strided_slice %25 {offsets = [0, 128], sizes = [1, 128], strides = [1, 1]} : vector<1x384xf32> to vector<1x128xf32>
    %28 = vector.extract_strided_slice %25 {offsets = [0, 256], sizes = [1, 128], strides = [1, 1]} : vector<1x384xf32> to vector<1x128xf32>
    %29 = vector.extract_strided_slice %17 {offsets = [0, 384], sizes = [1, 128], strides = [1, 1]} : vector<1x512xf32> to vector<1x128xf32>
    %30 = math.tanh %29 : vector<1x128xf32>
    %31 = arith.mulf %27, %11 : vector<1x128xf32>
    %32 = arith.mulf %26, %30 : vector<1x128xf32>
    %33 = arith.addf %31, %32 : vector<1x128xf32>
    %34 = math.tanh %33 : vector<1x128xf32>
    %35 = arith.mulf %28, %34 : vector<1x128xf32>
    %36 = arith.truncf %35 : vector<1x128xf32> to vector<1x128xbf16>
    %cst_23 = arith.constant dense<0.000000e+00> : vector<1x512xf32>
    %37 = tpu.matmul %36, %8, %cst_23 {dimension_numbers = #tpu.dot_dimension_numbers<[1], [0], [0], [1], [0, 0, 1, 1], [], []>} : vector<1x128xbf16>, vector<128x512xbf16>, vector<1x512xf32> -> vector<1x512xf32>
    %38 = arith.addf %13, %37 : vector<1x512xf32>
    %39 = arith.addf %38, %10 : vector<1x512xf32>
    %40 = vector.extract_strided_slice %39 {offsets = [0, 0], sizes = [1, 384], strides = [1, 1]} : vector<1x512xf32> to vector<1x384xf32>
    %cst_24 = arith.constant 5.000000e-01 : f32
    %41 = vector.broadcast %cst_24 : f32 to vector<1x384xf32>
    %42 = arith.mulf %41, %40 : vector<1x384xf32>
    %43 = math.tanh %42 : vector<1x384xf32>
    %cst_25 = arith.constant 5.000000e-01 : f32
    %44 = vector.broadcast %cst_25 : f32 to vector<1x384xf32>
    %45 = arith.mulf %44, %43 : vector<1x384xf32>
    %cst_26 = arith.constant 5.000000e-01 : f32
    %46 = vector.broadcast %cst_26 : f32 to vector<1x384xf32>
    %47 = arith.addf %45, %46 : vector<1x384xf32>
    %48 = vector.extract_strided_slice %47 {offsets = [0, 0], sizes = [1, 128], strides = [1, 1]} : vector<1x384xf32> to vector<1x128xf32>
    %49 = vector.extract_strided_slice %47 {offsets = [0, 128], sizes = [1, 128], strides = [1, 1]} : vector<1x384xf32> to vector<1x128xf32>
    %50 = vector.extract_strided_slice %47 {offsets = [0, 256], sizes = [1, 128], strides = [1, 1]} : vector<1x384xf32> to vector<1x128xf32>
    %51 = vector.extract_strided_slice %39 {offsets = [0, 384], sizes = [1, 128], strides = [1, 1]} : vector<1x512xf32> to vector<1x128xf32>
    %52 = math.tanh %51 : vector<1x128xf32>
    %53 = arith.mulf %49, %11 : vector<1x128xf32>
    %54 = arith.mulf %48, %52 : vector<1x128xf32>
    %55 = arith.addf %53, %54 : vector<1x128xf32>
    %56 = math.tanh %55 : vector<1x128xf32>
    %57 = arith.mulf %50, %56 : vector<1x128xf32>
    %58 = arith.truncf %57 : vector<1x128xf32> to vector<1x128xbf16>
    %59 = arith.index_cast %c0_i32 : i32 to index
    %c0_27 = arith.constant 0 : index
    %60 = vector.load %arg11[%59, %c0_27] : memref<8x128xf32, #tpu.memory_space<vmem>>, vector<1x128xf32>
    tpu.vector_store %arg11[%59, %c0_27], %57 {strides = array<i32>} : memref<8x128xf32, #tpu.memory_space<vmem>>, vector<1x128xf32>,
    %c1_i32 = arith.constant 1 : i32
    %cst_28 = arith.constant dense<0.000000e+00> : vector<1x512xf32>
    %61 = tpu.matmul %58, %9, %cst_28 {dimension_numbers = #tpu.dot_dimension_numbers<[1], [0], [0], [1], [0, 0, 1, 1], [], []>} : vector<1x128xbf16>, vector<128x512xbf16>, vector<1x512xf32> -> vector<1x512xf32>
    %62 = arith.index_cast %c1_i32 : i32 to index
    %c0_29 = arith.constant 0 : index
    %63 = vector.load %arg10[%62, %c0_29] : memref<8x512xf32, #tpu.memory_space<vmem>>, vector<1x512xf32>
    %cst_30 = arith.constant dense<0.000000e+00> : vector<1x512xf32>
    %64 = tpu.matmul %36, %7, %cst_30 {dimension_numbers = #tpu.dot_dimension_numbers<[1], [0], [0], [1], [0, 0, 1, 1], [], []>} : vector<1x128xbf16>, vector<128x512xbf16>, vector<1x512xf32> -> vector<1x512xf32>
    %65 = arith.addf %63, %64 : vector<1x512xf32>
    %66 = vector.extract_strided_slice %65 {offsets = [0, 0], sizes = [1, 384], strides = [1, 1]} : vector<1x512xf32> to vector<1x384xf32>
    %cst_31 = arith.constant 5.000000e-01 : f32
    %67 = vector.broadcast %cst_31 : f32 to vector<1x384xf32>
    %68 = arith.mulf %67, %66 : vector<1x384xf32>
    %69 = math.tanh %68 : vector<1x384xf32>
    %cst_32 = arith.constant 5.000000e-01 : f32
    %70 = vector.broadcast %cst_32 : f32 to vector<1x384xf32>
    %71 = arith.mulf %70, %69 : vector<1x384xf32>
    %cst_33 = arith.constant 5.000000e-01 : f32
    %72 = vector.broadcast %cst_33 : f32 to vector<1x384xf32>
    %73 = arith.addf %71, %72 : vector<1x384xf32>
    %74 = vector.extract_strided_slice %73 {offsets = [0, 0], sizes = [1, 128], strides = [1, 1]} : vector<1x384xf32> to vector<1x128xf32>
    %75 = vector.extract_strided_slice %73 {offsets = [0, 128], sizes = [1, 128], strides = [1, 1]} : vector<1x384xf32> to vector<1x128xf32>
    %76 = vector.extract_strided_slice %73 {offsets = [0, 256], sizes = [1, 128], strides = [1, 1]} : vector<1x384xf32> to vector<1x128xf32>
    %77 = vector.extract_strided_slice %65 {offsets = [0, 384], sizes = [1, 128], strides = [1, 1]} : vector<1x512xf32> to vector<1x128xf32>
    %78 = math.tanh %77 : vector<1x128xf32>
    %79 = arith.mulf %75, %33 : vector<1x128xf32>
    %80 = arith.mulf %74, %78 : vector<1x128xf32>
    %81 = arith.addf %79, %80 : vector<1x128xf32>
    %82 = math.tanh %81 : vector<1x128xf32>
    %83 = arith.mulf %76, %82 : vector<1x128xf32>
    %84 = arith.truncf %83 : vector<1x128xf32> to vector<1x128xbf16>
    %cst_34 = arith.constant dense<0.000000e+00> : vector<1x512xf32>
    %85 = tpu.matmul %84, %8, %cst_34 {dimension_numbers = #tpu.dot_dimension_numbers<[1], [0], [0], [1], [0, 0, 1, 1], [], []>} : vector<1x128xbf16>, vector<128x512xbf16>, vector<1x512xf32> -> vector<1x512xf32>
    %86 = arith.addf %61, %85 : vector<1x512xf32>
    %87 = arith.addf %86, %10 : vector<1x512xf32>
    %88 = vector.extract_strided_slice %87 {offsets = [0, 0], sizes = [1, 384], strides = [1, 1]} : vector<1x512xf32> to vector<1x384xf32>
    %cst_35 = arith.constant 5.000000e-01 : f32
    %89 = vector.broadcast %cst_35 : f32 to vector<1x384xf32>
    %90 = arith.mulf %89, %88 : vector<1x384xf32>
    %91 = math.tanh %90 : vector<1x384xf32>
    %cst_36 = arith.constant 5.000000e-01 : f32
    %92 = vector.broadcast %cst_36 : f32 to vector<1x384xf32>
    %93 = arith.mulf %92, %91 : vector<1x384xf32>
    %cst_37 = arith.constant 5.000000e-01 : f32
    %94 = vector.broadcast %cst_37 : f32 to vector<1x384xf32>
    %95 = arith.addf %93, %94 : vector<1x384xf32>
    %96 = vector.extract_strided_slice %95 {offsets = [0, 0], sizes = [1, 128], strides = [1, 1]} : vector<1x384xf32> to vector<1x128xf32>
    %97 = vector.extract_strided_slice %95 {offsets = [0, 128], sizes = [1, 128], strides = [1, 1]} : vector<1x384xf32> to vector<1x128xf32>
    %98 = vector.extract_strided_slice %95 {offsets = [0, 256], sizes = [1, 128], strides = [1, 1]} : vector<1x384xf32> to vector<1x128xf32>
    %99 = vector.extract_strided_slice %87 {offsets = [0, 384], sizes = [1, 128], strides = [1, 1]} : vector<1x512xf32> to vector<1x128xf32>
    %100 = math.tanh %99 : vector<1x128xf32>
    %101 = arith.mulf %97, %55 : vector<1x128xf32>
    %102 = arith.mulf %96, %100 : vector<1x128xf32>
    %103 = arith.addf %101, %102 : vector<1x128xf32>
    %104 = math.tanh %103 : vector<1x128xf32>
    %105 = arith.mulf %98, %104 : vector<1x128xf32>
    %106 = arith.truncf %105 : vector<1x128xf32> to vector<1x128xbf16>
    %107 = arith.index_cast %c1_i32 : i32 to index
    %c0_38 = arith.constant 0 : index
    %108 = vector.load %arg11[%107, %c0_38] : memref<8x128xf32, #tpu.memory_space<vmem>>, vector<1x128xf32>
    tpu.vector_store %arg11[%107, %c0_38], %105 {strides = array<i32>} : memref<8x128xf32, #tpu.memory_space<vmem>>, vector<1x128xf32>,
    %c2_i32 = arith.constant 2 : i32
    %cst_39 = arith.constant dense<0.000000e+00> : vector<1x512xf32>
    %109 = tpu.matmul %106, %9, %cst_39 {dimension_numbers = #tpu.dot_dimension_numbers<[1], [0], [0], [1], [0, 0, 1, 1], [], []>} : vector<1x128xbf16>, vector<128x512xbf16>, vector<1x512xf32> -> vector<1x512xf32>
    %110 = arith.index_cast %c2_i32 : i32 to index
    %c0_40 = arith.constant 0 : index
    %111 = vector.load %arg10[%110, %c0_40] : memref<8x512xf32, #tpu.memory_space<vmem>>, vector<1x512xf32>
    %cst_41 = arith.constant dense<0.000000e+00> : vector<1x512xf32>
    %112 = tpu.matmul %84, %7, %cst_41 {dimension_numbers = #tpu.dot_dimension_numbers<[1], [0], [0], [1], [0, 0, 1, 1], [], []>} : vector<1x128xbf16>, vector<128x512xbf16>, vector<1x512xf32> -> vector<1x512xf32>
    %113 = arith.addf %111, %112 : vector<1x512xf32>
    %114 = vector.extract_strided_slice %113 {offsets = [0, 0], sizes = [1, 384], strides = [1, 1]} : vector<1x512xf32> to vector<1x384xf32>
    %cst_42 = arith.constant 5.000000e-01 : f32
    %115 = vector.broadcast %cst_42 : f32 to vector<1x384xf32>
    %116 = arith.mulf %115, %114 : vector<1x384xf32>
    %117 = math.tanh %116 : vector<1x384xf32>
    %cst_43 = arith.constant 5.000000e-01 : f32
    %118 = vector.broadcast %cst_43 : f32 to vector<1x384xf32>
    %119 = arith.mulf %118, %117 : vector<1x384xf32>
    %cst_44 = arith.constant 5.000000e-01 : f32
    %120 = vector.broadcast %cst_44 : f32 to vector<1x384xf32>
    %121 = arith.addf %119, %120 : vector<1x384xf32>
    %122 = vector.extract_strided_slice %121 {offsets = [0, 0], sizes = [1, 128], strides = [1, 1]} : vector<1x384xf32> to vector<1x128xf32>
    %123 = vector.extract_strided_slice %121 {offsets = [0, 128], sizes = [1, 128], strides = [1, 1]} : vector<1x384xf32> to vector<1x128xf32>
    %124 = vector.extract_strided_slice %121 {offsets = [0, 256], sizes = [1, 128], strides = [1, 1]} : vector<1x384xf32> to vector<1x128xf32>
    %125 = vector.extract_strided_slice %113 {offsets = [0, 384], sizes = [1, 128], strides = [1, 1]} : vector<1x512xf32> to vector<1x128xf32>
    %126 = math.tanh %125 : vector<1x128xf32>
    %127 = arith.mulf %123, %81 : vector<1x128xf32>
    %128 = arith.mulf %122, %126 : vector<1x128xf32>
    %129 = arith.addf %127, %128 : vector<1x128xf32>
    %130 = math.tanh %129 : vector<1x128xf32>
    %131 = arith.mulf %124, %130 : vector<1x128xf32>
    %132 = arith.truncf %131 : vector<1x128xf32> to vector<1x128xbf16>
    %cst_45 = arith.constant dense<0.000000e+00> : vector<1x512xf32>
    %133 = tpu.matmul %132, %8, %cst_45 {dimension_numbers = #tpu.dot_dimension_numbers<[1], [0], [0], [1], [0, 0, 1, 1], [], []>} : vector<1x128xbf16>, vector<128x512xbf16>, vector<1x512xf32> -> vector<1x512xf32>
    %134 = arith.addf %109, %133 : vector<1x512xf32>
    %135 = arith.addf %134, %10 : vector<1x512xf32>
    %136 = vector.extract_strided_slice %135 {offsets = [0, 0], sizes = [1, 384], strides = [1, 1]} : vector<1x512xf32> to vector<1x384xf32>
    %cst_46 = arith.constant 5.000000e-01 : f32
    %137 = vector.broadcast %cst_46 : f32 to vector<1x384xf32>
    %138 = arith.mulf %137, %136 : vector<1x384xf32>
    %139 = math.tanh %138 : vector<1x384xf32>
    %cst_47 = arith.constant 5.000000e-01 : f32
    %140 = vector.broadcast %cst_47 : f32 to vector<1x384xf32>
    %141 = arith.mulf %140, %139 : vector<1x384xf32>
    %cst_48 = arith.constant 5.000000e-01 : f32
    %142 = vector.broadcast %cst_48 : f32 to vector<1x384xf32>
    %143 = arith.addf %141, %142 : vector<1x384xf32>
    %144 = vector.extract_strided_slice %143 {offsets = [0, 0], sizes = [1, 128], strides = [1, 1]} : vector<1x384xf32> to vector<1x128xf32>
    %145 = vector.extract_strided_slice %143 {offsets = [0, 128], sizes = [1, 128], strides = [1, 1]} : vector<1x384xf32> to vector<1x128xf32>
    %146 = vector.extract_strided_slice %143 {offsets = [0, 256], sizes = [1, 128], strides = [1, 1]} : vector<1x384xf32> to vector<1x128xf32>
    %147 = vector.extract_strided_slice %135 {offsets = [0, 384], sizes = [1, 128], strides = [1, 1]} : vector<1x512xf32> to vector<1x128xf32>
    %148 = math.tanh %147 : vector<1x128xf32>
    %149 = arith.mulf %145, %103 : vector<1x128xf32>
    %150 = arith.mulf %144, %148 : vector<1x128xf32>
    %151 = arith.addf %149, %150 : vector<1x128xf32>
    %152 = math.tanh %151 : vector<1x128xf32>
    %153 = arith.mulf %146, %152 : vector<1x128xf32>
    %154 = arith.truncf %153 : vector<1x128xf32> to vector<1x128xbf16>
    %155 = arith.index_cast %c2_i32 : i32 to index
    %c0_49 = arith.constant 0 : index
    %156 = vector.load %arg11[%155, %c0_49] : memref<8x128xf32, #tpu.memory_space<vmem>>, vector<1x128xf32>
    tpu.vector_store %arg11[%155, %c0_49], %153 {strides = array<i32>} : memref<8x128xf32, #tpu.memory_space<vmem>>, vector<1x128xf32>,
    %c3_i32 = arith.constant 3 : i32
    %cst_50 = arith.constant dense<0.000000e+00> : vector<1x512xf32>
    %157 = tpu.matmul %154, %9, %cst_50 {dimension_numbers = #tpu.dot_dimension_numbers<[1], [0], [0], [1], [0, 0, 1, 1], [], []>} : vector<1x128xbf16>, vector<128x512xbf16>, vector<1x512xf32> -> vector<1x512xf32>
    %158 = arith.index_cast %c3_i32 : i32 to index
    %c0_51 = arith.constant 0 : index
    %159 = vector.load %arg10[%158, %c0_51] : memref<8x512xf32, #tpu.memory_space<vmem>>, vector<1x512xf32>
    %cst_52 = arith.constant dense<0.000000e+00> : vector<1x512xf32>
    %160 = tpu.matmul %132, %7, %cst_52 {dimension_numbers = #tpu.dot_dimension_numbers<[1], [0], [0], [1], [0, 0, 1, 1], [], []>} : vector<1x128xbf16>, vector<128x512xbf16>, vector<1x512xf32> -> vector<1x512xf32>
    %161 = arith.addf %159, %160 : vector<1x512xf32>
    %162 = vector.extract_strided_slice %161 {offsets = [0, 0], sizes = [1, 384], strides = [1, 1]} : vector<1x512xf32> to vector<1x384xf32>
    %cst_53 = arith.constant 5.000000e-01 : f32
    %163 = vector.broadcast %cst_53 : f32 to vector<1x384xf32>
    %164 = arith.mulf %163, %162 : vector<1x384xf32>
    %165 = math.tanh %164 : vector<1x384xf32>
    %cst_54 = arith.constant 5.000000e-01 : f32
    %166 = vector.broadcast %cst_54 : f32 to vector<1x384xf32>
    %167 = arith.mulf %166, %165 : vector<1x384xf32>
    %cst_55 = arith.constant 5.000000e-01 : f32
    %168 = vector.broadcast %cst_55 : f32 to vector<1x384xf32>
    %169 = arith.addf %167, %168 : vector<1x384xf32>
    %170 = vector.extract_strided_slice %169 {offsets = [0, 0], sizes = [1, 128], strides = [1, 1]} : vector<1x384xf32> to vector<1x128xf32>
    %171 = vector.extract_strided_slice %169 {offsets = [0, 128], sizes = [1, 128], strides = [1, 1]} : vector<1x384xf32> to vector<1x128xf32>
    %172 = vector.extract_strided_slice %169 {offsets = [0, 256], sizes = [1, 128], strides = [1, 1]} : vector<1x384xf32> to vector<1x128xf32>
    %173 = vector.extract_strided_slice %161 {offsets = [0, 384], sizes = [1, 128], strides = [1, 1]} : vector<1x512xf32> to vector<1x128xf32>
    %174 = math.tanh %173 : vector<1x128xf32>
    %175 = arith.mulf %171, %129 : vector<1x128xf32>
    %176 = arith.mulf %170, %174 : vector<1x128xf32>
    %177 = arith.addf %175, %176 : vector<1x128xf32>
    %178 = math.tanh %177 : vector<1x128xf32>
    %179 = arith.mulf %172, %178 : vector<1x128xf32>
    %180 = arith.truncf %179 : vector<1x128xf32> to vector<1x128xbf16>
    %cst_56 = arith.constant dense<0.000000e+00> : vector<1x512xf32>
    %181 = tpu.matmul %180, %8, %cst_56 {dimension_numbers = #tpu.dot_dimension_numbers<[1], [0], [0], [1], [0, 0, 1, 1], [], []>} : vector<1x128xbf16>, vector<128x512xbf16>, vector<1x512xf32> -> vector<1x512xf32>
    %182 = arith.addf %157, %181 : vector<1x512xf32>
    %183 = arith.addf %182, %10 : vector<1x512xf32>
    %184 = vector.extract_strided_slice %183 {offsets = [0, 0], sizes = [1, 384], strides = [1, 1]} : vector<1x512xf32> to vector<1x384xf32>
    %cst_57 = arith.constant 5.000000e-01 : f32
    %185 = vector.broadcast %cst_57 : f32 to vector<1x384xf32>
    %186 = arith.mulf %185, %184 : vector<1x384xf32>
    %187 = math.tanh %186 : vector<1x384xf32>
    %cst_58 = arith.constant 5.000000e-01 : f32
    %188 = vector.broadcast %cst_58 : f32 to vector<1x384xf32>
    %189 = arith.mulf %188, %187 : vector<1x384xf32>
    %cst_59 = arith.constant 5.000000e-01 : f32
    %190 = vector.broadcast %cst_59 : f32 to vector<1x384xf32>
    %191 = arith.addf %189, %190 : vector<1x384xf32>
    %192 = vector.extract_strided_slice %191 {offsets = [0, 0], sizes = [1, 128], strides = [1, 1]} : vector<1x384xf32> to vector<1x128xf32>
    %193 = vector.extract_strided_slice %191 {offsets = [0, 128], sizes = [1, 128], strides = [1, 1]} : vector<1x384xf32> to vector<1x128xf32>
    %194 = vector.extract_strided_slice %191 {offsets = [0, 256], sizes = [1, 128], strides = [1, 1]} : vector<1x384xf32> to vector<1x128xf32>
    %195 = vector.extract_strided_slice %183 {offsets = [0, 384], sizes = [1, 128], strides = [1, 1]} : vector<1x512xf32> to vector<1x128xf32>
    %196 = math.tanh %195 : vector<1x128xf32>
    %197 = arith.mulf %193, %151 : vector<1x128xf32>
    %198 = arith.mulf %192, %196 : vector<1x128xf32>
    %199 = arith.addf %197, %198 : vector<1x128xf32>
    %200 = math.tanh %199 : vector<1x128xf32>
    %201 = arith.mulf %194, %200 : vector<1x128xf32>
    %202 = arith.truncf %201 : vector<1x128xf32> to vector<1x128xbf16>
    %203 = arith.index_cast %c3_i32 : i32 to index
    %c0_60 = arith.constant 0 : index
    %204 = vector.load %arg11[%203, %c0_60] : memref<8x128xf32, #tpu.memory_space<vmem>>, vector<1x128xf32>
    tpu.vector_store %arg11[%203, %c0_60], %201 {strides = array<i32>} : memref<8x128xf32, #tpu.memory_space<vmem>>, vector<1x128xf32>,
    %c4_i32 = arith.constant 4 : i32
    %cst_61 = arith.constant dense<0.000000e+00> : vector<1x512xf32>
    %205 = tpu.matmul %202, %9, %cst_61 {dimension_numbers = #tpu.dot_dimension_numbers<[1], [0], [0], [1], [0, 0, 1, 1], [], []>} : vector<1x128xbf16>, vector<128x512xbf16>, vector<1x512xf32> -> vector<1x512xf32>
    %206 = arith.index_cast %c4_i32 : i32 to index
    %c0_62 = arith.constant 0 : index
    %207 = vector.load %arg10[%206, %c0_62] : memref<8x512xf32, #tpu.memory_space<vmem>>, vector<1x512xf32>
    %cst_63 = arith.constant dense<0.000000e+00> : vector<1x512xf32>
    %208 = tpu.matmul %180, %7, %cst_63 {dimension_numbers = #tpu.dot_dimension_numbers<[1], [0], [0], [1], [0, 0, 1, 1], [], []>} : vector<1x128xbf16>, vector<128x512xbf16>, vector<1x512xf32> -> vector<1x512xf32>
    %209 = arith.addf %207, %208 : vector<1x512xf32>
    %210 = vector.extract_strided_slice %209 {offsets = [0, 0], sizes = [1, 384], strides = [1, 1]} : vector<1x512xf32> to vector<1x384xf32>
    %cst_64 = arith.constant 5.000000e-01 : f32
    %211 = vector.broadcast %cst_64 : f32 to vector<1x384xf32>
    %212 = arith.mulf %211, %210 : vector<1x384xf32>
    %213 = math.tanh %212 : vector<1x384xf32>
    %cst_65 = arith.constant 5.000000e-01 : f32
    %214 = vector.broadcast %cst_65 : f32 to vector<1x384xf32>
    %215 = arith.mulf %214, %213 : vector<1x384xf32>
    %cst_66 = arith.constant 5.000000e-01 : f32
    %216 = vector.broadcast %cst_66 : f32 to vector<1x384xf32>
    %217 = arith.addf %215, %216 : vector<1x384xf32>
    %218 = vector.extract_strided_slice %217 {offsets = [0, 0], sizes = [1, 128], strides = [1, 1]} : vector<1x384xf32> to vector<1x128xf32>
    %219 = vector.extract_strided_slice %217 {offsets = [0, 128], sizes = [1, 128], strides = [1, 1]} : vector<1x384xf32> to vector<1x128xf32>
    %220 = vector.extract_strided_slice %217 {offsets = [0, 256], sizes = [1, 128], strides = [1, 1]} : vector<1x384xf32> to vector<1x128xf32>
    %221 = vector.extract_strided_slice %209 {offsets = [0, 384], sizes = [1, 128], strides = [1, 1]} : vector<1x512xf32> to vector<1x128xf32>
    %222 = math.tanh %221 : vector<1x128xf32>
    %223 = arith.mulf %219, %177 : vector<1x128xf32>
    %224 = arith.mulf %218, %222 : vector<1x128xf32>
    %225 = arith.addf %223, %224 : vector<1x128xf32>
    %226 = math.tanh %225 : vector<1x128xf32>
    %227 = arith.mulf %220, %226 : vector<1x128xf32>
    %228 = arith.truncf %227 : vector<1x128xf32> to vector<1x128xbf16>
    %cst_67 = arith.constant dense<0.000000e+00> : vector<1x512xf32>
    %229 = tpu.matmul %228, %8, %cst_67 {dimension_numbers = #tpu.dot_dimension_numbers<[1], [0], [0], [1], [0, 0, 1, 1], [], []>} : vector<1x128xbf16>, vector<128x512xbf16>, vector<1x512xf32> -> vector<1x512xf32>
    %230 = arith.addf %205, %229 : vector<1x512xf32>
    %231 = arith.addf %230, %10 : vector<1x512xf32>
    %232 = vector.extract_strided_slice %231 {offsets = [0, 0], sizes = [1, 384], strides = [1, 1]} : vector<1x512xf32> to vector<1x384xf32>
    %cst_68 = arith.constant 5.000000e-01 : f32
    %233 = vector.broadcast %cst_68 : f32 to vector<1x384xf32>
    %234 = arith.mulf %233, %232 : vector<1x384xf32>
    %235 = math.tanh %234 : vector<1x384xf32>
    %cst_69 = arith.constant 5.000000e-01 : f32
    %236 = vector.broadcast %cst_69 : f32 to vector<1x384xf32>
    %237 = arith.mulf %236, %235 : vector<1x384xf32>
    %cst_70 = arith.constant 5.000000e-01 : f32
    %238 = vector.broadcast %cst_70 : f32 to vector<1x384xf32>
    %239 = arith.addf %237, %238 : vector<1x384xf32>
    %240 = vector.extract_strided_slice %239 {offsets = [0, 0], sizes = [1, 128], strides = [1, 1]} : vector<1x384xf32> to vector<1x128xf32>
    %241 = vector.extract_strided_slice %239 {offsets = [0, 128], sizes = [1, 128], strides = [1, 1]} : vector<1x384xf32> to vector<1x128xf32>
    %242 = vector.extract_strided_slice %239 {offsets = [0, 256], sizes = [1, 128], strides = [1, 1]} : vector<1x384xf32> to vector<1x128xf32>
    %243 = vector.extract_strided_slice %231 {offsets = [0, 384], sizes = [1, 128], strides = [1, 1]} : vector<1x512xf32> to vector<1x128xf32>
    %244 = math.tanh %243 : vector<1x128xf32>
    %245 = arith.mulf %241, %199 : vector<1x128xf32>
    %246 = arith.mulf %240, %244 : vector<1x128xf32>
    %247 = arith.addf %245, %246 : vector<1x128xf32>
    %248 = math.tanh %247 : vector<1x128xf32>
    %249 = arith.mulf %242, %248 : vector<1x128xf32>
    %250 = arith.truncf %249 : vector<1x128xf32> to vector<1x128xbf16>
    %251 = arith.index_cast %c4_i32 : i32 to index
    %c0_71 = arith.constant 0 : index
    %252 = vector.load %arg11[%251, %c0_71] : memref<8x128xf32, #tpu.memory_space<vmem>>, vector<1x128xf32>
    tpu.vector_store %arg11[%251, %c0_71], %249 {strides = array<i32>} : memref<8x128xf32, #tpu.memory_space<vmem>>, vector<1x128xf32>,
    %c5_i32 = arith.constant 5 : i32
    %cst_72 = arith.constant dense<0.000000e+00> : vector<1x512xf32>
    %253 = tpu.matmul %250, %9, %cst_72 {dimension_numbers = #tpu.dot_dimension_numbers<[1], [0], [0], [1], [0, 0, 1, 1], [], []>} : vector<1x128xbf16>, vector<128x512xbf16>, vector<1x512xf32> -> vector<1x512xf32>
    %254 = arith.index_cast %c5_i32 : i32 to index
    %c0_73 = arith.constant 0 : index
    %255 = vector.load %arg10[%254, %c0_73] : memref<8x512xf32, #tpu.memory_space<vmem>>, vector<1x512xf32>
    %cst_74 = arith.constant dense<0.000000e+00> : vector<1x512xf32>
    %256 = tpu.matmul %228, %7, %cst_74 {dimension_numbers = #tpu.dot_dimension_numbers<[1], [0], [0], [1], [0, 0, 1, 1], [], []>} : vector<1x128xbf16>, vector<128x512xbf16>, vector<1x512xf32> -> vector<1x512xf32>
    %257 = arith.addf %255, %256 : vector<1x512xf32>
    %258 = vector.extract_strided_slice %257 {offsets = [0, 0], sizes = [1, 384], strides = [1, 1]} : vector<1x512xf32> to vector<1x384xf32>
    %cst_75 = arith.constant 5.000000e-01 : f32
    %259 = vector.broadcast %cst_75 : f32 to vector<1x384xf32>
    %260 = arith.mulf %259, %258 : vector<1x384xf32>
    %261 = math.tanh %260 : vector<1x384xf32>
    %cst_76 = arith.constant 5.000000e-01 : f32
    %262 = vector.broadcast %cst_76 : f32 to vector<1x384xf32>
    %263 = arith.mulf %262, %261 : vector<1x384xf32>
    %cst_77 = arith.constant 5.000000e-01 : f32
    %264 = vector.broadcast %cst_77 : f32 to vector<1x384xf32>
    %265 = arith.addf %263, %264 : vector<1x384xf32>
    %266 = vector.extract_strided_slice %265 {offsets = [0, 0], sizes = [1, 128], strides = [1, 1]} : vector<1x384xf32> to vector<1x128xf32>
    %267 = vector.extract_strided_slice %265 {offsets = [0, 128], sizes = [1, 128], strides = [1, 1]} : vector<1x384xf32> to vector<1x128xf32>
    %268 = vector.extract_strided_slice %265 {offsets = [0, 256], sizes = [1, 128], strides = [1, 1]} : vector<1x384xf32> to vector<1x128xf32>
    %269 = vector.extract_strided_slice %257 {offsets = [0, 384], sizes = [1, 128], strides = [1, 1]} : vector<1x512xf32> to vector<1x128xf32>
    %270 = math.tanh %269 : vector<1x128xf32>
    %271 = arith.mulf %267, %225 : vector<1x128xf32>
    %272 = arith.mulf %266, %270 : vector<1x128xf32>
    %273 = arith.addf %271, %272 : vector<1x128xf32>
    %274 = math.tanh %273 : vector<1x128xf32>
    %275 = arith.mulf %268, %274 : vector<1x128xf32>
    %276 = arith.truncf %275 : vector<1x128xf32> to vector<1x128xbf16>
    %cst_78 = arith.constant dense<0.000000e+00> : vector<1x512xf32>
    %277 = tpu.matmul %276, %8, %cst_78 {dimension_numbers = #tpu.dot_dimension_numbers<[1], [0], [0], [1], [0, 0, 1, 1], [], []>} : vector<1x128xbf16>, vector<128x512xbf16>, vector<1x512xf32> -> vector<1x512xf32>
    %278 = arith.addf %253, %277 : vector<1x512xf32>
    %279 = arith.addf %278, %10 : vector<1x512xf32>
    %280 = vector.extract_strided_slice %279 {offsets = [0, 0], sizes = [1, 384], strides = [1, 1]} : vector<1x512xf32> to vector<1x384xf32>
    %cst_79 = arith.constant 5.000000e-01 : f32
    %281 = vector.broadcast %cst_79 : f32 to vector<1x384xf32>
    %282 = arith.mulf %281, %280 : vector<1x384xf32>
    %283 = math.tanh %282 : vector<1x384xf32>
    %cst_80 = arith.constant 5.000000e-01 : f32
    %284 = vector.broadcast %cst_80 : f32 to vector<1x384xf32>
    %285 = arith.mulf %284, %283 : vector<1x384xf32>
    %cst_81 = arith.constant 5.000000e-01 : f32
    %286 = vector.broadcast %cst_81 : f32 to vector<1x384xf32>
    %287 = arith.addf %285, %286 : vector<1x384xf32>
    %288 = vector.extract_strided_slice %287 {offsets = [0, 0], sizes = [1, 128], strides = [1, 1]} : vector<1x384xf32> to vector<1x128xf32>
    %289 = vector.extract_strided_slice %287 {offsets = [0, 128], sizes = [1, 128], strides = [1, 1]} : vector<1x384xf32> to vector<1x128xf32>
    %290 = vector.extract_strided_slice %287 {offsets = [0, 256], sizes = [1, 128], strides = [1, 1]} : vector<1x384xf32> to vector<1x128xf32>
    %291 = vector.extract_strided_slice %279 {offsets = [0, 384], sizes = [1, 128], strides = [1, 1]} : vector<1x512xf32> to vector<1x128xf32>
    %292 = math.tanh %291 : vector<1x128xf32>
    %293 = arith.mulf %289, %247 : vector<1x128xf32>
    %294 = arith.mulf %288, %292 : vector<1x128xf32>
    %295 = arith.addf %293, %294 : vector<1x128xf32>
    %296 = math.tanh %295 : vector<1x128xf32>
    %297 = arith.mulf %290, %296 : vector<1x128xf32>
    %298 = arith.truncf %297 : vector<1x128xf32> to vector<1x128xbf16>
    %299 = arith.index_cast %c5_i32 : i32 to index
    %c0_82 = arith.constant 0 : index
    %300 = vector.load %arg11[%299, %c0_82] : memref<8x128xf32, #tpu.memory_space<vmem>>, vector<1x128xf32>
    tpu.vector_store %arg11[%299, %c0_82], %297 {strides = array<i32>} : memref<8x128xf32, #tpu.memory_space<vmem>>, vector<1x128xf32>,
    %c6_i32 = arith.constant 6 : i32
    %cst_83 = arith.constant dense<0.000000e+00> : vector<1x512xf32>
    %301 = tpu.matmul %298, %9, %cst_83 {dimension_numbers = #tpu.dot_dimension_numbers<[1], [0], [0], [1], [0, 0, 1, 1], [], []>} : vector<1x128xbf16>, vector<128x512xbf16>, vector<1x512xf32> -> vector<1x512xf32>
    %302 = arith.index_cast %c6_i32 : i32 to index
    %c0_84 = arith.constant 0 : index
    %303 = vector.load %arg10[%302, %c0_84] : memref<8x512xf32, #tpu.memory_space<vmem>>, vector<1x512xf32>
    %cst_85 = arith.constant dense<0.000000e+00> : vector<1x512xf32>
    %304 = tpu.matmul %276, %7, %cst_85 {dimension_numbers = #tpu.dot_dimension_numbers<[1], [0], [0], [1], [0, 0, 1, 1], [], []>} : vector<1x128xbf16>, vector<128x512xbf16>, vector<1x512xf32> -> vector<1x512xf32>
    %305 = arith.addf %303, %304 : vector<1x512xf32>
    %306 = vector.extract_strided_slice %305 {offsets = [0, 0], sizes = [1, 384], strides = [1, 1]} : vector<1x512xf32> to vector<1x384xf32>
    %cst_86 = arith.constant 5.000000e-01 : f32
    %307 = vector.broadcast %cst_86 : f32 to vector<1x384xf32>
    %308 = arith.mulf %307, %306 : vector<1x384xf32>
    %309 = math.tanh %308 : vector<1x384xf32>
    %cst_87 = arith.constant 5.000000e-01 : f32
    %310 = vector.broadcast %cst_87 : f32 to vector<1x384xf32>
    %311 = arith.mulf %310, %309 : vector<1x384xf32>
    %cst_88 = arith.constant 5.000000e-01 : f32
    %312 = vector.broadcast %cst_88 : f32 to vector<1x384xf32>
    %313 = arith.addf %311, %312 : vector<1x384xf32>
    %314 = vector.extract_strided_slice %313 {offsets = [0, 0], sizes = [1, 128], strides = [1, 1]} : vector<1x384xf32> to vector<1x128xf32>
    %315 = vector.extract_strided_slice %313 {offsets = [0, 128], sizes = [1, 128], strides = [1, 1]} : vector<1x384xf32> to vector<1x128xf32>
    %316 = vector.extract_strided_slice %313 {offsets = [0, 256], sizes = [1, 128], strides = [1, 1]} : vector<1x384xf32> to vector<1x128xf32>
    %317 = vector.extract_strided_slice %305 {offsets = [0, 384], sizes = [1, 128], strides = [1, 1]} : vector<1x512xf32> to vector<1x128xf32>
    %318 = math.tanh %317 : vector<1x128xf32>
    %319 = arith.mulf %315, %273 : vector<1x128xf32>
    %320 = arith.mulf %314, %318 : vector<1x128xf32>
    %321 = arith.addf %319, %320 : vector<1x128xf32>
    %322 = math.tanh %321 : vector<1x128xf32>
    %323 = arith.mulf %316, %322 : vector<1x128xf32>
    %324 = arith.truncf %323 : vector<1x128xf32> to vector<1x128xbf16>
    %cst_89 = arith.constant dense<0.000000e+00> : vector<1x512xf32>
    %325 = tpu.matmul %324, %8, %cst_89 {dimension_numbers = #tpu.dot_dimension_numbers<[1], [0], [0], [1], [0, 0, 1, 1], [], []>} : vector<1x128xbf16>, vector<128x512xbf16>, vector<1x512xf32> -> vector<1x512xf32>
    %326 = arith.addf %301, %325 : vector<1x512xf32>
    %327 = arith.addf %326, %10 : vector<1x512xf32>
    %328 = vector.extract_strided_slice %327 {offsets = [0, 0], sizes = [1, 384], strides = [1, 1]} : vector<1x512xf32> to vector<1x384xf32>
    %cst_90 = arith.constant 5.000000e-01 : f32
    %329 = vector.broadcast %cst_90 : f32 to vector<1x384xf32>
    %330 = arith.mulf %329, %328 : vector<1x384xf32>
    %331 = math.tanh %330 : vector<1x384xf32>
    %cst_91 = arith.constant 5.000000e-01 : f32
    %332 = vector.broadcast %cst_91 : f32 to vector<1x384xf32>
    %333 = arith.mulf %332, %331 : vector<1x384xf32>
    %cst_92 = arith.constant 5.000000e-01 : f32
    %334 = vector.broadcast %cst_92 : f32 to vector<1x384xf32>
    %335 = arith.addf %333, %334 : vector<1x384xf32>
    %336 = vector.extract_strided_slice %335 {offsets = [0, 0], sizes = [1, 128], strides = [1, 1]} : vector<1x384xf32> to vector<1x128xf32>
    %337 = vector.extract_strided_slice %335 {offsets = [0, 128], sizes = [1, 128], strides = [1, 1]} : vector<1x384xf32> to vector<1x128xf32>
    %338 = vector.extract_strided_slice %335 {offsets = [0, 256], sizes = [1, 128], strides = [1, 1]} : vector<1x384xf32> to vector<1x128xf32>
    %339 = vector.extract_strided_slice %327 {offsets = [0, 384], sizes = [1, 128], strides = [1, 1]} : vector<1x512xf32> to vector<1x128xf32>
    %340 = math.tanh %339 : vector<1x128xf32>
    %341 = arith.mulf %337, %295 : vector<1x128xf32>
    %342 = arith.mulf %336, %340 : vector<1x128xf32>
    %343 = arith.addf %341, %342 : vector<1x128xf32>
    %344 = math.tanh %343 : vector<1x128xf32>
    %345 = arith.mulf %338, %344 : vector<1x128xf32>
    %346 = arith.truncf %345 : vector<1x128xf32> to vector<1x128xbf16>
    %347 = arith.index_cast %c6_i32 : i32 to index
    %c0_93 = arith.constant 0 : index
    %348 = vector.load %arg11[%347, %c0_93] : memref<8x128xf32, #tpu.memory_space<vmem>>, vector<1x128xf32>
    tpu.vector_store %arg11[%347, %c0_93], %345 {strides = array<i32>} : memref<8x128xf32, #tpu.memory_space<vmem>>, vector<1x128xf32>,
    %c7_i32 = arith.constant 7 : i32
    %cst_94 = arith.constant dense<0.000000e+00> : vector<1x512xf32>
    %349 = tpu.matmul %346, %9, %cst_94 {dimension_numbers = #tpu.dot_dimension_numbers<[1], [0], [0], [1], [0, 0, 1, 1], [], []>} : vector<1x128xbf16>, vector<128x512xbf16>, vector<1x512xf32> -> vector<1x512xf32>
    %350 = arith.index_cast %c7_i32 : i32 to index
    %c0_95 = arith.constant 0 : index
    %351 = vector.load %arg10[%350, %c0_95] : memref<8x512xf32, #tpu.memory_space<vmem>>, vector<1x512xf32>
    %cst_96 = arith.constant dense<0.000000e+00> : vector<1x512xf32>
    %352 = tpu.matmul %324, %7, %cst_96 {dimension_numbers = #tpu.dot_dimension_numbers<[1], [0], [0], [1], [0, 0, 1, 1], [], []>} : vector<1x128xbf16>, vector<128x512xbf16>, vector<1x512xf32> -> vector<1x512xf32>
    %353 = arith.addf %351, %352 : vector<1x512xf32>
    %354 = vector.extract_strided_slice %353 {offsets = [0, 0], sizes = [1, 384], strides = [1, 1]} : vector<1x512xf32> to vector<1x384xf32>
    %cst_97 = arith.constant 5.000000e-01 : f32
    %355 = vector.broadcast %cst_97 : f32 to vector<1x384xf32>
    %356 = arith.mulf %355, %354 : vector<1x384xf32>
    %357 = math.tanh %356 : vector<1x384xf32>
    %cst_98 = arith.constant 5.000000e-01 : f32
    %358 = vector.broadcast %cst_98 : f32 to vector<1x384xf32>
    %359 = arith.mulf %358, %357 : vector<1x384xf32>
    %cst_99 = arith.constant 5.000000e-01 : f32
    %360 = vector.broadcast %cst_99 : f32 to vector<1x384xf32>
    %361 = arith.addf %359, %360 : vector<1x384xf32>
    %362 = vector.extract_strided_slice %361 {offsets = [0, 0], sizes = [1, 128], strides = [1, 1]} : vector<1x384xf32> to vector<1x128xf32>
    %363 = vector.extract_strided_slice %361 {offsets = [0, 128], sizes = [1, 128], strides = [1, 1]} : vector<1x384xf32> to vector<1x128xf32>
    %364 = vector.extract_strided_slice %361 {offsets = [0, 256], sizes = [1, 128], strides = [1, 1]} : vector<1x384xf32> to vector<1x128xf32>
    %365 = vector.extract_strided_slice %353 {offsets = [0, 384], sizes = [1, 128], strides = [1, 1]} : vector<1x512xf32> to vector<1x128xf32>
    %366 = math.tanh %365 : vector<1x128xf32>
    %367 = arith.mulf %363, %321 : vector<1x128xf32>
    %368 = arith.mulf %362, %366 : vector<1x128xf32>
    %369 = arith.addf %367, %368 : vector<1x128xf32>
    %370 = math.tanh %369 : vector<1x128xf32>
    %371 = arith.mulf %364, %370 : vector<1x128xf32>
    %372 = arith.truncf %371 : vector<1x128xf32> to vector<1x128xbf16>
    %cst_100 = arith.constant dense<0.000000e+00> : vector<1x512xf32>
    %373 = tpu.matmul %372, %8, %cst_100 {dimension_numbers = #tpu.dot_dimension_numbers<[1], [0], [0], [1], [0, 0, 1, 1], [], []>} : vector<1x128xbf16>, vector<128x512xbf16>, vector<1x512xf32> -> vector<1x512xf32>
    %374 = arith.addf %349, %373 : vector<1x512xf32>
    %375 = arith.addf %374, %10 : vector<1x512xf32>
    %376 = vector.extract_strided_slice %375 {offsets = [0, 0], sizes = [1, 384], strides = [1, 1]} : vector<1x512xf32> to vector<1x384xf32>
    %cst_101 = arith.constant 5.000000e-01 : f32
    %377 = vector.broadcast %cst_101 : f32 to vector<1x384xf32>
    %378 = arith.mulf %377, %376 : vector<1x384xf32>
    %379 = math.tanh %378 : vector<1x384xf32>
    %cst_102 = arith.constant 5.000000e-01 : f32
    %380 = vector.broadcast %cst_102 : f32 to vector<1x384xf32>
    %381 = arith.mulf %380, %379 : vector<1x384xf32>
    %cst_103 = arith.constant 5.000000e-01 : f32
    %382 = vector.broadcast %cst_103 : f32 to vector<1x384xf32>
    %383 = arith.addf %381, %382 : vector<1x384xf32>
    %384 = vector.extract_strided_slice %383 {offsets = [0, 0], sizes = [1, 128], strides = [1, 1]} : vector<1x384xf32> to vector<1x128xf32>
    %385 = vector.extract_strided_slice %383 {offsets = [0, 128], sizes = [1, 128], strides = [1, 1]} : vector<1x384xf32> to vector<1x128xf32>
    %386 = vector.extract_strided_slice %383 {offsets = [0, 256], sizes = [1, 128], strides = [1, 1]} : vector<1x384xf32> to vector<1x128xf32>
    %387 = vector.extract_strided_slice %375 {offsets = [0, 384], sizes = [1, 128], strides = [1, 1]} : vector<1x512xf32> to vector<1x128xf32>
    %388 = math.tanh %387 : vector<1x128xf32>
    %389 = arith.mulf %385, %343 : vector<1x128xf32>
    %390 = arith.mulf %384, %388 : vector<1x128xf32>
    %391 = arith.addf %389, %390 : vector<1x128xf32>
    %392 = math.tanh %391 : vector<1x128xf32>
    %393 = arith.mulf %386, %392 : vector<1x128xf32>
    %394 = arith.truncf %393 : vector<1x128xf32> to vector<1x128xbf16>
    %395 = arith.index_cast %c7_i32 : i32 to index
    %c0_104 = arith.constant 0 : index
    %396 = vector.load %arg11[%395, %c0_104] : memref<8x128xf32, #tpu.memory_space<vmem>>, vector<1x128xf32>
    tpu.vector_store %arg11[%395, %c0_104], %393 {strides = array<i32>} : memref<8x128xf32, #tpu.memory_space<vmem>>, vector<1x128xf32>,
    %c8_i32 = arith.constant 8 : i32
    %c0_105 = arith.constant 0 : index
    %c0_106 = arith.constant 0 : index
    %397 = vector.load %arg11[%c0_105, %c0_106] : memref<8x128xf32, #tpu.memory_space<vmem>>, vector<8x128xf32>
    %398 = arith.truncf %397 : vector<8x128xf32> to vector<8x128xbf16>
    %c0_107 = arith.constant 0 : index
    %c0_108 = arith.constant 0 : index
    %399 = vector.load %arg7[%c0_107, %c0_108] : memref<128x128xbf16, #tpu.memory_space<vmem>>, vector<128x128xbf16>
    %cst_109 = arith.constant dense<0.000000e+00> : vector<8x128xf32>
    %400 = tpu.matmul %398, %399, %cst_109 {dimension_numbers = #tpu.dot_dimension_numbers<[1], [0], [0], [1], [0, 0, 1, 1], [], []>} : vector<8x128xbf16>, vector<128x128xbf16>, vector<8x128xf32> -> vector<8x128xf32>
    %c0_110 = arith.constant 0 : index
    %c0_111 = arith.constant 0 : index
    %401 = vector.load %arg8[%c0_110, %c0_111] : memref<1x128xf32, #tpu.memory_space<vmem>>, vector<1x128xf32>
    %402 = vector.broadcast %401 : vector<1x128xf32> to vector<8x128xf32>
    %403 = arith.addf %400, %402 : vector<8x128xf32>
    %cst_112 = arith.constant 5.000000e-01 : f32
    %404 = vector.broadcast %cst_112 : f32 to vector<8x128xf32>
    %405 = arith.mulf %404, %403 : vector<8x128xf32>
    %406 = math.tanh %405 : vector<8x128xf32>
    %cst_113 = arith.constant 5.000000e-01 : f32
    %407 = vector.broadcast %cst_113 : f32 to vector<8x128xf32>
    %408 = arith.mulf %407, %406 : vector<8x128xf32>
    %cst_114 = arith.constant 5.000000e-01 : f32
    %409 = vector.broadcast %cst_114 : f32 to vector<8x128xf32>
    %410 = arith.addf %408, %409 : vector<8x128xf32>
    %c0_115 = arith.constant 0 : index
    %c0_116 = arith.constant 0 : index
    %411 = vector.load %arg9[%c0_115, %c0_116] : memref<8x128xf32, #tpu.memory_space<vmem>>, vector<8x128xf32>
    tpu.vector_store %arg9[%c0_115, %c0_116], %410 {strides = array<i32>} : memref<8x128xf32, #tpu.memory_space<vmem>>, vector<8x128xf32>,
    return
  }
}

</mosaic_0001>

<bundles_post_ra>
// kernel: tpu_custom_call.1
= control target key start
LH: loop header
LB: loop body
LE: loop exit
PB: predicated region body
PF: predicated region fallthrough
CT: control target
= control target key end

     0   :  { %14 = vsyncpa [#allocation5], 0  ;;  %s6151_s0 = inlined_call_operand.hbm [shape: f32[8,8], index: 0, kind: input, shape index: {}]   ;;  %s6152_s1 = inlined_call_operand.hbm [shape: f32[8,512], index: 1, kind: input, shape index: {}]   ;;  %s6153_s2 = inlined_call_operand.vmem [shape: f32[1,512], index: 2, kind: input, shape index: {}]   ;;  %s6154_s3 = inlined_call_operand.hbm [shape: bf16[128,512], index: 3, kind: input, shape index: {}]   ;;  %s6155_s4 = inlined_call_operand.hbm [shape: bf16[128,512], index: 4, kind: input, shape index: {}]   ;;  %s6156_s5 = inlined_call_operand.hbm [shape: bf16[128,512], index: 5, kind: input, shape index: {}]   ;;  %s6157_s6 = inlined_call_operand.vmem [shape: f32[1,512], index: 6, kind: input, shape index: {}]   ;;  %s6158_s7 = inlined_call_operand.hbm [shape: bf16[128,128], index: 7, kind: input, shape index: {}]   ;;  %s6159_s8 = inlined_call_operand.vmem [shape: f32[1,128], index: 8, kind: input, shape index: {}]   ;;  %s6160_s9 = inlined_call_operand.hbm [shape: f32[8,128], index: 9, kind: output, shape index: {}]  }
   0x1   :  { %15 = vsyncpa [#allocation8], 0 }
   0x2   :  { %16 = vsyncpa [#allocation11], 0 }
   0x3   :  { %17 = vsyncpa [#allocation14], 0 }
   0x4   :  { %18 = vsyncpa [#allocation6], 0  ;;  %s4378_s30 = smov [#allocation7]   ;;  %s4214_s13 = scalar_lea.hbm %s6152_s1, 512 }
   0x5   :  { %s35_s10 = sshll.u32 %s4378_s30, 4  ;;  %p4215_p0 = scmp.ne.s32.totalorder %s6152_s1, %s4214_s13  ;;  %s36_s10 = int_to_ptr.vmem [resolvable:$true] %s35_s10 }
   0x6   :  { %p4218_p1 = scmp.lt.u32.totalorder %s4214_s13, %s6152_s1 }
   0x8   :  { %p4220_p2 = pnand %p4218_p1, %p4215_p0 }
   0xa   :  { %4223 = shalt.err (!%p4220_p2)
}
   0xb   :  { %s4224_s18 = scalar_lea.vmem %s36_s10, 512  ;;  %p4229_p4 = scmp.lt.s32.totalorder %s36_s10, %s36_s10 }
   0xc   :  { %p4225_p3 = scmp.ne.s32.totalorder %s36_s10, %s4224_s18  ;;  %p4230_p5 = scmp.lt.s32.totalorder %s4224_s18, %s4224_s18 }
   0xe   :  { %p4231_p6 = por %p4230_p5, %p4229_p4 }
  0x10   :  { %p4232_p7 = pnand %p4231_p6, %p4225_p3 }
  0x12   :  { %4235 = shalt.err (!%p4232_p7)
}
  0x13   :  { %38 = dma.hbm_to_vmem [thread:$0]  %s6152_s1, 512, %s36_s10, [#allocation8]  }
  0x14   :  { %s4379_s21 = smov [#allocation10]   ;;  %s4380_s23 = smov [#allocation4]  }
  0x15   :  { %s58_s22 = sshll.u32 %s4379_s21, 4  ;;  %s25_s24 = sshll.u32 %s4380_s23, 4  ;;  %s59_s22 = int_to_ptr.vmem [resolvable:$true] %s58_s22  ;;  %s26_s24 = int_to_ptr.vmem [resolvable:$true] %s25_s24 }
  0x16   :  { %s4236_s27 = scalar_lea.hbm %s6155_s4, 4096 }
  0x17   :  { %p4237_p8 = scmp.ne.s32.totalorder %s6155_s4, %s4236_s27  ;;  %p4240_p9 = scmp.lt.u32.totalorder %s4236_s27, %s6155_s4 }
  0x19   :  { %p4242_p10 = pnand %p4240_p9, %p4237_p8 }
  0x1b   :  { %4245 = shalt.err (!%p4242_p10)
}
  0x1c   :  { %s4246_s1 = scalar_lea.vmem %s59_s22, 4096  ;;  %p4251_p12 = scmp.lt.s32.totalorder %s59_s22, %s59_s22 }
  0x1d   :  { %p4247_p11 = scmp.ne.s32.totalorder %s59_s22, %s4246_s1  ;;  %p4252_p13 = scmp.lt.s32.totalorder %s4246_s1, %s4246_s1 }
  0x1f   :  { %p4253_p0 = por %p4252_p13, %p4251_p12 }
  0x21   :  { %p4254_p1 = pnand %p4253_p0, %p4247_p11 }
  0x23   :  { %4257 = shalt.err (!%p4254_p1)
}
  0x24   :  { %s4381_s10 = smov 256   ;;  %s4382_s12 = smov 16  }
  0x25   :  { %64 = dma.hbm_to_vmem [thread:$0]  %s6155_s4, 4096, %s59_s22, [#allocation11], %s4381_s10, %s4381_s10, %s4382_s12  }
  0x26   :  { %s4258_s17 = scalar_lea.hbm %s6151_s0, 128 }
  0x27   :  { %p4259_p2 = scmp.ne.s32.totalorder %s6151_s0, %s4258_s17  ;;  %p4262_p3 = scmp.lt.u32.totalorder %s4258_s17, %s6151_s0 }
  0x29   :  { %p4264_p4 = pnand %p4262_p3, %p4259_p2 }
  0x2b   :  { %4267 = shalt.err (!%p4264_p4)
}
  0x2c   :  { %s4268_s23 = scalar_lea.vmem %s26_s24, 128  ;;  %p4273_p6 = scmp.lt.s32.totalorder %s26_s24, %s26_s24 }
  0x2d   :  { %p4269_p5 = scmp.ne.s32.totalorder %s26_s24, %s4268_s23  ;;  %p4274_p7 = scmp.lt.s32.totalorder %s4268_s23, %s4268_s23 }
  0x2f   :  { %p4275_p8 = por %p4274_p7, %p4273_p6 }
  0x31   :  { %p4276_p9 = pnand %p4275_p8, %p4269_p5 }
  0x33   :  { %4279 = shalt.err (!%p4276_p9)
}
  0x34   :  { %28 = dma.hbm_to_vmem [thread:$0]  %s6151_s0, 128, %s26_s24, [#allocation5]  }
  0x35   :  { %s4383_s25 = smov [#allocation9]   ;;  %s4384_s27 = smov [#allocation12]  }
  0x36   :  { %s46_s26 = sshll.u32 %s4383_s25, 4  ;;  %s70_s28 = sshll.u32 %s4384_s27, 4  ;;  %s47_s26 = int_to_ptr.vmem [resolvable:$true] %s46_s26  ;;  %s71_s28 = int_to_ptr.vmem [resolvable:$true] %s70_s28 }
  0x37   :  { %s4280_s11 = scalar_lea.hbm %s6154_s3, 4096 }
  0x38   :  { %p4281_p10 = scmp.ne.s32.totalorder %s6154_s3, %s4280_s11  ;;  %p4284_p11 = scmp.lt.u32.totalorder %s4280_s11, %s6154_s3 }
  0x3a   :  { %p4286_p12 = pnand %p4284_p11, %p4281_p10 }
  0x3c   :  { %4289 = shalt.err (!%p4286_p12)
}
  0x3d   :  { %s4290_s0 = scalar_lea.vmem %s47_s26, 4096  ;;  %p4295_p0 = scmp.lt.s32.totalorder %s47_s26, %s47_s26 }
  0x3e   :  { %p4291_p13 = scmp.ne.s32.totalorder %s47_s26, %s4290_s0  ;;  %p4296_p1 = scmp.lt.s32.totalorder %s4290_s0, %s4290_s0 }
  0x40   :  { %p4297_p2 = por %p4296_p1, %p4295_p0 }
  0x42   :  { %p4298_p3 = pnand %p4297_p2, %p4291_p13 }
  0x44   :  { %4301 = shalt.err (!%p4298_p3)
}
  0x45   :  { %52 = dma.hbm_to_vmem [thread:$0]  %s6154_s3, 4096, %s47_s26, [#allocation8], %s4381_s10, %s4381_s10, %s4382_s12  }
  0x46   :  { %s4302_s19 = scalar_lea.hbm %s6156_s5, 4096 }
  0x47   :  { %p4303_p4 = scmp.ne.s32.totalorder %s6156_s5, %s4302_s19  ;;  %p4306_p5 = scmp.lt.u32.totalorder %s4302_s19, %s6156_s5 }
  0x49   :  { %p4308_p6 = pnand %p4306_p5, %p4303_p4 }
  0x4b   :  { %4311 = shalt.err (!%p4308_p6)
}
  0x4c   :  { %s4312_s22 = scalar_lea.vmem %s71_s28, 4096  ;;  %p4317_p8 = scmp.lt.s32.totalorder %s71_s28, %s71_s28 }
  0x4d   :  { %p4313_p7 = scmp.ne.s32.totalorder %s71_s28, %s4312_s22  ;;  %p4318_p9 = scmp.lt.s32.totalorder %s4312_s22, %s4312_s22 }
  0x4f   :  { %p4319_p10 = por %p4318_p9, %p4317_p8 }
  0x51   :  { %p4320_p11 = pnand %p4319_p10, %p4313_p7 }
  0x53   :  { %4323 = shalt.err (!%p4320_p11)
}
  0x54   :  { %76 = dma.hbm_to_vmem [thread:$0]  %s6156_s5, 4096, %s71_s28, [#allocation11], %s4381_s10, %s4381_s10, %s4382_s12  }
  0x55   :  { %s4385_s26 = smov [#allocation13]   ;;  %s4324_s11 = scalar_lea.hbm %s6158_s7, 1024 }
  0x56   :  { %s84_s27 = sshll.u32 %s4385_s26, 4  ;;  %p4325_p12 = scmp.ne.s32.totalorder %s6158_s7, %s4324_s11  ;;  %s85_s27 = int_to_ptr.vmem [resolvable:$true] %s84_s27 }
  0x57   :  { %p4328_p13 = scmp.lt.u32.totalorder %s4324_s11, %s6158_s7 }
  0x59   :  { %p4330_p0 = pnand %p4328_p13, %p4325_p12 }
  0x5b   :  { %4333 = shalt.err (!%p4330_p0)
}
  0x5c   :  { %s4334_s0 = scalar_lea.vmem %s85_s27, 1024  ;;  %p4339_p2 = scmp.lt.s32.totalorder %s85_s27, %s85_s27 }
  0x5d   :  { %p4335_p1 = scmp.ne.s32.totalorder %s85_s27, %s4334_s0  ;;  %p4340_p3 = scmp.lt.s32.totalorder %s4334_s0, %s4334_s0 }
  0x5f   :  { %p4341_p4 = por %p4340_p3, %p4339_p2 }
  0x61   :  { %p4342_p5 = pnand %p4341_p4, %p4335_p1 }
  0x63   :  { %4345 = shalt.err (!%p4342_p5)
}
  0x64   :  { %s4386_s5 = smov 64   ;;  %s4387_s10 = smov 4  }
  0x65   :  { %90 = dma.hbm_to_vmem [thread:$0]  %s6158_s7, 1024, %s85_s27, [#allocation14], %s4386_s5, %s4386_s5, %s4387_s10  }
  0x66   :  { %4368 = dma.done.wait [#allocation5], 128  }
  0x67   :  { %4369 = vsyncadd [#allocation5], 4294967168 }
  0x68   :  { %4370 = dma.done.wait [#allocation8], 4608  }
  0x69   :  { %4371 = vsyncadd [#allocation8], 4294962688 }
  0x6a   :  { %4372 = dma.done.wait [#allocation11], 8192  }
  0x6b   :  { %4373 = vsyncadd [#allocation11], 4294959104 }
  0x6c   :  { %4374 = dma.done.wait [#allocation14], 1024  }
  0x6d   :  { %4375 = vsyncadd [#allocation14], 4294966272  ;;  %v6161_v0 = vmov 0.0   ;;  %v6163_v1 = vmov 0   ;;  %v114_v2 = vld [vmem:[#allocation7 + $0x8] sm:$0xff]  ;;  %v113_v3 = vld [vmem:[#allocation7] sm:$0xff] }
  0x6e   :  { %207 = vmatprep.mubr.f32.mxu1 %v6161_v0  ;;  %579 = vmatprep.mubr.bf16.mxu0 %v6163_v1  ;;  %v112_v4 = vld [vmem:[#allocation4] sm:$0xff]  ;;  %vm139_vm0 = vcmask 64512   ;;  %v115_v6 = vld [vmem:[#allocation7 + $0x10] sm:$0xff]  ;;  %vm4391_vm1 = vmmov 0   ;;  %s4392_s18 = smov [#allocation15]  }
  0x6f   :  { %143 = vmatprep.subr.mxu1 %v114_v2  ;;  %v116_v5 = vld [vmem:[#allocation7 + $0x18] sm:$0xff]  ;;  %v4526_v7 = vld [vmem:[#allocation9 + $0x4] ss:$16 sps:$4 sm:$0xff]   ;;  %v4528_v8 = vld [vmem:[#allocation9] ss:$16 sps:$4 sm:$0xff]   ;;  %s3577_s19 = sshll.u32 %s4392_s18, 4  ;;  %s3578_s19 = int_to_ptr.vmem [resolvable:$true] %s3577_s19 }
  0x70   :  { %144 = vmatpush1.msra.mxu1 %v113_v3  ;;  %v4531_v9 = vld [vmem:[#allocation9 + $0xc] ss:$16 sps:$4 sm:$0xff]   ;;  %547 = vmatprep.subr.bf16.mxu0 %v4526_v7  ;;  %v4534_v10 = vld [vmem:[#allocation9 + $0x8] ss:$16 sps:$4 sm:$0xff]   ;;  %v4538_v11 = vld [vmem:[#allocation9 + $0x24] ss:$16 sps:$4 sm:$0xff]   ;;  %p4351_p7 = scmp.lt.s32.totalorder %s3578_s19, %s3578_s19 }
  0x71   :  { %3589 = vmatmul.mubr.msk.f32.vlgmr.msra.gmra.mrb[0].mxu1 %vm139_vm0, %v112_v4  ;;  %214 = vmatprep.subr.mxu1 %v116_v5  ;;  %v4540_v12 = vld [vmem:[#allocation9 + $0x20] ss:$16 sps:$4 sm:$0xff]   ;;  %v4543_v13 = vld [vmem:[#allocation9 + $0x2c] ss:$16 sps:$4 sm:$0xff]   ;;  %v4547_v14 = vld [vmem:[#allocation9 + $0x44] ss:$16 sps:$4 sm:$0xff]  }
  0x72   :  { %215 = vmatpush1.msra.mxu1 %v115_v6  ;;  %548 = vmatpush1.bf16.msra.mxu0 %v4528_v8  ;;  %v4550_v15 = vld [vmem:[#allocation9 + $0x28] ss:$16 sps:$4 sm:$0xff]   ;;  %v4555_v16 = vld [vmem:[#allocation9 + $0x40] ss:$16 sps:$4 sm:$0xff]   ;;  %v4557_v17 = vld [vmem:[#allocation9 + $0x4c] ss:$16 sps:$4 sm:$0xff]  }
  0x73   :  { %278 = vmatprep.mubr.f32.mxu1 %v6161_v0  ;;  %588 = vmatprep.subr.bf16.mxu1 %v4531_v9  ;;  %v4560_v18 = vld [vmem:[#allocation9 + $0x64] ss:$16 sps:$4 sm:$0xff]   ;;  %v4563_v19 = vld [vmem:[#allocation9 + $0x48] ss:$16 sps:$4 sm:$0xff]   ;;  %v4567_v20 = vld [vmem:[#allocation9 + $0x60] ss:$16 sps:$4 sm:$0xff]  }
  0x74   :  { %549 = vmatprep.subr.bf16.mxu0 %v4538_v11  ;;  %v4569_v21 = vld [vmem:[#allocation9 + $0x6c] ss:$16 sps:$4 sm:$0xff]   ;;  %v4572_v22 = vld [vmem:[#allocation9 + $0x84] ss:$16 sps:$4 sm:$0xff]   ;;  %v4575_v23 = vld [vmem:[#allocation9 + $0x68] ss:$16 sps:$4 sm:$0xff]  }
  0x75   :  { %3590 = vmatmul.mubr.msk.f32.vlgmr.msra.gmra.mrb[2].mxu1 %vm139_vm0, %v112_v4  ;;  %v4579_v24 = vld [vmem:[#allocation9 + $0x80] ss:$16 sps:$4 sm:$0xff]   ;;  %v4581_v25 = vld [vmem:[#allocation9 + $0x8c] ss:$16 sps:$4 sm:$0xff]   ;;  %v4584_v26 = vld [vmem:[#allocation9 + $0xa4] ss:$16 sps:$4 sm:$0xff]  }
  0x76   :  { %589 = vmatpush1.bf16.msra.mxu1 %v4534_v10  ;;  %620 = vmatprep.mubr.bf16.mxu1 %v6163_v1  ;;  %v4587_v27 = vld [vmem:[#allocation9 + $0x88] ss:$16 sps:$4 sm:$0xff]   ;;  %v4591_v28 = vld [vmem:[#allocation9 + $0xa0] ss:$16 sps:$4 sm:$0xff]   ;;  %v4593_v29 = vld [vmem:[#allocation9 + $0xac] ss:$16 sps:$4 sm:$0xff]  }
  0x77   :  { %550 = vmatpush1.bf16.msra.mxu0 %v4540_v12  ;;  %590 = vmatprep.subr.bf16.mxu1 %v4543_v13  ;;  %v4596_v30 = vld [vmem:[#allocation9 + $0xa8] ss:$16 sps:$4 sm:$0xff]   ;;  %v4598_v31 = vld [vmem:[#allocation9 + $0xc4] ss:$16 sps:$4 sm:$0xff]   ;;  %v4600_v32 = vld [vmem:[#allocation9 + $0xc0] ss:$16 sps:$4 sm:$0xff]  }
  0x78   :  { %551 = vmatprep.subr.bf16.mxu0 %v4547_v14  ;;  %v4602_v33 = vld [vmem:[#allocation9 + $0xcc] ss:$16 sps:$4 sm:$0xff]   ;;  %v4605_v34 = vld [vmem:[#allocation9 + $0xe4] ss:$16 sps:$4 sm:$0xff]   ;;  %v4610_v35 = vld [vmem:[#allocation9 + $0xc8] ss:$16 sps:$4 sm:$0xff]  }
  0x79   :  { %v4612_v36 = vld [vmem:[#allocation9 + $0xe0] ss:$16 sps:$4 sm:$0xff]   ;;  %v4614_v37 = vld [vmem:[#allocation9 + $0xec] ss:$16 sps:$4 sm:$0xff]   ;;  %v4620_v38 = vld [vmem:[#allocation9 + $0xe8] ss:$16 sps:$4 sm:$0xff]  }
  0x7a   :  { %591 = vmatpush1.bf16.msra.mxu1 %v4550_v15  ;;  %v4630_v39 = vld [vmem:[#allocation10 + $0x4] ss:$16 sps:$4 sm:$0xff]   ;;  %v4632_v40 = vld [vmem:[#allocation10 + $0xc] ss:$16 sps:$4 sm:$0xff]   ;;  %v4634_v41 = vld [vmem:[#allocation10] ss:$16 sps:$4 sm:$0xff]  }
  0x7b   :  { %552 = vmatpush1.bf16.msra.mxu0 %v4555_v16  ;;  %592 = vmatprep.subr.bf16.mxu1 %v4557_v17  ;;  %v4636_v42 = vld [vmem:[#allocation10 + $0x8] ss:$16 sps:$4 sm:$0xff]   ;;  %v4642_v43 = vld [vmem:[#allocation10 + $0x24] ss:$16 sps:$4 sm:$0xff]   ;;  %v4644_v44 = vld [vmem:[#allocation10 + $0x2c] ss:$16 sps:$4 sm:$0xff]  }
  0x7c   :  { %553 = vmatprep.subr.bf16.mxu0 %v4560_v18  ;;  %v4646_v45 = vld [vmem:[#allocation10 + $0x20] ss:$16 sps:$4 sm:$0xff]   ;;  %v4648_v46 = vld [vmem:[#allocation10 + $0x28] ss:$16 sps:$4 sm:$0xff]   ;;  %v4654_v47 = vld [vmem:[#allocation10 + $0x44] ss:$16 sps:$4 sm:$0xff]  }
  0x7d   :  { %v4656_v48 = vld [vmem:[#allocation10 + $0x4c] ss:$16 sps:$4 sm:$0xff]   ;;  %v4658_v49 = vld [vmem:[#allocation10 + $0x40] ss:$16 sps:$4 sm:$0xff]   ;;  %v4660_v50 = vld [vmem:[#allocation10 + $0x48] ss:$16 sps:$4 sm:$0xff]  }
  0x7e   :  { %593 = vmatpush1.bf16.msra.mxu1 %v4563_v19  ;;  %v4666_v51 = vld [vmem:[#allocation10 + $0x64] ss:$16 sps:$4 sm:$0xff]   ;;  %v4668_v52 = vld [vmem:[#allocation10 + $0x6c] ss:$16 sps:$4 sm:$0xff]   ;;  %v4670_v53 = vld [vmem:[#allocation10 + $0x60] ss:$16 sps:$4 sm:$0xff]  }
  0x7f   :  { %554 = vmatpush1.bf16.msra.mxu0 %v4567_v20  ;;  %594 = vmatprep.subr.bf16.mxu1 %v4569_v21  ;;  %6467 = vst [vmem:[#allocation21_spill] sm:$0xff] %v4666_v51  ;;  %6468 = vst [vmem:[#allocation22_spill] sm:$0xff] %v4668_v52  ;;  %v4672_v54 = vld [vmem:[#allocation10 + $0x68] ss:$16 sps:$4 sm:$0xff]   ;;  %v4678_v55 = vld [vmem:[#allocation10 + $0x84] ss:$16 sps:$4 sm:$0xff]  }
  0x80   :  { %555 = vmatprep.subr.bf16.mxu0 %v4572_v22  ;;  %6469 = vst [vmem:[#allocation23_spill] sm:$0xff] %v4670_v53  ;;  %6470 = vst [vmem:[#allocation24_spill] sm:$0xff] %v4672_v54  ;;  %v4680_v56 = vld [vmem:[#allocation10 + $0x8c] ss:$16 sps:$4 sm:$0xff]   ;;  %v4682_v57 = vld [vmem:[#allocation10 + $0x80] ss:$16 sps:$4 sm:$0xff]  }
  0x81   :  { %6471 = vst [vmem:[#allocation25_spill] sm:$0xff] %v4678_v55  ;;  %6472 = vst [vmem:[#allocation26_spill] sm:$0xff] %v4680_v56  ;;  %v4684_v58 = vld [vmem:[#allocation10 + $0x88] ss:$16 sps:$4 sm:$0xff]   ;;  %v4686_v59 = vld [vmem:[#allocation10 + $0xa4] ss:$16 sps:$4 sm:$0xff]  }
  0x82   :  { %595 = vmatpush1.bf16.msra.mxu1 %v4575_v23  ;;  %6473 = vst [vmem:[#allocation27_spill] sm:$0xff] %v4682_v57  ;;  %6474 = vst [vmem:[#allocation28_spill] sm:$0xff] %v4684_v58  ;;  %v4690_v60 = vld [vmem:[#allocation10 + $0xac] ss:$16 sps:$4 sm:$0xff]   ;;  %v4694_v61 = vld [vmem:[#allocation10 + $0xa0] ss:$16 sps:$4 sm:$0xff]  }
  0x83   :  { %556 = vmatpush1.bf16.msra.mxu0 %v4579_v24  ;;  %596 = vmatprep.subr.bf16.mxu1 %v4581_v25  ;;  %6475 = vst [vmem:[#allocation29_spill] sm:$0xff] %v4686_v59  ;;  %6476 = vst [vmem:[#allocation30_spill] sm:$0xff] %v4690_v60  ;;  %v4696_v62 = vld [vmem:[#allocation10 + $0xa8] ss:$16 sps:$4 sm:$0xff]   ;;  %v4700_v63 = vld [vmem:[#allocation10 + $0xc4] ss:$16 sps:$4 sm:$0xff]  }
  0x84   :  { %557 = vmatprep.subr.bf16.mxu0 %v4584_v26  ;;  %6477 = vst [vmem:[#allocation31_spill] sm:$0xff] %v4694_v61  ;;  %6478 = vst [vmem:[#allocation32_spill] sm:$0xff] %v4696_v62  ;;  %v4702_v2 = vld [vmem:[#allocation10 + $0xcc] ss:$16 sps:$4 sm:$0xff]   ;;  %v4706_v3 = vld [vmem:[#allocation10 + $0xc0] ss:$16 sps:$4 sm:$0xff]  }
  0x85   :  { %6479 = vst [vmem:[#allocation33_spill] sm:$0xff] %v4700_v63  ;;  %6480 = vst [vmem:[#allocation34_spill] sm:$0xff] %v4702_v2  ;;  %v4708_v4 = vld [vmem:[#allocation10 + $0xc8] ss:$16 sps:$4 sm:$0xff]   ;;  %v4712_v5 = vld [vmem:[#allocation10 + $0xe4] ss:$16 sps:$4 sm:$0xff]  }
  0x86   :  { %597 = vmatpush1.bf16.msra.mxu1 %v4587_v27  ;;  %6481 = vst [vmem:[#allocation35_spill] sm:$0xff] %v4706_v3  ;;  %6482 = vst [vmem:[#allocation36_spill] sm:$0xff] %v4708_v4  ;;  %v4714_v6 = vld [vmem:[#allocation10 + $0xec] ss:$16 sps:$4 sm:$0xff]   ;;  %v4718_v0 = vld [vmem:[#allocation10 + $0xe0] ss:$16 sps:$4 sm:$0xff]  }
  0x87   :  { %558 = vmatpush1.bf16.msra.mxu0 %v4591_v28  ;;  %598 = vmatprep.subr.bf16.mxu1 %v4593_v29  ;;  %6483 = vst [vmem:[#allocation37_spill] sm:$0xff] %v4712_v5  ;;  %6484 = vst [vmem:[#allocation38_spill] sm:$0xff] %v4714_v6  ;;  %s4346_s20 = scalar_lea.vmem %s3578_s19, 128 }
  0x88   :  { %559 = vmatprep.subr.bf16.mxu0 %v4598_v31  ;;  %6485 = vst [vmem:[#allocation39_spill] sm:$0xff] %v4718_v0  ;;  %p4347_p6 = scmp.ne.s32.totalorder %s3578_s19, %s4346_s20  ;;  %p4352_p8 = scmp.lt.s32.totalorder %s4346_s20, %s4346_s20 }
  0x8a   :  { %599 = vmatpush1.bf16.msra.mxu1 %v4596_v30  ;;  %p4353_p9 = por %p4352_p8, %p4351_p7 }
  0x8b   :  { %560 = vmatpush1.bf16.msra.mxu0 %v4600_v32  ;;  %600 = vmatprep.subr.bf16.mxu1 %v4602_v33 }
  0x8c   :  { %561 = vmatprep.subr.bf16.mxu0 %v4605_v34  ;;  %p4354_p10 = pnand %p4353_p9, %p4347_p6 }
  0x8e   :  { %601 = vmatpush1.bf16.msra.mxu1 %v4610_v35 }
  0x8f   :  { %562 = vmatpush1.bf16.msra.mxu0 %v4612_v36  ;;  %602 = vmatprep.subr.bf16.mxu1 %v4614_v37 }
  0x90   :  { %838 = vmatprep.subr.bf16.mxu0 %v4630_v39 }
  0x92   :  { %603 = vmatpush1.bf16.msra.mxu1 %v4620_v38  ;;  %580 = vmatmul.mubr.bf16.vlgmr.msra.gmra.mrb[0].mxu0 %v6163_v1 }
  0x93   :  { %870 = vmatprep.mubr.bf16.mxu0 %v6163_v1  ;;  %879 = vmatprep.subr.bf16.mxu1 %v4632_v40 }
  0x94   :  { %839 = vmatpush1.bf16.msra.mxu0 %v4634_v41 }
  0x95   :  { %621 = vmatmul.mubr.bf16.vlgmr.msra.gmra.mrb[4].mxu1 %v6163_v1  ;;  %840 = vmatprep.subr.bf16.mxu0 %v4642_v43 }
  0x96   :  { %911 = vmatprep.mubr.bf16.mxu1 %v6163_v1  ;;  %880 = vmatpush1.bf16.msra.mxu1 %v4636_v42  ;;  %v4720_v1 = vld [vmem:[#allocation10 + $0xe8] ss:$16 sps:$4 sm:$0xff]  }
  0x97   :  { %881 = vmatprep.subr.bf16.mxu1 %v4644_v44  ;;  %6486 = vst [vmem:[#allocation40_spill] sm:$0xff] %v4720_v1 }
  0x98   :  { %841 = vmatpush1.bf16.msra.mxu0 %v4646_v45 }
  0x99   :  { %842 = vmatprep.subr.bf16.mxu0 %v4654_v47 }
  0x9a   :  { %882 = vmatpush1.bf16.msra.mxu1 %v4648_v46 }
  0x9b   :  { %883 = vmatprep.subr.bf16.mxu1 %v4656_v48 }
  0x9c   :  { %843 = vmatpush1.bf16.msra.mxu0 %v4658_v49 }
  0x9d   :  { %844 = vmatprep.subr.bf16.mxu0 %v4666_v51 }
  0x9e   :  { %884 = vmatpush1.bf16.msra.mxu1 %v4660_v50 }
  0x9f   :  { %885 = vmatprep.subr.bf16.mxu1 %v4668_v52 }
  0xa0   :  { %845 = vmatpush1.bf16.msra.mxu0 %v4670_v53 }
  0xa1   :  { %846 = vmatprep.subr.bf16.mxu0 %v4678_v55 }
  0xa2   :  { %886 = vmatpush1.bf16.msra.mxu1 %v4672_v54 }
  0xa3   :  { %887 = vmatprep.subr.bf16.mxu1 %v4680_v56 }
  0xa4   :  { %847 = vmatpush1.bf16.msra.mxu0 %v4682_v57 }
  0xa5   :  { %848 = vmatprep.subr.bf16.mxu0 %v4686_v59 }
  0xa6   :  { %888 = vmatpush1.bf16.msra.mxu1 %v4684_v58 }
  0xa7   :  { %889 = vmatprep.subr.bf16.mxu1 %v4690_v60 }
  0xa8   :  { %849 = vmatpush1.bf16.msra.mxu0 %v4694_v61 }
  0xa9   :  { %850 = vmatprep.subr.bf16.mxu0 %v4700_v63  ;;  %v4726_v63 = vld [vmem:[#allocation12 + $0xc] ss:$16 sps:$4 sm:$0xff]  }
  0xaa   :  { %890 = vmatpush1.bf16.msra.mxu1 %v4696_v62  ;;  %v4724_v62 = vld [vmem:[#allocation12 + $0x4] ss:$16 sps:$4 sm:$0xff]   ;;  %6488 = vst [vmem:[#allocation42_spill] sm:$0xff] %v4726_v63 }
  0xab   :  { %891 = vmatprep.subr.bf16.mxu1 %v4702_v2  ;;  %6487 = vst [vmem:[#allocation41_spill] sm:$0xff] %v4724_v62 }
  0xac   :  { %851 = vmatpush1.bf16.msra.mxu0 %v4706_v3 }
  0xad   :  { %852 = vmatprep.subr.bf16.mxu0 %v4712_v5 }
  0xae   :  { %892 = vmatpush1.bf16.msra.mxu1 %v4708_v4  ;;  %v119_v4 = vlaneseq }
  0xaf   :  { %893 = vmatprep.subr.bf16.mxu1 %v4714_v6  ;;  %v117_v6 = vld [vmem:[%s6153_s2] sm:$0xf] }
  0xb0   :  { %853 = vmatpush1.bf16.msra.mxu0 %v4718_v0  ;;  %v4732_v3 = vshrl.u32 %v119_v4, 7 }
  0xb1   :  { %1080 = vmatprep.subr.bf16.mxu0 %v4724_v62 }
  0xb2   :  { %894 = vmatpush1.bf16.msra.mxu1 %v4720_v1  ;;  %6489 = vst [vmem:[#allocation43_spill] sm:$0xff] %v4732_v3  ;;  %v6197_v2 = vsub.s32 0, %v4732_v3  ;;  %v6204_v5 = vsub.s32 1, %v4732_v3  ;;  %v6209_v1 = vsub.s32 2, %v4732_v3 }
  0xb3   :  { %1121 = vmatprep.subr.bf16.mxu1 %v4726_v63  ;;  %v6212_v63 = vsub.s32 3, %v4732_v3 }
  0xb4   :  { %v122_v0 = vrot.slane %v117_v6, %v6197_v2  ;;  %v126_v62 = vrot.slane %v117_v6, %v6204_v5  ;;  %v130_v59 = vrot.slane %v117_v6, %v6209_v1  ;;  %v4390_v5 = vmov 1966171168  }
  0xb5   :  { %v134_v57 = vrot.slane %v117_v6, %v6212_v63  ;;  %v636_v53 = vunpack.c.l.s4 %v4390_v5 }
  0xb7   :  { %v637_v52 = vunpack.c.0.s8 %v636_v53 }
 0x144   :  { %v209_v4 = vpop.f32.mrb[0].mxu1 }
 0x145   :  { %v210_v61 = vadd.f32 %v209_v4, %v122_v0  ;;  %v211_v60 = vpop.f32.mrb[1].mxu1  ;;  %v4750_v4 = vsub.s32 %v637_v52, %v4732_v3 }
 0x146   :  { %v212_v58 = vadd.f32 %v211_v60, %v126_v62 }
 0x147   :  { %285 = vst [vmem:[#allocation2] sm:$0xff] %v210_v61 }
 0x148   :  { %286 = vst [vmem:[#allocation2 + $0x8] sm:$0xff] %v212_v58  ;;  %v280_v2 = vpop.f32.mrb[2].mxu1 }
 0x149   :  { %v281_v56 = vadd.f32 %v280_v2, %v130_v59  ;;  %v282_v55 = vpop.f32.mrb[3].mxu1 }
 0x14a   :  { %v283_v54 = vadd.f32 %v282_v55, %v134_v57 }
 0x14b   :  { %287 = vst [vmem:[#allocation2 + $0x10] sm:$0xff] %v281_v56 }
 0x14c   :  { %288 = vst [vmem:[#allocation2 + $0x18] sm:$0xff] %v283_v54 }
 0x153   :  { %v386_v57 = vld [vmem:[#allocation2] ss:$8 sm:$0xf] }
 0x165   :  { %v581_v0 = vpop.f32.mrb[0].mxu0 }
 0x166   :  { %v583_v1 = vpop.f32.mrb[1].mxu0 }
 0x167   :  { %v633_v60 = vcombine.low %v581_v0, %v583_v1  ;;  %v585_v62 = vpop.f32.mrb[2].mxu0 }
 0x168   :  { %v622_v51 = vpop.f32.mrb[4].mxu1  ;;  %v586_v6 = vpop.f32.mrb[3].mxu0 }
 0x169   :  { %v624_v61 = vpop.f32.mrb[5].mxu1  ;;  %v641_v58 = vrot.slane %v633_v60, %v4750_v4 }
 0x16a   :  { %v634_v59 = vcombine.low %v622_v51, %v624_v61  ;;  %v626_v2 = vpop.f32.mrb[6].mxu1 }
 0x16b   :  { %v627_v55 = vpop.f32.mrb[7].mxu1 }
 0x16c   :  { %v648_v54 = vrot.slane %v634_v59, %v4750_v4  ;;  %v4758_v55 = vld [vmem:[#allocation12] ss:$16 sps:$4 sm:$0xff]  }
 0x16e   :  { %v649_v56 = vcombine.low %v641_v58, %v648_v54  ;;  %v4760_v54 = vld [vmem:[#allocation12 + $0x8] ss:$16 sps:$4 sm:$0xff]  }
 0x170   :  { %v656_v53 = vrot.slane %v649_v56, %v4750_v4 }
 0x172   :  { %v658_v5 = vadd.f32 %v656_v53, %v386_v57  ;;  %v4766_v53 = vld [vmem:[#allocation12 + $0x2c] ss:$16 sps:$4 sm:$0xff]   ;;  %v4774_v57 = vld [vmem:[#allocation12 + $0x28] ss:$16 sps:$4 sm:$0xff]  }
 0x174   :  { %v659_v52 = vmul.f32 0.5, %v658_v5  ;;  %v664_v63 = vrot.slane %v658_v5, 3  ;;  %v4778_v5 = vld [vmem:[#allocation12 + $0x44] ss:$16 sps:$4 sm:$0xff]  }
 0x176   :  { %3892 = vtanh.f32 %v659_v52  ;;  %v4780_v52 = vld [vmem:[#allocation12 + $0x4c] ss:$16 sps:$4 sm:$0xff]  }
 0x177   :  { %3894 = vtanh.f32 %v664_v63  ;;  %v4764_v63 = vld [vmem:[#allocation12 + $0x24] ss:$16 sps:$4 sm:$0xff]   ;;  %6490 = vst [vmem:[#allocation44_spill] sm:$0xff] %v4780_v52 }
 0x180   :  { %v3893_v1 = vpop.eup %3892 }
 0x181   :  { %v661_v0 = vmul.f32 0.5, %v3893_v1  ;;  %v3895_v3 = vpop.eup %3894  ;;  %v6491_v1 = vmov 0  }
 0x183   :  { %v662_v62 = vadd.f32 0.5, %v661_v0  ;;  %v4786_v0 = vld [vmem:[#allocation12 + $0x40] ss:$16 sps:$4 sm:$0xff]  }
 0x184   :  { %6492 = vst [vmem:[#allocation45_spill] sm:$0xff] %v4786_v0 }
 0x185   :  { %v668_v6 = vrot.slane %v662_v62, 1  ;;  %v671_v51 = vmul.f32 %v3895_v3, %v662_v62  ;;  %v674_v58 = vrot.slane %v662_v62, 2  ;;  %v4772_v3 = vld [vmem:[#allocation12 + $0x20] ss:$16 sps:$4 sm:$0xff]   ;;  %v4788_v62 = vld [vmem:[#allocation12 + $0x48] ss:$16 sps:$4 sm:$0xff]  }
 0x186   :  { %6493 = vst [vmem:[#allocation46_spill] sm:$0xff] %v4788_v62 }
 0x187   :  { %v670_v60 = vmul.f32 0.0, %v668_v6  ;;  %v4792_v6 = vld [vmem:[#allocation12 + $0x64] ss:$16 sps:$4 sm:$0xff]  }
 0x188   :  { %6494 = vst [vmem:[#allocation47_spill] sm:$0xff] %v4792_v6 }
 0x189   :  { %v4755_v61 = vadd.f32 %v671_v51, %v670_v60  ;;  %v4794_v60 = vld [vmem:[#allocation12 + $0x6c] ss:$16 sps:$4 sm:$0xff]   ;;  %v4798_v51 = vld [vmem:[#allocation12 + $0x60] ss:$16 sps:$4 sm:$0xff]  }
 0x18a   :  { %6495 = vst [vmem:[#allocation48_spill] sm:$0xff] %v4794_v60  ;;  %6496 = vst [vmem:[#allocation49_spill] sm:$0xff] %v4798_v51 }
 0x18b   :  { %3896 = vtanh.f32 %v4755_v61 }
 0x195   :  { %v3897_v59 = vpop.eup %3896 }
 0x196   :  { %v676_v2 = vmul.f32 %v3897_v59, %v674_v58  ;;  %v4800_v58 = vld [vmem:[#allocation12 + $0x68] ss:$16 sps:$4 sm:$0xff]   ;;  %v4804_v59 = vld [vmem:[#allocation12 + $0x84] ss:$16 sps:$4 sm:$0xff]  }
 0x197   :  { %6497 = vst [vmem:[#allocation50_spill] sm:$0xff] %v4800_v58  ;;  %6498 = vst [vmem:[#allocation51_spill] sm:$0xff] %v4804_v59 }
 0x198   :  { %v4762_v56 = vpack.c.bf16 %v676_v2, %v676_v2  ;;  %v4806_v2 = vld [vmem:[#allocation12 + $0x8c] ss:$16 sps:$4 sm:$0xff]  }
 0x199   :  { %6499 = vst [vmem:[#allocation52_spill] sm:$0xff] %v4806_v2 }
 0x19a   :  { %871 = vmatmul.mubr.bf16.vlgmr.msra.gmra.mrb[4].mxu0 %v4762_v56  ;;  %912 = vmatmul.mubr.bf16.vlgmr.msra.gmra.mrb[8].mxu1 %v4762_v56 }
 0x19b   :  { %1081 = vmatpush1.bf16.msra.mxu0 %v4758_v55  ;;  %1122 = vmatpush1.bf16.msra.mxu1 %v4760_v54 }
 0x19c   :  { %1082 = vmatprep.subr.bf16.mxu0 %v4764_v63  ;;  %1123 = vmatprep.subr.bf16.mxu1 %v4766_v53 }
 0x19d   :  { %1112 = vmatprep.mubr.bf16.mxu0 %v6491_v1  ;;  %1153 = vmatprep.mubr.bf16.mxu1 %v6491_v1 }
 0x19f   :  { %1083 = vmatpush1.bf16.msra.mxu0 %v4772_v3  ;;  %1124 = vmatpush1.bf16.msra.mxu1 %v4774_v57 }
 0x1a0   :  { %1084 = vmatprep.subr.bf16.mxu0 %v4778_v5  ;;  %1125 = vmatprep.subr.bf16.mxu1 %v4780_v52  ;;  %v4810_v52 = vld [vmem:[#allocation12 + $0x80] ss:$16 sps:$4 sm:$0xff]  }
 0x1a1   :  { %6500 = vst [vmem:[#allocation53_spill] sm:$0xff] %v4810_v52 }
 0x1a3   :  { %1085 = vmatpush1.bf16.msra.mxu0 %v4786_v0  ;;  %1126 = vmatpush1.bf16.msra.mxu1 %v4788_v62  ;;  %v4812_v0 = vld [vmem:[#allocation12 + $0x88] ss:$16 sps:$4 sm:$0xff]   ;;  %v4816_v62 = vld [vmem:[#allocation12 + $0xa4] ss:$16 sps:$4 sm:$0xff]  }
 0x1a4   :  { %1086 = vmatprep.subr.bf16.mxu0 %v4792_v6  ;;  %1127 = vmatprep.subr.bf16.mxu1 %v4794_v60  ;;  %6501 = vst [vmem:[#allocation54_spill] sm:$0xff] %v4812_v0  ;;  %6502 = vst [vmem:[#allocation55_spill] sm:$0xff] %v4816_v62  ;;  %v4818_v6 = vld [vmem:[#allocation12 + $0xac] ss:$16 sps:$4 sm:$0xff]   ;;  %v4822_v60 = vld [vmem:[#allocation12 + $0xa0] ss:$16 sps:$4 sm:$0xff]  }
 0x1a5   :  { %6503 = vst [vmem:[#allocation56_spill] sm:$0xff] %v4818_v6  ;;  %6504 = vst [vmem:[#allocation57_spill] sm:$0xff] %v4822_v60 }
 0x1a7   :  { %1087 = vmatpush1.bf16.msra.mxu0 %v4798_v51  ;;  %1128 = vmatpush1.bf16.msra.mxu1 %v4800_v58  ;;  %v4824_v51 = vld [vmem:[#allocation12 + $0xa8] ss:$16 sps:$4 sm:$0xff]   ;;  %v4828_v58 = vld [vmem:[#allocation12 + $0xc4] ss:$16 sps:$4 sm:$0xff]  }
 0x1a8   :  { %1088 = vmatprep.subr.bf16.mxu0 %v4804_v59  ;;  %1129 = vmatprep.subr.bf16.mxu1 %v4806_v2  ;;  %v4830_v59 = vld [vmem:[#allocation12 + $0xcc] ss:$16 sps:$4 sm:$0xff]   ;;  %v4834_v2 = vld [vmem:[#allocation12 + $0xc0] ss:$16 sps:$4 sm:$0xff]  }
 0x1ab   :  { %1089 = vmatpush1.bf16.msra.mxu0 %v4810_v52  ;;  %1130 = vmatpush1.bf16.msra.mxu1 %v4812_v0  ;;  %v4836_v52 = vld [vmem:[#allocation12 + $0xc8] ss:$16 sps:$4 sm:$0xff]   ;;  %v4840_v0 = vld [vmem:[#allocation12 + $0xe4] ss:$16 sps:$4 sm:$0xff]  }
 0x1ac   :  { %1090 = vmatprep.subr.bf16.mxu0 %v4816_v62  ;;  %1131 = vmatprep.subr.bf16.mxu1 %v4818_v6  ;;  %v4842_v62 = vld [vmem:[#allocation12 + $0xec] ss:$16 sps:$4 sm:$0xff]   ;;  %v4846_v6 = vld [vmem:[#allocation12 + $0xe0] ss:$16 sps:$4 sm:$0xff]  }
 0x1af   :  { %1091 = vmatpush1.bf16.msra.mxu0 %v4822_v60  ;;  %1132 = vmatpush1.bf16.msra.mxu1 %v4824_v51  ;;  %v4848_v60 = vld [vmem:[#allocation12 + $0xe8] ss:$16 sps:$4 sm:$0xff]  }
 0x1b0   :  { %1092 = vmatprep.subr.bf16.mxu0 %v4828_v58  ;;  %1133 = vmatprep.subr.bf16.mxu1 %v4830_v59  ;;  %6505 = vst [vmem:[#allocation58_spill] sm:$0xff] %v4848_v60 }
 0x1b3   :  { %1093 = vmatpush1.bf16.msra.mxu0 %v4834_v2  ;;  %1134 = vmatpush1.bf16.msra.mxu1 %v4836_v52 }
 0x1b4   :  { %1094 = vmatprep.subr.bf16.mxu0 %v4840_v0  ;;  %1135 = vmatprep.subr.bf16.mxu1 %v4842_v62 }
 0x1b7   :  { %1095 = vmatpush1.bf16.msra.mxu0 %v4846_v6  ;;  %1136 = vmatpush1.bf16.msra.mxu1 %v4848_v60 }
 0x1b8   :  { %1209 = vmatprep.subr.bf16.mxu0 %v4526_v7  ;;  %1250 = vmatprep.subr.bf16.mxu1 %v4531_v9  ;;  %v6506_v7 = vld [vmem:[#allocation21_spill] sm:$0xff]  ;;  %v6508_v9 = vld [vmem:[#allocation23_spill] sm:$0xff] }
 0x1ba   :  { %1113 = vmatmul.mubr.bf16.vlgmr.msra.gmra.mrb[8].mxu0 %v6491_v1  ;;  %1154 = vmatmul.mubr.bf16.vlgmr.msra.gmra.mrb[12].mxu1 %v6491_v1 }
 0x1bb   :  { %1210 = vmatpush1.bf16.msra.mxu0 %v4528_v8  ;;  %1251 = vmatpush1.bf16.msra.mxu1 %v4534_v10  ;;  %v6507_v8 = vld [vmem:[#allocation22_spill] sm:$0xff]  ;;  %v6509_v10 = vld [vmem:[#allocation24_spill] sm:$0xff] }
 0x1bc   :  { %1211 = vmatprep.subr.bf16.mxu0 %v4538_v11  ;;  %1252 = vmatprep.subr.bf16.mxu1 %v4543_v13  ;;  %v6510_v11 = vld [vmem:[#allocation25_spill] sm:$0xff]  ;;  %v6512_v13 = vld [vmem:[#allocation27_spill] sm:$0xff] }
 0x1bd   :  { %1241 = vmatprep.mubr.bf16.mxu0 %v6491_v1  ;;  %1282 = vmatprep.mubr.bf16.mxu1 %v6491_v1 }
 0x1bf   :  { %1212 = vmatpush1.bf16.msra.mxu0 %v4540_v12  ;;  %1253 = vmatpush1.bf16.msra.mxu1 %v4550_v15  ;;  %v6511_v12 = vld [vmem:[#allocation26_spill] sm:$0xff]  ;;  %v6514_v15 = vld [vmem:[#allocation29_spill] sm:$0xff] }
 0x1c0   :  { %1213 = vmatprep.subr.bf16.mxu0 %v4547_v14  ;;  %1254 = vmatprep.subr.bf16.mxu1 %v4557_v17  ;;  %v6513_v14 = vld [vmem:[#allocation28_spill] sm:$0xff]  ;;  %v6516_v17 = vld [vmem:[#allocation31_spill] sm:$0xff] }
 0x1c3   :  { %1214 = vmatpush1.bf16.msra.mxu0 %v4555_v16  ;;  %1255 = vmatpush1.bf16.msra.mxu1 %v4563_v19  ;;  %v6515_v16 = vld [vmem:[#allocation30_spill] sm:$0xff]  ;;  %v6518_v19 = vld [vmem:[#allocation33_spill] sm:$0xff] }
 0x1c4   :  { %1215 = vmatprep.subr.bf16.mxu0 %v4560_v18  ;;  %1256 = vmatprep.subr.bf16.mxu1 %v4569_v21  ;;  %v6517_v18 = vld [vmem:[#allocation32_spill] sm:$0xff]  ;;  %v6520_v21 = vld [vmem:[#allocation35_spill] sm:$0xff] }
 0x1c7   :  { %1216 = vmatpush1.bf16.msra.mxu0 %v4567_v20  ;;  %1257 = vmatpush1.bf16.msra.mxu1 %v4575_v23  ;;  %v6519_v20 = vld [vmem:[#allocation34_spill] sm:$0xff]  ;;  %v6522_v23 = vld [vmem:[#allocation37_spill] sm:$0xff] }
 0x1c8   :  { %1217 = vmatprep.subr.bf16.mxu0 %v4572_v22  ;;  %1258 = vmatprep.subr.bf16.mxu1 %v4581_v25  ;;  %v6521_v22 = vld [vmem:[#allocation36_spill] sm:$0xff]  ;;  %v6524_v25 = vld [vmem:[#allocation39_spill] sm:$0xff] }
 0x1cb   :  { %1218 = vmatpush1.bf16.msra.mxu0 %v4579_v24  ;;  %1259 = vmatpush1.bf16.msra.mxu1 %v4587_v27  ;;  %v6523_v24 = vld [vmem:[#allocation38_spill] sm:$0xff]  ;;  %v6526_v27 = vld [vmem:[#allocation41_spill] sm:$0xff] }
 0x1cc   :  { %1219 = vmatprep.subr.bf16.mxu0 %v4584_v26  ;;  %1260 = vmatprep.subr.bf16.mxu1 %v4593_v29  ;;  %v6525_v26 = vld [vmem:[#allocation40_spill] sm:$0xff] }
 0x1cf   :  { %1220 = vmatpush1.bf16.msra.mxu0 %v4591_v28  ;;  %1261 = vmatpush1.bf16.msra.mxu1 %v4596_v30  ;;  %v6527_v28 = vld [vmem:[#allocation42_spill] sm:$0xff] }
 0x1d0   :  { %1221 = vmatprep.subr.bf16.mxu0 %v4598_v31  ;;  %1262 = vmatprep.subr.bf16.mxu1 %v4602_v33 }
 0x1d3   :  { %1222 = vmatpush1.bf16.msra.mxu0 %v4600_v32  ;;  %1263 = vmatpush1.bf16.msra.mxu1 %v4610_v35 }
 0x1d4   :  { %1223 = vmatprep.subr.bf16.mxu0 %v4605_v34  ;;  %1264 = vmatprep.subr.bf16.mxu1 %v4614_v37 }
 0x1d7   :  { %1224 = vmatpush1.bf16.msra.mxu0 %v4612_v36  ;;  %1265 = vmatpush1.bf16.msra.mxu1 %v4620_v38 }
 0x1d8   :  { %1340 = vmatprep.subr.bf16.mxu0 %v4630_v39  ;;  %1381 = vmatprep.subr.bf16.mxu1 %v4632_v40 }
 0x1da   :  { %1242 = vmatmul.mubr.bf16.vlgmr.msra.gmra.mrb[12].mxu0 %v4762_v56  ;;  %1283 = vmatmul.mubr.bf16.vlgmr.msra.gmra.mrb[16].mxu1 %v4762_v56 }
 0x1db   :  { %1341 = vmatpush1.bf16.msra.mxu0 %v4634_v41  ;;  %1382 = vmatpush1.bf16.msra.mxu1 %v4636_v42 }
 0x1dc   :  { %1342 = vmatprep.subr.bf16.mxu0 %v4642_v43  ;;  %1383 = vmatprep.subr.bf16.mxu1 %v4644_v44 }
 0x1dd   :  { %1372 = vmatprep.mubr.bf16.mxu0 %v6491_v1  ;;  %1413 = vmatprep.mubr.bf16.mxu1 %v6491_v1 }
 0x1df   :  { %1343 = vmatpush1.bf16.msra.mxu0 %v4646_v45  ;;  %1384 = vmatpush1.bf16.msra.mxu1 %v4648_v46 }
 0x1e0   :  { %1344 = vmatprep.subr.bf16.mxu0 %v4654_v47  ;;  %1385 = vmatprep.subr.bf16.mxu1 %v4656_v48 }
 0x1e3   :  { %1345 = vmatpush1.bf16.msra.mxu0 %v4658_v49  ;;  %1386 = vmatpush1.bf16.msra.mxu1 %v4660_v50 }
 0x1e4   :  { %1346 = vmatprep.subr.bf16.mxu0 %v6506_v7  ;;  %1387 = vmatprep.subr.bf16.mxu1 %v6507_v8 }
 0x1e7   :  { %1347 = vmatpush1.bf16.msra.mxu0 %v6508_v9  ;;  %1388 = vmatpush1.bf16.msra.mxu1 %v6509_v10 }
 0x1e8   :  { %1348 = vmatprep.subr.bf16.mxu0 %v6510_v11  ;;  %1389 = vmatprep.subr.bf16.mxu1 %v6511_v12 }
 0x1eb   :  { %1349 = vmatpush1.bf16.msra.mxu0 %v6512_v13  ;;  %1390 = vmatpush1.bf16.msra.mxu1 %v6513_v14 }
 0x1ec   :  { %1350 = vmatprep.subr.bf16.mxu0 %v6514_v15  ;;  %1391 = vmatprep.subr.bf16.mxu1 %v6515_v16 }
 0x1ef   :  { %1351 = vmatpush1.bf16.msra.mxu0 %v6516_v17  ;;  %1392 = vmatpush1.bf16.msra.mxu1 %v6517_v18 }
 0x1f0   :  { %1352 = vmatprep.subr.bf16.mxu0 %v6518_v19  ;;  %1393 = vmatprep.subr.bf16.mxu1 %v6519_v20 }
 0x1f3   :  { %1353 = vmatpush1.bf16.msra.mxu0 %v6520_v21  ;;  %1394 = vmatpush1.bf16.msra.mxu1 %v6521_v22 }
 0x1f4   :  { %1354 = vmatprep.subr.bf16.mxu0 %v6522_v23  ;;  %1395 = vmatprep.subr.bf16.mxu1 %v6523_v24  ;;  %v385_v24 = vld [vmem:[%s6157_s6] sm:$0xf]  ;;  %v6528_v23 = vld [vmem:[#allocation43_spill] sm:$0xff] }
 0x1f5   :  { %v6531_v15 = vsub.s32 3, %v6528_v23 }
 0x1f7   :  { %1355 = vmatpush1.bf16.msra.mxu0 %v6524_v25  ;;  %1396 = vmatpush1.bf16.msra.mxu1 %v6525_v26  ;;  %v6529_v25 = vsub.s32 0, %v6528_v23  ;;  %v4941_v14 = vrot.slane %v385_v24, %v6531_v15 }
 0x1f8   :  { %1422 = vmatprep.subr.bf16.mxu0 %v6526_v27  ;;  %1463 = vmatprep.subr.bf16.mxu1 %v6527_v28  ;;  %v6530_v27 = vsub.s32 1, %v6528_v23 }
 0x1f9   :  { %v4933_v21 = vrot.slane %v385_v24, %v6529_v25 }
 0x1fa   :  { %v4937_v26 = vrot.slane %v385_v24, %v6530_v27 }
 0x26d   :  { %v872_v29 = vpop.f32.mrb[4].mxu0  ;;  %v913_v30 = vpop.f32.mrb[8].mxu1 }
 0x26e   :  { %v874_v31 = vpop.f32.mrb[5].mxu0  ;;  %v915_v32 = vpop.f32.mrb[9].mxu1 }
 0x26f   :  { %v876_v33 = vpop.f32.mrb[6].mxu0  ;;  %v917_v34 = vpop.f32.mrb[10].mxu1 }
 0x270   :  { %v877_v56 = vpop.f32.mrb[7].mxu0  ;;  %v918_v22 = vpop.f32.mrb[11].mxu1 }
 0x28d   :  { %v1114_v28 = vpop.f32.mrb[8].mxu0  ;;  %v1155_v20 = vpop.f32.mrb[12].mxu1 }
 0x28e   :  { %v1115_v19 = vadd.f32 %v1114_v28, %v872_v29  ;;  %v1156_v18 = vadd.f32 %v1155_v20, %v913_v30  ;;  %v1116_v33 = vpop.f32.mrb[9].mxu0  ;;  %v1157_v34 = vpop.f32.mrb[13].mxu1  ;;  %v6532_v28 = vsub.s32 2, %v6528_v23 }
 0x28f   :  { %v1117_v56 = vadd.f32 %v1116_v33, %v874_v31  ;;  %v1158_v22 = vadd.f32 %v1157_v34, %v915_v32  ;;  %v1118_v17 = vpop.f32.mrb[10].mxu0  ;;  %v1159_v16 = vpop.f32.mrb[14].mxu1 }
 0x290   :  { %v1183_v25 = vadd.f32 %v4933_v21, %v1115_v19  ;;  %v1119_v13 = vpop.f32.mrb[11].mxu0  ;;  %v1160_v12 = vpop.f32.mrb[15].mxu1  ;;  %v4948_v29 = vrot.slane %v385_v24, %v6532_v28 }
 0x291   :  { %v1184_v27 = vadd.f32 %v4937_v26, %v1117_v56  ;;  %v1186_v20 = vadd.f32 %v4941_v14, %v1158_v22 }
 0x292   :  { %v1187_v11 = vmul.f32 0.5, %v1183_v25  ;;  %v1185_v15 = vadd.f32 %v4948_v29, %v1156_v18 }
 0x293   :  { %v1188_v10 = vmul.f32 0.5, %v1184_v27 }
 0x294   :  { %3898 = vtanh.f32 %v1187_v11  ;;  %v1189_v16 = vmul.f32 0.5, %v1185_v15 }
 0x295   :  { %3900 = vtanh.f32 %v1188_v10 }
 0x296   :  { %3902 = vtanh.f32 %v1186_v20 }
 0x297   :  { %3904 = vtanh.f32 %v1189_v16 }
 0x29e   :  { %v3899_v17 = vpop.eup %3898 }
 0x29f   :  { %v1193_v19 = vmul.f32 0.5, %v3899_v17  ;;  %v3901_v13 = vpop.eup %3900 }
 0x2a0   :  { %v1194_v30 = vmul.f32 0.5, %v3901_v13  ;;  %v3903_v31 = vpop.eup %3902 }
 0x2a1   :  { %v1196_v12 = vadd.f32 0.5, %v1193_v19  ;;  %v3905_v23 = vpop.eup %3904 }
 0x2a2   :  { %v1197_v32 = vadd.f32 0.5, %v1194_v30  ;;  %v1195_v56 = vmul.f32 0.5, %v3905_v23 }
 0x2a3   :  { %v1201_v11 = vmul.f32 %v3903_v31, %v1196_v12 }
 0x2a4   :  { %v1200_v33 = vmul.f32 0.0, %v1197_v32  ;;  %v1198_v13 = vadd.f32 0.5, %v1195_v56 }
 0x2a6   :  { %v4951_v34 = vadd.f32 %v1201_v11, %v1200_v33  ;;  %v1208_v11 = vld [vmem:[#allocation2 + $0x1] ss:$8 sm:$0xf] }
 0x2a8   :  { %3906 = vtanh.f32 %v4951_v34 }
 0x2ad   :  { %v1243_v10 = vpop.f32.mrb[12].mxu0  ;;  %v1284_v24 = vpop.f32.mrb[16].mxu1 }
 0x2ae   :  { %v1245_v18 = vpop.f32.mrb[13].mxu0  ;;  %v1286_v22 = vpop.f32.mrb[17].mxu1 }
 0x2af   :  { %v1295_v25 = vcombine.low %v1243_v10, %v1245_v18  ;;  %v1296_v27 = vcombine.low %v1284_v24, %v1286_v22  ;;  %v1247_v20 = vpop.f32.mrb[14].mxu0  ;;  %v1288_v28 = vpop.f32.mrb[18].mxu1 }
 0x2b0   :  { %v1248_v15 = vpop.f32.mrb[15].mxu0  ;;  %v1289_v16 = vpop.f32.mrb[19].mxu1 }
 0x2b1   :  { %v1303_v17 = vrot.slane %v1295_v25, %v4750_v4  ;;  %v1310_v19 = vrot.slane %v1296_v27, %v4750_v4 }
 0x2b2   :  { %v3907_v12 = vpop.eup %3906 }
 0x2b3   :  { %v1311_v30 = vcombine.low %v1303_v17, %v1310_v19  ;;  %v1204_v31 = vmul.f32 %v3907_v12, %v1198_v13  ;;  %v6534_v13 = vld [vmem:[#allocation45_spill] sm:$0xff]  ;;  %v6535_v12 = vld [vmem:[#allocation46_spill] sm:$0xff] }
 0x2b5   :  { %v1318_v32 = vrot.slane %v1311_v30, %v4750_v4  ;;  %1206 = vst [vmem:[#allocation3] sm:$0x1] %v1204_v31  ;;  %v6536_v30 = vld [vmem:[#allocation47_spill] sm:$0xff] }
 0x2b7   :  { %v1320_v33 = vadd.f32 %v1318_v32, %v1208_v11  ;;  %v6537_v32 = vld [vmem:[#allocation48_spill] sm:$0xff]  ;;  %v6538_v11 = vld [vmem:[#allocation49_spill] sm:$0xff] }
 0x2b9   :  { %v1321_v23 = vmul.f32 0.5, %v1320_v33  ;;  %v1326_v10 = vrot.slane %v1320_v33, 3  ;;  %v6539_v33 = vld [vmem:[#allocation50_spill] sm:$0xff] }
 0x2bb   :  { %3908 = vtanh.f32 %v1321_v23  ;;  %v6540_v23 = vld [vmem:[#allocation51_spill] sm:$0xff] }
 0x2bc   :  { %3910 = vtanh.f32 %v1326_v10  ;;  %v6541_v10 = vld [vmem:[#allocation52_spill] sm:$0xff] }
 0x2c5   :  { %v3909_v24 = vpop.eup %3908 }
 0x2c6   :  { %v1323_v18 = vmul.f32 0.5, %v3909_v24  ;;  %v3911_v25 = vpop.eup %3910  ;;  %v6542_v24 = vld [vmem:[#allocation53_spill] sm:$0xff] }
 0x2c8   :  { %v1324_v22 = vadd.f32 0.5, %v1323_v18  ;;  %v6543_v18 = vld [vmem:[#allocation54_spill] sm:$0xff] }
 0x2ca   :  { %v1330_v20 = vrot.slane %v1324_v22, 1  ;;  %v1333_v56 = vmul.f32 %v3911_v25, %v1324_v22  ;;  %v1336_v15 = vrot.slane %v1324_v22, 2  ;;  %v6544_v22 = vld [vmem:[#allocation55_spill] sm:$0xff]  ;;  %v6546_v25 = vld [vmem:[#allocation57_spill] sm:$0xff] }
 0x2cc   :  { %v1332_v27 = vmul.f32 %v1330_v20, %v4755_v61  ;;  %v6533_v61 = vld [vmem:[#allocation44_spill] sm:$0xff] }
 0x2cd   :  { %v6545_v20 = vld [vmem:[#allocation56_spill] sm:$0xff] }
 0x2ce   :  { %v4958_v28 = vadd.f32 %v1333_v56, %v1332_v27  ;;  %v1205_v27 = vpack.c.bf16 %v1204_v31, %v1204_v31  ;;  %v4997_v56 = vld [vmem:[#allocation9 + $0x4] ss:$16 sps:$4 sm:$0xff]   ;;  %v5012_v31 = vld [vmem:[#allocation9 + $0x2c] ss:$16 sps:$4 sm:$0xff]  }
 0x2cf   :  { %6551 = vst [vmem:[#allocation44_spill] sm:$0xff] %v5012_v31 }
 0x2d0   :  { %3912 = vtanh.f32 %v4958_v28 }
 0x2da   :  { %v3913_v16 = vpop.eup %3912 }
 0x2db   :  { %v1338_v17 = vmul.f32 %v3913_v16, %v1336_v15  ;;  %v5000_v15 = vld [vmem:[#allocation9 + $0xc] ss:$16 sps:$4 sm:$0xff]   ;;  %v5003_v16 = vld [vmem:[#allocation9] ss:$16 sps:$4 sm:$0xff]  }
 0x2dc   :  { %6547 = vst [vmem:[#allocation21_spill] sm:$0xff] %v5000_v15  ;;  %6548 = vst [vmem:[#allocation22_spill] sm:$0xff] %v5003_v16 }
 0x2dd   :  { %v4961_v19 = vpack.c.bf16 %v1338_v17, %v1338_v17  ;;  %v5006_v17 = vld [vmem:[#allocation9 + $0x8] ss:$16 sps:$4 sm:$0xff]  }
 0x2de   :  { %6549 = vst [vmem:[#allocation23_spill] sm:$0xff] %v5006_v17 }
 0x2df   :  { %1373 = vmatmul.mubr.bf16.vlgmr.msra.gmra.mrb[16].mxu0 %v4961_v19  ;;  %1414 = vmatmul.mubr.bf16.vlgmr.msra.gmra.mrb[20].mxu1 %v4961_v19 }
 0x2e0   :  { %1423 = vmatpush1.bf16.msra.mxu0 %v4758_v55  ;;  %1464 = vmatpush1.bf16.msra.mxu1 %v4760_v54 }
 0x2e1   :  { %1424 = vmatprep.subr.bf16.mxu0 %v4764_v63  ;;  %1465 = vmatprep.subr.bf16.mxu1 %v4766_v53 }
 0x2e2   :  { %1454 = vmatprep.mubr.bf16.mxu0 %v6491_v1  ;;  %1495 = vmatprep.mubr.bf16.mxu1 %v6491_v1 }
 0x2e4   :  { %1425 = vmatpush1.bf16.msra.mxu0 %v4772_v3  ;;  %1466 = vmatpush1.bf16.msra.mxu1 %v4774_v57 }
 0x2e5   :  { %1426 = vmatprep.subr.bf16.mxu0 %v4778_v5  ;;  %1467 = vmatprep.subr.bf16.mxu1 %v6533_v61 }
 0x2e8   :  { %1427 = vmatpush1.bf16.msra.mxu0 %v6534_v13  ;;  %1468 = vmatpush1.bf16.msra.mxu1 %v6535_v12 }
 0x2e9   :  { %1428 = vmatprep.subr.bf16.mxu0 %v6536_v30  ;;  %1469 = vmatprep.subr.bf16.mxu1 %v6537_v32 }
 0x2ec   :  { %1429 = vmatpush1.bf16.msra.mxu0 %v6538_v11  ;;  %1470 = vmatpush1.bf16.msra.mxu1 %v6539_v33 }
 0x2ed   :  { %1430 = vmatprep.subr.bf16.mxu0 %v6540_v23  ;;  %1471 = vmatprep.subr.bf16.mxu1 %v6541_v10 }
 0x2f0   :  { %1431 = vmatpush1.bf16.msra.mxu0 %v6542_v24  ;;  %1472 = vmatpush1.bf16.msra.mxu1 %v6543_v18 }
 0x2f1   :  { %1432 = vmatprep.subr.bf16.mxu0 %v6544_v22  ;;  %1473 = vmatprep.subr.bf16.mxu1 %v6545_v20 }
 0x2f4   :  { %1433 = vmatpush1.bf16.msra.mxu0 %v6546_v25  ;;  %1474 = vmatpush1.bf16.msra.mxu1 %v4824_v51 }
 0x2f5   :  { %1434 = vmatprep.subr.bf16.mxu0 %v4828_v58  ;;  %1475 = vmatprep.subr.bf16.mxu1 %v4830_v59 }
 0x2f8   :  { %1435 = vmatpush1.bf16.msra.mxu0 %v4834_v2  ;;  %1476 = vmatpush1.bf16.msra.mxu1 %v4836_v52 }
 0x2f9   :  { %1436 = vmatprep.subr.bf16.mxu0 %v4840_v0  ;;  %1477 = vmatprep.subr.bf16.mxu1 %v4842_v62 }
 0x2fc   :  { %1437 = vmatpush1.bf16.msra.mxu0 %v4846_v6  ;;  %1478 = vmatpush1.bf16.msra.mxu1 %v4848_v60  ;;  %v5009_v60 = vld [vmem:[#allocation9 + $0x24] ss:$16 sps:$4 sm:$0xff]  }
 0x2fd   :  { %1530 = vmatprep.subr.bf16.mxu0 %v4997_v56  ;;  %1571 = vmatprep.subr.bf16.mxu1 %v5000_v15  ;;  %6550 = vst [vmem:[#allocation43_spill] sm:$0xff] %v5009_v60  ;;  %v5032_v15 = vld [vmem:[#allocation9 + $0x48] ss:$16 sps:$4 sm:$0xff]  }
 0x2fe   :  { %6557 = vst [vmem:[#allocation50_spill] sm:$0xff] %v5032_v15 }
 0x2ff   :  { %1455 = vmatmul.mubr.bf16.vlgmr.msra.gmra.mrb[20].mxu0 %v1205_v27  ;;  %1496 = vmatmul.mubr.bf16.vlgmr.msra.gmra.mrb[24].mxu1 %v1205_v27  ;;  %v5017_v27 = vld [vmem:[#allocation9 + $0x20] ss:$16 sps:$4 sm:$0xff]  }
 0x300   :  { %1531 = vmatpush1.bf16.msra.mxu0 %v5003_v16  ;;  %1572 = vmatpush1.bf16.msra.mxu1 %v5006_v17  ;;  %6552 = vst [vmem:[#allocation45_spill] sm:$0xff] %v5017_v27  ;;  %v5020_v16 = vld [vmem:[#allocation9 + $0x28] ss:$16 sps:$4 sm:$0xff]   ;;  %v5023_v17 = vld [vmem:[#allocation9 + $0x44] ss:$16 sps:$4 sm:$0xff]  }
 0x301   :  { %1532 = vmatprep.subr.bf16.mxu0 %v5009_v60  ;;  %1573 = vmatprep.subr.bf16.mxu1 %v5012_v31  ;;  %6553 = vst [vmem:[#allocation46_spill] sm:$0xff] %v5020_v16  ;;  %6554 = vst [vmem:[#allocation47_spill] sm:$0xff] %v5023_v17  ;;  %v5026_v60 = vld [vmem:[#allocation9 + $0x4c] ss:$16 sps:$4 sm:$0xff]   ;;  %v5029_v31 = vld [vmem:[#allocation9 + $0x40] ss:$16 sps:$4 sm:$0xff]  }
 0x302   :  { %1562 = vmatprep.mubr.bf16.mxu0 %v6491_v1  ;;  %1603 = vmatprep.mubr.bf16.mxu1 %v6491_v1  ;;  %6555 = vst [vmem:[#allocation48_spill] sm:$0xff] %v5026_v60  ;;  %6556 = vst [vmem:[#allocation49_spill] sm:$0xff] %v5029_v31 }
 0x304   :  { %1533 = vmatpush1.bf16.msra.mxu0 %v5017_v27  ;;  %1574 = vmatpush1.bf16.msra.mxu1 %v5020_v16  ;;  %v5035_v27 = vld [vmem:[#allocation9 + $0x64] ss:$16 sps:$4 sm:$0xff]   ;;  %v5038_v16 = vld [vmem:[#allocation9 + $0x6c] ss:$16 sps:$4 sm:$0xff]  }
 0x305   :  { %1534 = vmatprep.subr.bf16.mxu0 %v5023_v17  ;;  %1575 = vmatprep.subr.bf16.mxu1 %v5026_v60  ;;  %6558 = vst [vmem:[#allocation51_spill] sm:$0xff] %v5035_v27  ;;  %6559 = vst [vmem:[#allocation52_spill] sm:$0xff] %v5038_v16  ;;  %v5041_v17 = vld [vmem:[#allocation9 + $0x60] ss:$16 sps:$4 sm:$0xff]   ;;  %v5044_v60 = vld [vmem:[#allocation9 + $0x68] ss:$16 sps:$4 sm:$0xff]  }
 0x306   :  { %6560 = vst [vmem:[#allocation53_spill] sm:$0xff] %v5041_v17  ;;  %6561 = vst [vmem:[#allocation54_spill] sm:$0xff] %v5044_v60 }
 0x308   :  { %1535 = vmatpush1.bf16.msra.mxu0 %v5029_v31  ;;  %1576 = vmatpush1.bf16.msra.mxu1 %v5032_v15  ;;  %v5047_v31 = vld [vmem:[#allocation9 + $0x84] ss:$16 sps:$4 sm:$0xff]   ;;  %v5050_v15 = vld [vmem:[#allocation9 + $0x8c] ss:$16 sps:$4 sm:$0xff]  }
 0x309   :  { %1536 = vmatprep.subr.bf16.mxu0 %v5035_v27  ;;  %1577 = vmatprep.subr.bf16.mxu1 %v5038_v16  ;;  %6562 = vst [vmem:[#allocation55_spill] sm:$0xff] %v5047_v31  ;;  %6563 = vst [vmem:[#allocation56_spill] sm:$0xff] %v5050_v15  ;;  %v5053_v27 = vld [vmem:[#allocation9 + $0x80] ss:$16 sps:$4 sm:$0xff]   ;;  %v5056_v16 = vld [vmem:[#allocation9 + $0x88] ss:$16 sps:$4 sm:$0xff]  }
 0x30a   :  { %6564 = vst [vmem:[#allocation57_spill] sm:$0xff] %v5053_v27  ;;  %6565 = vst [vmem:[#allocation59_spill] sm:$0xff] %v5056_v16 }
 0x30c   :  { %1537 = vmatpush1.bf16.msra.mxu0 %v5041_v17  ;;  %1578 = vmatpush1.bf16.msra.mxu1 %v5044_v60  ;;  %v5059_v17 = vld [vmem:[#allocation9 + $0xa4] ss:$16 sps:$4 sm:$0xff]   ;;  %v5062_v60 = vld [vmem:[#allocation9 + $0xac] ss:$16 sps:$4 sm:$0xff]  }
 0x30d   :  { %1538 = vmatprep.subr.bf16.mxu0 %v5047_v31  ;;  %1579 = vmatprep.subr.bf16.mxu1 %v5050_v15  ;;  %6566 = vst [vmem:[#allocation60_spill] sm:$0xff] %v5059_v17  ;;  %6567 = vst [vmem:[#allocation61_spill] sm:$0xff] %v5062_v60  ;;  %v5065_v31 = vld [vmem:[#allocation9 + $0xa0] ss:$16 sps:$4 sm:$0xff]   ;;  %v5068_v15 = vld [vmem:[#allocation9 + $0xa8] ss:$16 sps:$4 sm:$0xff]  }
 0x310   :  { %1539 = vmatpush1.bf16.msra.mxu0 %v5053_v27  ;;  %1580 = vmatpush1.bf16.msra.mxu1 %v5056_v16  ;;  %v5071_v27 = vld [vmem:[#allocation9 + $0xc4] ss:$16 sps:$4 sm:$0xff]   ;;  %v5074_v16 = vld [vmem:[#allocation9 + $0xcc] ss:$16 sps:$4 sm:$0xff]  }
 0x311   :  { %1540 = vmatprep.subr.bf16.mxu0 %v5059_v17  ;;  %1581 = vmatprep.subr.bf16.mxu1 %v5062_v60  ;;  %v5077_v17 = vld [vmem:[#allocation9 + $0xc0] ss:$16 sps:$4 sm:$0xff]   ;;  %v5081_v60 = vld [vmem:[#allocation9 + $0xe4] ss:$16 sps:$4 sm:$0xff]  }
 0x312   :  { %6568 = vst [vmem:[#allocation62_spill] sm:$0xff] %v5077_v17  ;;  %6569 = vst [vmem:[#allocation63_spill] sm:$0xff] %v5081_v60 }
 0x314   :  { %1541 = vmatpush1.bf16.msra.mxu0 %v5065_v31  ;;  %1582 = vmatpush1.bf16.msra.mxu1 %v5068_v15 }
 0x315   :  { %1542 = vmatprep.subr.bf16.mxu0 %v5071_v27  ;;  %1583 = vmatprep.subr.bf16.mxu1 %v5074_v16 }
 0x318   :  { %1543 = vmatpush1.bf16.msra.mxu0 %v5077_v17  ;;  %1584 = vmatpush1.bf16.msra.mxu1 %v4610_v35  ;;  %v6570_v35 = vld [vmem:[#allocation24_spill] sm:$0xff] }
 0x319   :  { %1544 = vmatprep.subr.bf16.mxu0 %v5081_v60  ;;  %1585 = vmatprep.subr.bf16.mxu1 %v4614_v37  ;;  %v6572_v37 = vld [vmem:[#allocation26_spill] sm:$0xff] }
 0x31c   :  { %1545 = vmatpush1.bf16.msra.mxu0 %v4612_v36  ;;  %1586 = vmatpush1.bf16.msra.mxu1 %v4620_v38  ;;  %v6571_v36 = vld [vmem:[#allocation25_spill] sm:$0xff]  ;;  %v6573_v38 = vld [vmem:[#allocation27_spill] sm:$0xff] }
 0x31d   :  { %1661 = vmatprep.subr.bf16.mxu0 %v4630_v39  ;;  %1702 = vmatprep.subr.bf16.mxu1 %v4632_v40  ;;  %v6574_v39 = vld [vmem:[#allocation28_spill] sm:$0xff]  ;;  %v6575_v40 = vld [vmem:[#allocation29_spill] sm:$0xff] }
 0x31f   :  { %1563 = vmatmul.mubr.bf16.vlgmr.msra.gmra.mrb[24].mxu0 %v4961_v19  ;;  %1604 = vmatmul.mubr.bf16.vlgmr.msra.gmra.mrb[28].mxu1 %v4961_v19 }
 0x320   :  { %1662 = vmatpush1.bf16.msra.mxu0 %v4634_v41  ;;  %1703 = vmatpush1.bf16.msra.mxu1 %v4636_v42  ;;  %v6576_v41 = vld [vmem:[#allocation30_spill] sm:$0xff]  ;;  %v6577_v42 = vld [vmem:[#allocation31_spill] sm:$0xff] }
 0x321   :  { %1663 = vmatprep.subr.bf16.mxu0 %v4642_v43  ;;  %1704 = vmatprep.subr.bf16.mxu1 %v4644_v44  ;;  %v6578_v43 = vld [vmem:[#allocation32_spill] sm:$0xff]  ;;  %v6579_v44 = vld [vmem:[#allocation33_spill] sm:$0xff] }
 0x322   :  { %1693 = vmatprep.mubr.bf16.mxu0 %v6491_v1  ;;  %1734 = vmatprep.mubr.bf16.mxu1 %v6491_v1 }
 0x324   :  { %1664 = vmatpush1.bf16.msra.mxu0 %v4646_v45  ;;  %1705 = vmatpush1.bf16.msra.mxu1 %v4648_v46  ;;  %v6580_v45 = vld [vmem:[#allocation34_spill] sm:$0xff]  ;;  %v6581_v46 = vld [vmem:[#allocation35_spill] sm:$0xff] }
 0x325   :  { %1665 = vmatprep.subr.bf16.mxu0 %v4654_v47  ;;  %1706 = vmatprep.subr.bf16.mxu1 %v4656_v48  ;;  %v6582_v47 = vld [vmem:[#allocation36_spill] sm:$0xff]  ;;  %v6583_v48 = vld [vmem:[#allocation37_spill] sm:$0xff] }
 0x328   :  { %1666 = vmatpush1.bf16.msra.mxu0 %v4658_v49  ;;  %1707 = vmatpush1.bf16.msra.mxu1 %v4660_v50  ;;  %v6584_v49 = vld [vmem:[#allocation38_spill] sm:$0xff]  ;;  %v6585_v50 = vld [vmem:[#allocation39_spill] sm:$0xff] }
 0x329   :  { %1667 = vmatprep.subr.bf16.mxu0 %v6506_v7  ;;  %1708 = vmatprep.subr.bf16.mxu1 %v6507_v8  ;;  %v6586_v7 = vld [vmem:[#allocation40_spill] sm:$0xff]  ;;  %v6587_v8 = vld [vmem:[#allocation41_spill] sm:$0xff] }
 0x32c   :  { %1668 = vmatpush1.bf16.msra.mxu0 %v6508_v9  ;;  %1709 = vmatpush1.bf16.msra.mxu1 %v6570_v35  ;;  %v6588_v9 = vld [vmem:[#allocation42_spill] sm:$0xff] }
 0x32d   :  { %1669 = vmatprep.subr.bf16.mxu0 %v6571_v36  ;;  %1710 = vmatprep.subr.bf16.mxu1 %v6572_v37 }
 0x330   :  { %1670 = vmatpush1.bf16.msra.mxu0 %v6573_v38  ;;  %1711 = vmatpush1.bf16.msra.mxu1 %v6574_v39 }
 0x331   :  { %1671 = vmatprep.subr.bf16.mxu0 %v6575_v40  ;;  %1712 = vmatprep.subr.bf16.mxu1 %v6576_v41 }
 0x334   :  { %1672 = vmatpush1.bf16.msra.mxu0 %v6577_v42  ;;  %1713 = vmatpush1.bf16.msra.mxu1 %v6578_v43 }
 0x335   :  { %1673 = vmatprep.subr.bf16.mxu0 %v6579_v44  ;;  %1714 = vmatprep.subr.bf16.mxu1 %v6580_v45 }
 0x338   :  { %1674 = vmatpush1.bf16.msra.mxu0 %v6581_v46  ;;  %1715 = vmatpush1.bf16.msra.mxu1 %v6582_v47 }
 0x339   :  { %1675 = vmatprep.subr.bf16.mxu0 %v6583_v48  ;;  %1716 = vmatprep.subr.bf16.mxu1 %v6584_v49 }
 0x33c   :  { %1676 = vmatpush1.bf16.msra.mxu0 %v6585_v50  ;;  %1717 = vmatpush1.bf16.msra.mxu1 %v6586_v7 }
 0x33d   :  { %1743 = vmatprep.subr.bf16.mxu0 %v6587_v8  ;;  %1784 = vmatprep.subr.bf16.mxu1 %v6588_v9 }
 0x3b2   :  { %v1374_v19 = vpop.f32.mrb[16].mxu0  ;;  %v1415_v35 = vpop.f32.mrb[20].mxu1 }
 0x3b3   :  { %v1376_v36 = vpop.f32.mrb[17].mxu0  ;;  %v1417_v37 = vpop.f32.mrb[21].mxu1 }
 0x3b4   :  { %v1378_v38 = vpop.f32.mrb[18].mxu0  ;;  %v1419_v39 = vpop.f32.mrb[22].mxu1 }
 0x3b5   :  { %v1379_v40 = vpop.f32.mrb[19].mxu0  ;;  %v1420_v41 = vpop.f32.mrb[23].mxu1 }
 0x3d2   :  { %v1456_v42 = vpop.f32.mrb[20].mxu0  ;;  %v1497_v43 = vpop.f32.mrb[24].mxu1 }
 0x3d3   :  { %v1457_v44 = vadd.f32 %v1456_v42, %v1374_v19  ;;  %v1498_v45 = vadd.f32 %v1497_v43, %v1415_v35  ;;  %v1458_v46 = vpop.f32.mrb[21].mxu0  ;;  %v1499_v47 = vpop.f32.mrb[25].mxu1 }
 0x3d4   :  { %v1459_v48 = vadd.f32 %v1458_v46, %v1376_v36  ;;  %v1500_v49 = vadd.f32 %v1499_v47, %v1417_v37  ;;  %v1460_v50 = vpop.f32.mrb[22].mxu0  ;;  %v1501_v7 = vpop.f32.mrb[26].mxu1 }
 0x3d5   :  { %v1504_v8 = vadd.f32 %v1457_v44, %v4933_v21  ;;  %v1461_v9 = vpop.f32.mrb[23].mxu0  ;;  %v1502_v60 = vpop.f32.mrb[27].mxu1  ;;  %v1506_v19 = vadd.f32 %v1498_v45, %v4948_v29 }
 0x3d6   :  { %v1505_v17 = vadd.f32 %v1459_v48, %v4937_v26  ;;  %v1507_v40 = vadd.f32 %v1500_v49, %v4941_v14 }
 0x3d7   :  { %v1508_v38 = vmul.f32 0.5, %v1504_v8  ;;  %v1510_v35 = vmul.f32 0.5, %v1506_v19 }
 0x3d8   :  { %v1509_v39 = vmul.f32 0.5, %v1505_v17 }
 0x3d9   :  { %3914 = vtanh.f32 %v1508_v38 }
 0x3da   :  { %3916 = vtanh.f32 %v1509_v39 }
 0x3db   :  { %3918 = vtanh.f32 %v1507_v40 }
 0x3dc   :  { %3920 = vtanh.f32 %v1510_v35 }
 0x3e3   :  { %v3915_v36 = vpop.eup %3914 }
 0x3e4   :  { %v1514_v37 = vmul.f32 0.5, %v3915_v36  ;;  %v3917_v41 = vpop.eup %3916 }
 0x3e5   :  { %v1515_v43 = vmul.f32 0.5, %v3917_v41  ;;  %v3919_v44 = vpop.eup %3918 }
 0x3e6   :  { %v1517_v42 = vadd.f32 0.5, %v1514_v37  ;;  %v3921_v48 = vpop.eup %3920 }
 0x3e7   :  { %v1518_v60 = vadd.f32 0.5, %v1515_v43  ;;  %v1516_v45 = vmul.f32 0.5, %v3921_v48 }
 0x3e8   :  { %v1522_v46 = vmul.f32 %v3919_v44, %v1517_v42 }
 0x3e9   :  { %v1521_v47 = vmul.f32 %v1518_v60, %v4951_v34  ;;  %v1519_v37 = vadd.f32 0.5, %v1516_v45  ;;  %v1529_v60 = vld [vmem:[#allocation2 + $0x2] ss:$8 sm:$0xf] }
 0x3eb   :  { %v5130_v17 = vadd.f32 %v1522_v46, %v1521_v47 }
 0x3ed   :  { %3922 = vtanh.f32 %v5130_v17 }
 0x3f2   :  { %v1564_v49 = vpop.f32.mrb[24].mxu0  ;;  %v1605_v50 = vpop.f32.mrb[28].mxu1 }
 0x3f3   :  { %v1566_v7 = vpop.f32.mrb[25].mxu0  ;;  %v1607_v8 = vpop.f32.mrb[29].mxu1 }
 0x3f4   :  { %v1616_v9 = vcombine.low %v1564_v49, %v1566_v7  ;;  %v1617_v38 = vcombine.low %v1605_v50, %v1607_v8  ;;  %v1568_v39 = vpop.f32.mrb[26].mxu0  ;;  %v1609_v40 = vpop.f32.mrb[30].mxu1 }
 0x3f5   :  { %v1569_v19 = vpop.f32.mrb[27].mxu0  ;;  %v1610_v35 = vpop.f32.mrb[31].mxu1 }
 0x3f6   :  { %v1624_v36 = vrot.slane %v1616_v9, %v4750_v4  ;;  %v1631_v34 = vrot.slane %v1617_v38, %v4750_v4 }
 0x3f7   :  { %v3923_v41 = vpop.eup %3922 }
 0x3f8   :  { %v1632_v42 = vcombine.low %v1624_v36, %v1631_v34  ;;  %v1525_v43 = vmul.f32 %v3923_v41, %v1519_v37  ;;  %v5221_v34 = vld [vmem:[#allocation10 + $0xc] ss:$16 sps:$4 sm:$0xff]   ;;  %v5226_v37 = vld [vmem:[#allocation10] ss:$16 sps:$4 sm:$0xff]   ;;  %v5229_v41 = vld [vmem:[#allocation10 + $0x8] ss:$16 sps:$4 sm:$0xff]  }
 0x3f9   :  { %6613 = vst [vmem:[#allocation24_spill] sm:$0xff] %v5226_v37  ;;  %6614 = vst [vmem:[#allocation25_spill] sm:$0xff] %v5229_v41 }
 0x3fa   :  { %v1639_v44 = vrot.slane %v1632_v42, %v4750_v4  ;;  %1527 = vst [vmem:[#allocation3 + $0x1] sm:$0x1] %v1525_v43  ;;  %v5232_v42 = vld [vmem:[#allocation10 + $0x24] ss:$16 sps:$4 sm:$0xff]  }
 0x3fb   :  { %6615 = vst [vmem:[#allocation26_spill] sm:$0xff] %v5232_v42 }
 0x3fc   :  { %v1641_v46 = vadd.f32 %v1639_v44, %v1529_v60  ;;  %v5240_v44 = vld [vmem:[#allocation10 + $0x20] ss:$16 sps:$4 sm:$0xff]   ;;  %v5243_v60 = vld [vmem:[#allocation10 + $0x28] ss:$16 sps:$4 sm:$0xff]  }
 0x3fd   :  { %6617 = vst [vmem:[#allocation28_spill] sm:$0xff] %v5240_v44  ;;  %6618 = vst [vmem:[#allocation29_spill] sm:$0xff] %v5243_v60 }
 0x3fe   :  { %v1642_v47 = vmul.f32 0.5, %v1641_v46  ;;  %v1647_v48 = vrot.slane %v1641_v46, 3  ;;  %v5246_v46 = vld [vmem:[#allocation10 + $0x44] ss:$16 sps:$4 sm:$0xff]  }
 0x3ff   :  { %6619 = vst [vmem:[#allocation30_spill] sm:$0xff] %v5246_v46 }
 0x400   :  { %3924 = vtanh.f32 %v1642_v47  ;;  %v5249_v47 = vld [vmem:[#allocation10 + $0x4c] ss:$16 sps:$4 sm:$0xff]  }
 0x401   :  { %3926 = vtanh.f32 %v1647_v48  ;;  %6620 = vst [vmem:[#allocation31_spill] sm:$0xff] %v5249_v47  ;;  %v5252_v48 = vld [vmem:[#allocation10 + $0x40] ss:$16 sps:$4 sm:$0xff]  }
 0x402   :  { %6621 = vst [vmem:[#allocation32_spill] sm:$0xff] %v5252_v48 }
 0x40a   :  { %v3925_v49 = vpop.eup %3924 }
 0x40b   :  { %v1644_v50 = vmul.f32 0.5, %v3925_v49  ;;  %v3927_v9 = vpop.eup %3926  ;;  %v5255_v49 = vld [vmem:[#allocation10 + $0x48] ss:$16 sps:$4 sm:$0xff]  }
 0x40c   :  { %6622 = vst [vmem:[#allocation33_spill] sm:$0xff] %v5255_v49 }
 0x40d   :  { %v1645_v7 = vadd.f32 0.5, %v1644_v50  ;;  %v5258_v50 = vld [vmem:[#allocation10 + $0x64] ss:$16 sps:$4 sm:$0xff]  }
 0x40e   :  { %6623 = vst [vmem:[#allocation34_spill] sm:$0xff] %v5258_v50 }
 0x40f   :  { %v1651_v8 = vrot.slane %v1645_v7, 1  ;;  %v1654_v45 = vmul.f32 %v3927_v9, %v1645_v7  ;;  %v1657_v40 = vrot.slane %v1645_v7, 2  ;;  %v5261_v7 = vld [vmem:[#allocation10 + $0x6c] ss:$16 sps:$4 sm:$0xff]   ;;  %v5267_v9 = vld [vmem:[#allocation10 + $0x68] ss:$16 sps:$4 sm:$0xff]  }
 0x410   :  { %6624 = vst [vmem:[#allocation35_spill] sm:$0xff] %v5261_v7  ;;  %6626 = vst [vmem:[#allocation37_spill] sm:$0xff] %v5267_v9 }
 0x411   :  { %v1653_v38 = vmul.f32 %v1651_v8, %v4958_v28  ;;  %v6603_v28 = vld [vmem:[#allocation53_spill] sm:$0xff]  ;;  %v5264_v8 = vld [vmem:[#allocation10 + $0x60] ss:$16 sps:$4 sm:$0xff]  }
 0x412   :  { %6625 = vst [vmem:[#allocation36_spill] sm:$0xff] %v5264_v8 }
 0x413   :  { %v5137_v39 = vadd.f32 %v1654_v45, %v1653_v38  ;;  %v5270_v38 = vld [vmem:[#allocation10 + $0x84] ss:$16 sps:$4 sm:$0xff]   ;;  %v5273_v45 = vld [vmem:[#allocation10 + $0x8c] ss:$16 sps:$4 sm:$0xff]  }
 0x414   :  { %6627 = vst [vmem:[#allocation38_spill] sm:$0xff] %v5270_v38  ;;  %6628 = vst [vmem:[#allocation39_spill] sm:$0xff] %v5273_v45 }
 0x415   :  { %3928 = vtanh.f32 %v5137_v39 }
 0x41f   :  { %v3929_v19 = vpop.eup %3928 }
 0x420   :  { %v1659_v35 = vmul.f32 %v3929_v19, %v1657_v40  ;;  %v5276_v40 = vld [vmem:[#allocation10 + $0x80] ss:$16 sps:$4 sm:$0xff]   ;;  %v5279_v19 = vld [vmem:[#allocation10 + $0x88] ss:$16 sps:$4 sm:$0xff]  }
 0x421   :  { %6629 = vst [vmem:[#allocation40_spill] sm:$0xff] %v5276_v40  ;;  %6630 = vst [vmem:[#allocation41_spill] sm:$0xff] %v5279_v19 }
 0x422   :  { %v5140_v36 = vpack.c.bf16 %v1659_v35, %v1659_v35  ;;  %v5282_v35 = vld [vmem:[#allocation10 + $0xa4] ss:$16 sps:$4 sm:$0xff]  }
 0x423   :  { %6631 = vst [vmem:[#allocation42_spill] sm:$0xff] %v5282_v35 }
 0x424   :  { %1694 = vmatmul.mubr.bf16.vlgmr.msra.gmra.mrb[28].mxu0 %v5140_v36  ;;  %1735 = vmatmul.mubr.bf16.vlgmr.msra.gmra.mrb[32].mxu1 %v5140_v36 }
 0x425   :  { %1744 = vmatpush1.bf16.msra.mxu0 %v4758_v55  ;;  %1785 = vmatpush1.bf16.msra.mxu1 %v4760_v54  ;;  %v6589_v55 = vld [vmem:[#allocation58_spill] sm:$0xff]  ;;  %v1526_v54 = vpack.c.bf16 %v1525_v43, %v1525_v43  ;;  %v5235_v43 = vld [vmem:[#allocation10 + $0x2c] ss:$16 sps:$4 sm:$0xff]  }
 0x426   :  { %1745 = vmatprep.subr.bf16.mxu0 %v4764_v63  ;;  %1786 = vmatprep.subr.bf16.mxu1 %v4766_v53  ;;  %v6590_v63 = vld [vmem:[#allocation21_spill] sm:$0xff]  ;;  %v6591_v53 = vld [vmem:[#allocation22_spill] sm:$0xff]  ;;  %6616 = vst [vmem:[#allocation27_spill] sm:$0xff] %v5235_v43 }
 0x427   :  { %1775 = vmatprep.mubr.bf16.mxu0 %v6491_v1  ;;  %1816 = vmatprep.mubr.bf16.mxu1 %v6491_v1 }
 0x429   :  { %1746 = vmatpush1.bf16.msra.mxu0 %v4772_v3  ;;  %1787 = vmatpush1.bf16.msra.mxu1 %v4774_v57  ;;  %v6592_v3 = vld [vmem:[#allocation23_spill] sm:$0xff] }
 0x42a   :  { %1747 = vmatprep.subr.bf16.mxu0 %v4778_v5  ;;  %1788 = vmatprep.subr.bf16.mxu1 %v6533_v61  ;;  %v6593_v57 = vld [vmem:[#allocation43_spill] sm:$0xff]  ;;  %v6594_v5 = vld [vmem:[#allocation44_spill] sm:$0xff]  ;;  %v6604_v61 = vld [vmem:[#allocation54_spill] sm:$0xff] }
 0x42d   :  { %1748 = vmatpush1.bf16.msra.mxu0 %v6534_v13  ;;  %1789 = vmatpush1.bf16.msra.mxu1 %v6535_v12  ;;  %v6605_v13 = vld [vmem:[#allocation55_spill] sm:$0xff]  ;;  %v6606_v12 = vld [vmem:[#allocation56_spill] sm:$0xff] }
 0x42e   :  { %1749 = vmatprep.subr.bf16.mxu0 %v6536_v30  ;;  %1790 = vmatprep.subr.bf16.mxu1 %v6537_v32  ;;  %v6607_v30 = vld [vmem:[#allocation57_spill] sm:$0xff]  ;;  %v6608_v32 = vld [vmem:[#allocation59_spill] sm:$0xff] }
 0x431   :  { %1750 = vmatpush1.bf16.msra.mxu0 %v6538_v11  ;;  %1791 = vmatpush1.bf16.msra.mxu1 %v6539_v33  ;;  %v6609_v11 = vld [vmem:[#allocation60_spill] sm:$0xff]  ;;  %v6610_v33 = vld [vmem:[#allocation61_spill] sm:$0xff] }
 0x432   :  { %1751 = vmatprep.subr.bf16.mxu0 %v6540_v23  ;;  %1792 = vmatprep.subr.bf16.mxu1 %v6541_v10  ;;  %v6611_v23 = vld [vmem:[#allocation62_spill] sm:$0xff]  ;;  %v5205_v10 = vld [vmem:[#allocation9 + $0xc8] ss:$16 sps:$4 sm:$0xff]  }
 0x435   :  { %1752 = vmatpush1.bf16.msra.mxu0 %v6542_v24  ;;  %1793 = vmatpush1.bf16.msra.mxu1 %v6543_v18  ;;  %v6612_v24 = vld [vmem:[#allocation63_spill] sm:$0xff] }
 0x436   :  { %1753 = vmatprep.subr.bf16.mxu0 %v6544_v22  ;;  %1794 = vmatprep.subr.bf16.mxu1 %v6545_v20  ;;  %v5209_v18 = vld [vmem:[#allocation9 + $0xec] ss:$16 sps:$4 sm:$0xff]   ;;  %v5212_v22 = vld [vmem:[#allocation9 + $0xe0] ss:$16 sps:$4 sm:$0xff]   ;;  %v5215_v20 = vld [vmem:[#allocation9 + $0xe8] ss:$16 sps:$4 sm:$0xff]  }
 0x439   :  { %1754 = vmatpush1.bf16.msra.mxu0 %v6546_v25  ;;  %1795 = vmatpush1.bf16.msra.mxu1 %v4824_v51  ;;  %v6599_v51 = vld [vmem:[#allocation49_spill] sm:$0xff]  ;;  %v5218_v25 = vld [vmem:[#allocation10 + $0x4] ss:$16 sps:$4 sm:$0xff]  }
 0x43a   :  { %1755 = vmatprep.subr.bf16.mxu0 %v4828_v58  ;;  %1796 = vmatprep.subr.bf16.mxu1 %v4830_v59  ;;  %v6600_v58 = vld [vmem:[#allocation50_spill] sm:$0xff]  ;;  %v6601_v59 = vld [vmem:[#allocation51_spill] sm:$0xff] }
 0x43d   :  { %1756 = vmatpush1.bf16.msra.mxu0 %v4834_v2  ;;  %1797 = vmatpush1.bf16.msra.mxu1 %v4836_v52  ;;  %v6595_v52 = vld [vmem:[#allocation45_spill] sm:$0xff]  ;;  %v6602_v2 = vld [vmem:[#allocation52_spill] sm:$0xff] }
 0x43e   :  { %1757 = vmatprep.subr.bf16.mxu0 %v4840_v0  ;;  %1798 = vmatprep.subr.bf16.mxu1 %v4842_v62  ;;  %v6596_v0 = vld [vmem:[#allocation46_spill] sm:$0xff]  ;;  %v6597_v62 = vld [vmem:[#allocation47_spill] sm:$0xff] }
 0x441   :  { %1758 = vmatpush1.bf16.msra.mxu0 %v4846_v6  ;;  %1799 = vmatpush1.bf16.msra.mxu1 %v6589_v55  ;;  %v6598_v6 = vld [vmem:[#allocation48_spill] sm:$0xff] }
 0x442   :  { %1851 = vmatprep.subr.bf16.mxu0 %v4997_v56  ;;  %1892 = vmatprep.subr.bf16.mxu1 %v6590_v63  ;;  %v5288_v55 = vld [vmem:[#allocation10 + $0xa0] ss:$16 sps:$4 sm:$0xff]  }
 0x443   :  { %6633 = vst [vmem:[#allocation21_spill] sm:$0xff] %v5288_v55 }
 0x444   :  { %1776 = vmatmul.mubr.bf16.vlgmr.msra.gmra.mrb[32].mxu0 %v1526_v54  ;;  %1817 = vmatmul.mubr.bf16.vlgmr.msra.gmra.mrb[36].mxu1 %v1526_v54  ;;  %v5291_v54 = vld [vmem:[#allocation10 + $0xa8] ss:$16 sps:$4 sm:$0xff]  }
 0x445   :  { %1852 = vmatpush1.bf16.msra.mxu0 %v6591_v53  ;;  %1893 = vmatpush1.bf16.msra.mxu1 %v6592_v3  ;;  %6634 = vst [vmem:[#allocation22_spill] sm:$0xff] %v5291_v54 }
 0x446   :  { %1853 = vmatprep.subr.bf16.mxu0 %v6593_v57  ;;  %1894 = vmatprep.subr.bf16.mxu1 %v6594_v5 }
 0x447   :  { %1883 = vmatprep.mubr.bf16.mxu0 %v6491_v1  ;;  %1924 = vmatprep.mubr.bf16.mxu1 %v6491_v1 }
 0x449   :  { %1854 = vmatpush1.bf16.msra.mxu0 %v6595_v52  ;;  %1895 = vmatpush1.bf16.msra.mxu1 %v6596_v0 }
 0x44a   :  { %1855 = vmatprep.subr.bf16.mxu0 %v6597_v62  ;;  %1896 = vmatprep.subr.bf16.mxu1 %v6598_v6 }
 0x44d   :  { %1856 = vmatpush1.bf16.msra.mxu0 %v6599_v51  ;;  %1897 = vmatpush1.bf16.msra.mxu1 %v6600_v58 }
 0x44e   :  { %1857 = vmatprep.subr.bf16.mxu0 %v6601_v59  ;;  %1898 = vmatprep.subr.bf16.mxu1 %v6602_v2 }
 0x451   :  { %1858 = vmatpush1.bf16.msra.mxu0 %v6603_v28  ;;  %1899 = vmatpush1.bf16.msra.mxu1 %v6604_v61 }
 0x452   :  { %1859 = vmatprep.subr.bf16.mxu0 %v6605_v13  ;;  %1900 = vmatprep.subr.bf16.mxu1 %v6606_v12 }
 0x455   :  { %1860 = vmatpush1.bf16.msra.mxu0 %v6607_v30  ;;  %1901 = vmatpush1.bf16.msra.mxu1 %v6608_v32 }
 0x456   :  { %1861 = vmatprep.subr.bf16.mxu0 %v6609_v11  ;;  %1902 = vmatprep.subr.bf16.mxu1 %v6610_v33 }
 0x459   :  { %1862 = vmatpush1.bf16.msra.mxu0 %v5065_v31  ;;  %1903 = vmatpush1.bf16.msra.mxu1 %v5068_v15 }
 0x45a   :  { %1863 = vmatprep.subr.bf16.mxu0 %v5071_v27  ;;  %1904 = vmatprep.subr.bf16.mxu1 %v5074_v16 }
 0x45d   :  { %1864 = vmatpush1.bf16.msra.mxu0 %v6611_v23  ;;  %1905 = vmatpush1.bf16.msra.mxu1 %v5205_v10 }
 0x45e   :  { %1865 = vmatprep.subr.bf16.mxu0 %v6612_v24  ;;  %1906 = vmatprep.subr.bf16.mxu1 %v5209_v18 }
 0x461   :  { %1866 = vmatpush1.bf16.msra.mxu0 %v5212_v22  ;;  %1907 = vmatpush1.bf16.msra.mxu1 %v5215_v20 }
 0x462   :  { %1982 = vmatprep.subr.bf16.mxu0 %v5218_v25  ;;  %2023 = vmatprep.subr.bf16.mxu1 %v5221_v34 }
 0x464   :  { %1884 = vmatmul.mubr.bf16.vlgmr.msra.gmra.mrb[36].mxu0 %v5140_v36  ;;  %1925 = vmatmul.mubr.bf16.vlgmr.msra.gmra.mrb[40].mxu1 %v5140_v36  ;;  %v5285_v36 = vld [vmem:[#allocation10 + $0xac] ss:$16 sps:$4 sm:$0xff]  }
 0x465   :  { %1983 = vmatpush1.bf16.msra.mxu0 %v5226_v37  ;;  %2024 = vmatpush1.bf16.msra.mxu1 %v5229_v41  ;;  %6632 = vst [vmem:[#allocation58_spill] sm:$0xff] %v5285_v36 }
 0x466   :  { %1984 = vmatprep.subr.bf16.mxu0 %v5232_v42  ;;  %2025 = vmatprep.subr.bf16.mxu1 %v5235_v43 }
 0x467   :  { %2014 = vmatprep.mubr.bf16.mxu0 %v6491_v1  ;;  %2055 = vmatprep.mubr.bf16.mxu1 %v6491_v1 }
 0x469   :  { %1985 = vmatpush1.bf16.msra.mxu0 %v5240_v44  ;;  %2026 = vmatpush1.bf16.msra.mxu1 %v5243_v60 }
 0x46a   :  { %1986 = vmatprep.subr.bf16.mxu0 %v5246_v46  ;;  %2027 = vmatprep.subr.bf16.mxu1 %v5249_v47 }
 0x46d   :  { %1987 = vmatpush1.bf16.msra.mxu0 %v5252_v48  ;;  %2028 = vmatpush1.bf16.msra.mxu1 %v5255_v49 }
 0x46e   :  { %1988 = vmatprep.subr.bf16.mxu0 %v5258_v50  ;;  %2029 = vmatprep.subr.bf16.mxu1 %v5261_v7 }
 0x471   :  { %1989 = vmatpush1.bf16.msra.mxu0 %v5264_v8  ;;  %2030 = vmatpush1.bf16.msra.mxu1 %v5267_v9 }
 0x472   :  { %1990 = vmatprep.subr.bf16.mxu0 %v5270_v38  ;;  %2031 = vmatprep.subr.bf16.mxu1 %v5273_v45 }
 0x475   :  { %1991 = vmatpush1.bf16.msra.mxu0 %v5276_v40  ;;  %2032 = vmatpush1.bf16.msra.mxu1 %v5279_v19  ;;  %v5294_v40 = vld [vmem:[#allocation10 + $0xc4] ss:$16 sps:$4 sm:$0xff]   ;;  %v5297_v19 = vld [vmem:[#allocation10 + $0xcc] ss:$16 sps:$4 sm:$0xff]  }
 0x476   :  { %1992 = vmatprep.subr.bf16.mxu0 %v5282_v35  ;;  %2033 = vmatprep.subr.bf16.mxu1 %v5285_v36  ;;  %6635 = vst [vmem:[#allocation23_spill] sm:$0xff] %v5294_v40  ;;  %6636 = vst [vmem:[#allocation43_spill] sm:$0xff] %v5297_v19  ;;  %v5300_v35 = vld [vmem:[#allocation10 + $0xc0] ss:$16 sps:$4 sm:$0xff]   ;;  %v5303_v36 = vld [vmem:[#allocation10 + $0xc8] ss:$16 sps:$4 sm:$0xff]  }
 0x477   :  { %6637 = vst [vmem:[#allocation44_spill] sm:$0xff] %v5300_v35  ;;  %6638 = vst [vmem:[#allocation45_spill] sm:$0xff] %v5303_v36 }
 0x479   :  { %1993 = vmatpush1.bf16.msra.mxu0 %v5288_v55  ;;  %2034 = vmatpush1.bf16.msra.mxu1 %v5291_v54  ;;  %v5306_v55 = vld [vmem:[#allocation10 + $0xe4] ss:$16 sps:$4 sm:$0xff]   ;;  %v5309_v54 = vld [vmem:[#allocation10 + $0xec] ss:$16 sps:$4 sm:$0xff]  }
 0x47a   :  { %1994 = vmatprep.subr.bf16.mxu0 %v5294_v40  ;;  %2035 = vmatprep.subr.bf16.mxu1 %v5297_v19  ;;  %6639 = vst [vmem:[#allocation46_spill] sm:$0xff] %v5306_v55  ;;  %6640 = vst [vmem:[#allocation47_spill] sm:$0xff] %v5309_v54  ;;  %v5312_v40 = vld [vmem:[#allocation10 + $0xe0] ss:$16 sps:$4 sm:$0xff]   ;;  %v5315_v19 = vld [vmem:[#allocation10 + $0xe8] ss:$16 sps:$4 sm:$0xff]  }
 0x47b   :  { %6641 = vst [vmem:[#allocation48_spill] sm:$0xff] %v5312_v40  ;;  %6642 = vst [vmem:[#allocation49_spill] sm:$0xff] %v5315_v19 }
 0x47d   :  { %1995 = vmatpush1.bf16.msra.mxu0 %v5300_v35  ;;  %2036 = vmatpush1.bf16.msra.mxu1 %v5303_v36  ;;  %v5318_v35 = vld [vmem:[#allocation12 + $0x4] ss:$16 sps:$4 sm:$0xff]   ;;  %v5321_v36 = vld [vmem:[#allocation12 + $0xc] ss:$16 sps:$4 sm:$0xff]  }
 0x47e   :  { %1996 = vmatprep.subr.bf16.mxu0 %v5306_v55  ;;  %2037 = vmatprep.subr.bf16.mxu1 %v5309_v54  ;;  %6643 = vst [vmem:[#allocation50_spill] sm:$0xff] %v5318_v35  ;;  %6644 = vst [vmem:[#allocation51_spill] sm:$0xff] %v5321_v36 }
 0x481   :  { %1997 = vmatpush1.bf16.msra.mxu0 %v5312_v40  ;;  %2038 = vmatpush1.bf16.msra.mxu1 %v5315_v19 }
 0x482   :  { %2064 = vmatprep.subr.bf16.mxu0 %v5318_v35  ;;  %2105 = vmatprep.subr.bf16.mxu1 %v5321_v36 }
 0x4f7   :  { %v1695_v55 = vpop.f32.mrb[28].mxu0  ;;  %v1736_v45 = vpop.f32.mrb[32].mxu1 }
 0x4f8   :  { %v1697_v38 = vpop.f32.mrb[29].mxu0  ;;  %v1738_v54 = vpop.f32.mrb[33].mxu1 }
 0x4f9   :  { %v1699_v9 = vpop.f32.mrb[30].mxu0  ;;  %v1740_v8 = vpop.f32.mrb[34].mxu1 }
 0x4fa   :  { %v1700_v7 = vpop.f32.mrb[31].mxu0  ;;  %v1741_v40 = vpop.f32.mrb[35].mxu1 }
 0x517   :  { %v1777_v50 = vpop.f32.mrb[32].mxu0  ;;  %v1818_v49 = vpop.f32.mrb[36].mxu1 }
 0x518   :  { %v1778_v48 = vadd.f32 %v1777_v50, %v1695_v55  ;;  %v1819_v19 = vadd.f32 %v1818_v49, %v1736_v45  ;;  %v1779_v47 = vpop.f32.mrb[33].mxu0  ;;  %v1820_v46 = vpop.f32.mrb[37].mxu1 }
 0x519   :  { %v1780_v60 = vadd.f32 %v1779_v47, %v1697_v38  ;;  %v1821_v35 = vadd.f32 %v1820_v46, %v1738_v54  ;;  %v1781_v44 = vpop.f32.mrb[34].mxu0  ;;  %v1822_v43 = vpop.f32.mrb[38].mxu1 }
 0x51a   :  { %v1825_v36 = vadd.f32 %v1778_v48, %v4933_v21  ;;  %v1782_v42 = vpop.f32.mrb[35].mxu0  ;;  %v1823_v41 = vpop.f32.mrb[39].mxu1  ;;  %v1827_v49 = vadd.f32 %v1819_v19, %v4948_v29 }
 0x51b   :  { %v1826_v37 = vadd.f32 %v1780_v60, %v4937_v26  ;;  %v1828_v7 = vadd.f32 %v1821_v35, %v4941_v14 }
 0x51c   :  { %v1829_v9 = vmul.f32 0.5, %v1825_v36  ;;  %v1831_v50 = vmul.f32 0.5, %v1827_v49 }
 0x51d   :  { %v1830_v8 = vmul.f32 0.5, %v1826_v37 }
 0x51e   :  { %3930 = vtanh.f32 %v1829_v9 }
 0x51f   :  { %3932 = vtanh.f32 %v1830_v8 }
 0x520   :  { %3934 = vtanh.f32 %v1828_v7 }
 0x521   :  { %3936 = vtanh.f32 %v1831_v50 }
 0x528   :  { %v3931_v47 = vpop.eup %3930 }
 0x529   :  { %v1835_v46 = vmul.f32 0.5, %v3931_v47  ;;  %v3933_v44 = vpop.eup %3932 }
 0x52a   :  { %v1836_v48 = vmul.f32 0.5, %v3933_v44  ;;  %v3935_v42 = vpop.eup %3934 }
 0x52b   :  { %v1838_v43 = vadd.f32 0.5, %v1835_v46  ;;  %v3937_v45 = vpop.eup %3936 }
 0x52c   :  { %v1839_v41 = vadd.f32 0.5, %v1836_v48  ;;  %v1837_v19 = vmul.f32 0.5, %v3937_v45 }
 0x52d   :  { %v1843_v38 = vmul.f32 %v3935_v42, %v1838_v43 }
 0x52e   :  { %v1842_v60 = vmul.f32 %v1839_v41, %v5130_v17  ;;  %v1840_v46 = vadd.f32 0.5, %v1837_v19  ;;  %v1850_v41 = vld [vmem:[#allocation2 + $0x3] ss:$8 sm:$0xf] }
 0x530   :  { %v5329_v37 = vadd.f32 %v1843_v38, %v1842_v60 }
 0x532   :  { %3938 = vtanh.f32 %v5329_v37 }
 0x537   :  { %v1885_v40 = vpop.f32.mrb[36].mxu0  ;;  %v1926_v35 = vpop.f32.mrb[40].mxu1 }
 0x538   :  { %v1887_v36 = vpop.f32.mrb[37].mxu0  ;;  %v1928_v55 = vpop.f32.mrb[41].mxu1 }
 0x539   :  { %v1937_v54 = vcombine.low %v1885_v40, %v1887_v36  ;;  %v1938_v9 = vcombine.low %v1926_v35, %v1928_v55  ;;  %v1889_v8 = vpop.f32.mrb[38].mxu0  ;;  %v1930_v7 = vpop.f32.mrb[42].mxu1 }
 0x53a   :  { %v1890_v49 = vpop.f32.mrb[39].mxu0  ;;  %v1931_v50 = vpop.f32.mrb[43].mxu1 }
 0x53b   :  { %v1945_v47 = vrot.slane %v1937_v54, %v4750_v4  ;;  %v1952_v17 = vrot.slane %v1938_v9, %v4750_v4 }
 0x53c   :  { %v3939_v44 = vpop.eup %3938 }
 0x53d   :  { %v1953_v43 = vcombine.low %v1945_v47, %v1952_v17  ;;  %v5334_v48 = vmul.f32 %v3939_v44, %v1840_v46  ;;  %v5346_v17 = vld [vmem:[#allocation12] ss:$16 sps:$4 sm:$0xff]   ;;  %v5349_v46 = vld [vmem:[#allocation12 + $0x8] ss:$16 sps:$4 sm:$0xff]   ;;  %v5355_v44 = vld [vmem:[#allocation12 + $0x2c] ss:$16 sps:$4 sm:$0xff]  }
 0x53f   :  { %v1960_v42 = vrot.slane %v1953_v43, %v4750_v4  ;;  %1848 = vst [vmem:[#allocation3 + $0x2] sm:$0x1] %v5334_v48  ;;  %v5360_v43 = vld [vmem:[#allocation12 + $0x20] ss:$16 sps:$4 sm:$0xff]  }
 0x541   :  { %v1962_v38 = vadd.f32 %v1960_v42, %v1850_v41  ;;  %v5363_v42 = vld [vmem:[#allocation12 + $0x28] ss:$16 sps:$4 sm:$0xff]   ;;  %v5366_v41 = vld [vmem:[#allocation12 + $0x44] ss:$16 sps:$4 sm:$0xff]  }
 0x543   :  { %v1963_v60 = vmul.f32 0.5, %v1962_v38  ;;  %v1968_v45 = vrot.slane %v1962_v38, 3  ;;  %v5369_v38 = vld [vmem:[#allocation12 + $0x4c] ss:$16 sps:$4 sm:$0xff]  }
 0x545   :  { %3940 = vtanh.f32 %v1963_v60  ;;  %v5372_v60 = vld [vmem:[#allocation12 + $0x40] ss:$16 sps:$4 sm:$0xff]  }
 0x546   :  { %3942 = vtanh.f32 %v1968_v45  ;;  %v5375_v45 = vld [vmem:[#allocation12 + $0x48] ss:$16 sps:$4 sm:$0xff]  }
 0x54f   :  { %v3941_v40 = vpop.eup %3940 }
 0x550   :  { %v1965_v35 = vmul.f32 0.5, %v3941_v40  ;;  %v3943_v54 = vpop.eup %3942  ;;  %v5378_v40 = vld [vmem:[#allocation12 + $0x64] ss:$16 sps:$4 sm:$0xff]  }
 0x552   :  { %v1966_v36 = vadd.f32 0.5, %v1965_v35  ;;  %v5381_v35 = vld [vmem:[#allocation12 + $0x6c] ss:$16 sps:$4 sm:$0xff]  }
 0x554   :  { %v1972_v55 = vrot.slane %v1966_v36, 1  ;;  %v1975_v9 = vmul.f32 %v3943_v54, %v1966_v36  ;;  %v1978_v7 = vrot.slane %v1966_v36, 2  ;;  %v5384_v36 = vld [vmem:[#allocation12 + $0x60] ss:$16 sps:$4 sm:$0xff]   ;;  %v5390_v54 = vld [vmem:[#allocation12 + $0x84] ss:$16 sps:$4 sm:$0xff]  }
 0x555   :  { %6645 = vst [vmem:[#allocation52_spill] sm:$0xff] %v5390_v54 }
 0x556   :  { %v1974_v19 = vmul.f32 %v1972_v55, %v5137_v39  ;;  %v5352_v39 = vld [vmem:[#allocation12 + $0x24] ss:$16 sps:$4 sm:$0xff]   ;;  %v5387_v55 = vld [vmem:[#allocation12 + $0x68] ss:$16 sps:$4 sm:$0xff]  }
 0x558   :  { %v5339_v8 = vadd.f32 %v1975_v9, %v1974_v19  ;;  %v5393_v19 = vld [vmem:[#allocation12 + $0x8c] ss:$16 sps:$4 sm:$0xff]   ;;  %v5396_v9 = vld [vmem:[#allocation12 + $0x80] ss:$16 sps:$4 sm:$0xff]  }
 0x559   :  { %6646 = vst [vmem:[#allocation53_spill] sm:$0xff] %v5393_v19  ;;  %6647 = vst [vmem:[#allocation54_spill] sm:$0xff] %v5396_v9 }
 0x55a   :  { %3944 = vtanh.f32 %v5339_v8 }
 0x564   :  { %v3945_v49 = vpop.eup %3944 }
 0x565   :  { %v1980_v50 = vmul.f32 %v3945_v49, %v1978_v7  ;;  %v5399_v7 = vld [vmem:[#allocation12 + $0x88] ss:$16 sps:$4 sm:$0xff]   ;;  %v5402_v49 = vld [vmem:[#allocation12 + $0xa4] ss:$16 sps:$4 sm:$0xff]  }
 0x566   :  { %6648 = vst [vmem:[#allocation55_spill] sm:$0xff] %v5399_v7  ;;  %6649 = vst [vmem:[#allocation56_spill] sm:$0xff] %v5402_v49 }
 0x567   :  { %v5342_v47 = vpack.c.bf16 %v1980_v50, %v1980_v50  ;;  %v5405_v50 = vld [vmem:[#allocation12 + $0xac] ss:$16 sps:$4 sm:$0xff]  }
 0x568   :  { %6650 = vst [vmem:[#allocation57_spill] sm:$0xff] %v5405_v50 }
 0x569   :  { %2015 = vmatmul.mubr.bf16.vlgmr.msra.gmra.mrb[40].mxu0 %v5342_v47  ;;  %2056 = vmatmul.mubr.bf16.vlgmr.msra.gmra.mrb[44].mxu1 %v5342_v47 }
 0x56a   :  { %2065 = vmatpush1.bf16.msra.mxu0 %v5346_v17  ;;  %2106 = vmatpush1.bf16.msra.mxu1 %v5349_v46 }
 0x56b   :  { %2066 = vmatprep.subr.bf16.mxu0 %v5352_v39  ;;  %2107 = vmatprep.subr.bf16.mxu1 %v5355_v44 }
 0x56c   :  { %2096 = vmatprep.mubr.bf16.mxu0 %v6491_v1  ;;  %2137 = vmatprep.mubr.bf16.mxu1 %v6491_v1 }
 0x56e   :  { %2067 = vmatpush1.bf16.msra.mxu0 %v5360_v43  ;;  %2108 = vmatpush1.bf16.msra.mxu1 %v5363_v42 }
 0x56f   :  { %2068 = vmatprep.subr.bf16.mxu0 %v5366_v41  ;;  %2109 = vmatprep.subr.bf16.mxu1 %v5369_v38 }
 0x572   :  { %2069 = vmatpush1.bf16.msra.mxu0 %v5372_v60  ;;  %2110 = vmatpush1.bf16.msra.mxu1 %v5375_v45 }
 0x573   :  { %2070 = vmatprep.subr.bf16.mxu0 %v5378_v40  ;;  %2111 = vmatprep.subr.bf16.mxu1 %v5381_v35 }
 0x576   :  { %2071 = vmatpush1.bf16.msra.mxu0 %v5384_v36  ;;  %2112 = vmatpush1.bf16.msra.mxu1 %v5387_v55 }
 0x577   :  { %2072 = vmatprep.subr.bf16.mxu0 %v5390_v54  ;;  %2113 = vmatprep.subr.bf16.mxu1 %v5393_v19  ;;  %v5408_v54 = vld [vmem:[#allocation12 + $0xa0] ss:$16 sps:$4 sm:$0xff]   ;;  %v5411_v19 = vld [vmem:[#allocation12 + $0xa8] ss:$16 sps:$4 sm:$0xff]  }
 0x578   :  { %6651 = vst [vmem:[#allocation59_spill] sm:$0xff] %v5408_v54  ;;  %6652 = vst [vmem:[#allocation60_spill] sm:$0xff] %v5411_v19 }
 0x57a   :  { %2073 = vmatpush1.bf16.msra.mxu0 %v5396_v9  ;;  %2114 = vmatpush1.bf16.msra.mxu1 %v5399_v7  ;;  %v5414_v9 = vld [vmem:[#allocation12 + $0xc4] ss:$16 sps:$4 sm:$0xff]   ;;  %v5417_v7 = vld [vmem:[#allocation12 + $0xcc] ss:$16 sps:$4 sm:$0xff]  }
 0x57b   :  { %2074 = vmatprep.subr.bf16.mxu0 %v5402_v49  ;;  %2115 = vmatprep.subr.bf16.mxu1 %v5405_v50  ;;  %6653 = vst [vmem:[#allocation61_spill] sm:$0xff] %v5414_v9  ;;  %6654 = vst [vmem:[#allocation62_spill] sm:$0xff] %v5417_v7  ;;  %v5420_v49 = vld [vmem:[#allocation12 + $0xc0] ss:$16 sps:$4 sm:$0xff]   ;;  %v5423_v50 = vld [vmem:[#allocation12 + $0xc8] ss:$16 sps:$4 sm:$0xff]  }
 0x57c   :  { %6655 = vst [vmem:[#allocation63_spill] sm:$0xff] %v5420_v49 }
 0x57e   :  { %2075 = vmatpush1.bf16.msra.mxu0 %v5408_v54  ;;  %2116 = vmatpush1.bf16.msra.mxu1 %v5411_v19  ;;  %v5426_v54 = vld [vmem:[#allocation12 + $0xe4] ss:$16 sps:$4 sm:$0xff]   ;;  %v5429_v19 = vld [vmem:[#allocation12 + $0xec] ss:$16 sps:$4 sm:$0xff]  }
 0x57f   :  { %2076 = vmatprep.subr.bf16.mxu0 %v5414_v9  ;;  %2117 = vmatprep.subr.bf16.mxu1 %v5417_v7  ;;  %v5432_v9 = vld [vmem:[#allocation12 + $0xe0] ss:$16 sps:$4 sm:$0xff]   ;;  %v5435_v7 = vld [vmem:[#allocation12 + $0xe8] ss:$16 sps:$4 sm:$0xff]  }
 0x582   :  { %2077 = vmatpush1.bf16.msra.mxu0 %v5420_v49  ;;  %2118 = vmatpush1.bf16.msra.mxu1 %v5423_v50  ;;  %v1847_v49 = vpack.c.bf16 %v5334_v48, %v5334_v48  ;;  %v6684_v48 = vld [vmem:[#allocation48_spill] sm:$0xff] }
 0x583   :  { %2078 = vmatprep.subr.bf16.mxu0 %v5426_v54  ;;  %2119 = vmatprep.subr.bf16.mxu1 %v5429_v19 }
 0x586   :  { %2079 = vmatpush1.bf16.msra.mxu0 %v5432_v9  ;;  %2120 = vmatpush1.bf16.msra.mxu1 %v5435_v7 }
 0x587   :  { %2172 = vmatprep.subr.bf16.mxu0 %v4997_v56  ;;  %2213 = vmatprep.subr.bf16.mxu1 %v6590_v63  ;;  %v6656_v56 = vld [vmem:[#allocation24_spill] sm:$0xff]  ;;  %v6661_v63 = vld [vmem:[#allocation29_spill] sm:$0xff] }
 0x589   :  { %2097 = vmatmul.mubr.bf16.vlgmr.msra.gmra.mrb[44].mxu0 %v1847_v49  ;;  %2138 = vmatmul.mubr.bf16.vlgmr.msra.gmra.mrb[48].mxu1 %v1847_v49  ;;  %v6686_v49 = vld [vmem:[#allocation50_spill] sm:$0xff] }
 0x58a   :  { %2173 = vmatpush1.bf16.msra.mxu0 %v6591_v53  ;;  %2214 = vmatpush1.bf16.msra.mxu1 %v6592_v3  ;;  %v6662_v53 = vld [vmem:[#allocation30_spill] sm:$0xff]  ;;  %v6663_v3 = vld [vmem:[#allocation31_spill] sm:$0xff] }
 0x58b   :  { %2174 = vmatprep.subr.bf16.mxu0 %v6593_v57  ;;  %2215 = vmatprep.subr.bf16.mxu1 %v6594_v5  ;;  %v6664_v57 = vld [vmem:[#allocation32_spill] sm:$0xff]  ;;  %v6665_v5 = vld [vmem:[#allocation33_spill] sm:$0xff] }
 0x58c   :  { %2204 = vmatprep.mubr.bf16.mxu0 %v6491_v1  ;;  %2245 = vmatprep.mubr.bf16.mxu1 %v6491_v1 }
 0x58e   :  { %2175 = vmatpush1.bf16.msra.mxu0 %v6595_v52  ;;  %2216 = vmatpush1.bf16.msra.mxu1 %v6596_v0  ;;  %v6666_v52 = vld [vmem:[#allocation34_spill] sm:$0xff]  ;;  %v6667_v0 = vld [vmem:[#allocation35_spill] sm:$0xff] }
 0x58f   :  { %2176 = vmatprep.subr.bf16.mxu0 %v6597_v62  ;;  %2217 = vmatprep.subr.bf16.mxu1 %v6598_v6  ;;  %v6668_v62 = vld [vmem:[#allocation36_spill] sm:$0xff]  ;;  %v6669_v6 = vld [vmem:[#allocation37_spill] sm:$0xff] }
 0x592   :  { %2177 = vmatpush1.bf16.msra.mxu0 %v6599_v51  ;;  %2218 = vmatpush1.bf16.msra.mxu1 %v6600_v58  ;;  %v6670_v51 = vld [vmem:[#allocation38_spill] sm:$0xff]  ;;  %v6671_v58 = vld [vmem:[#allocation39_spill] sm:$0xff] }
 0x593   :  { %2178 = vmatprep.subr.bf16.mxu0 %v6601_v59  ;;  %2219 = vmatprep.subr.bf16.mxu1 %v6602_v2  ;;  %v6672_v59 = vld [vmem:[#allocation40_spill] sm:$0xff]  ;;  %v6673_v2 = vld [vmem:[#allocation41_spill] sm:$0xff] }
 0x596   :  { %2179 = vmatpush1.bf16.msra.mxu0 %v6603_v28  ;;  %2220 = vmatpush1.bf16.msra.mxu1 %v6604_v61  ;;  %v6674_v28 = vld [vmem:[#allocation42_spill] sm:$0xff] }
 0x597   :  { %2180 = vmatprep.subr.bf16.mxu0 %v6605_v13  ;;  %2221 = vmatprep.subr.bf16.mxu1 %v6606_v12  ;;  %v6675_v61 = vld [vmem:[#allocation58_spill] sm:$0xff]  ;;  %v6676_v13 = vld [vmem:[#allocation21_spill] sm:$0xff] }
 0x598   :  { %v6677_v12 = vld [vmem:[#allocation22_spill] sm:$0xff] }
 0x59a   :  { %2181 = vmatpush1.bf16.msra.mxu0 %v6607_v30  ;;  %2222 = vmatpush1.bf16.msra.mxu1 %v6608_v32  ;;  %v6678_v30 = vld [vmem:[#allocation23_spill] sm:$0xff] }
 0x59b   :  { %2182 = vmatprep.subr.bf16.mxu0 %v6609_v11  ;;  %2223 = vmatprep.subr.bf16.mxu1 %v6610_v33  ;;  %v6679_v32 = vld [vmem:[#allocation43_spill] sm:$0xff]  ;;  %v6680_v11 = vld [vmem:[#allocation44_spill] sm:$0xff]  ;;  %v6681_v33 = vld [vmem:[#allocation45_spill] sm:$0xff] }
 0x59e   :  { %2183 = vmatpush1.bf16.msra.mxu0 %v5065_v31  ;;  %2224 = vmatpush1.bf16.msra.mxu1 %v5068_v15  ;;  %v6657_v15 = vld [vmem:[#allocation25_spill] sm:$0xff]  ;;  %v6659_v31 = vld [vmem:[#allocation27_spill] sm:$0xff] }
 0x59f   :  { %2184 = vmatprep.subr.bf16.mxu0 %v5071_v27  ;;  %2225 = vmatprep.subr.bf16.mxu1 %v5074_v16  ;;  %v6658_v16 = vld [vmem:[#allocation26_spill] sm:$0xff]  ;;  %v6660_v27 = vld [vmem:[#allocation28_spill] sm:$0xff] }
 0x5a2   :  { %2185 = vmatpush1.bf16.msra.mxu0 %v6611_v23  ;;  %2226 = vmatpush1.bf16.msra.mxu1 %v5205_v10  ;;  %v6682_v23 = vld [vmem:[#allocation46_spill] sm:$0xff] }
 0x5a3   :  { %2186 = vmatprep.subr.bf16.mxu0 %v6612_v24  ;;  %2227 = vmatprep.subr.bf16.mxu1 %v5209_v18  ;;  %v6683_v24 = vld [vmem:[#allocation47_spill] sm:$0xff] }
 0x5a6   :  { %2187 = vmatpush1.bf16.msra.mxu0 %v5212_v22  ;;  %2228 = vmatpush1.bf16.msra.mxu1 %v5215_v20 }
 0x5a7   :  { %2303 = vmatprep.subr.bf16.mxu0 %v5218_v25  ;;  %2344 = vmatprep.subr.bf16.mxu1 %v5221_v34 }
 0x5a9   :  { %2205 = vmatmul.mubr.bf16.vlgmr.msra.gmra.mrb[48].mxu0 %v5342_v47  ;;  %2246 = vmatmul.mubr.bf16.vlgmr.msra.gmra.mrb[52].mxu1 %v5342_v47  ;;  %v6685_v47 = vld [vmem:[#allocation49_spill] sm:$0xff] }
 0x5aa   :  { %2304 = vmatpush1.bf16.msra.mxu0 %v6656_v56  ;;  %2345 = vmatpush1.bf16.msra.mxu1 %v6657_v15 }
 0x5ab   :  { %2305 = vmatprep.subr.bf16.mxu0 %v6658_v16  ;;  %2346 = vmatprep.subr.bf16.mxu1 %v6659_v31 }
 0x5ac   :  { %2335 = vmatprep.mubr.bf16.mxu0 %v6491_v1  ;;  %2376 = vmatprep.mubr.bf16.mxu1 %v6491_v1 }
 0x5ae   :  { %2306 = vmatpush1.bf16.msra.mxu0 %v6660_v27  ;;  %2347 = vmatpush1.bf16.msra.mxu1 %v6661_v63 }
 0x5af   :  { %2307 = vmatprep.subr.bf16.mxu0 %v6662_v53  ;;  %2348 = vmatprep.subr.bf16.mxu1 %v6663_v3 }
 0x5b2   :  { %2308 = vmatpush1.bf16.msra.mxu0 %v6664_v57  ;;  %2349 = vmatpush1.bf16.msra.mxu1 %v6665_v5 }
 0x5b3   :  { %2309 = vmatprep.subr.bf16.mxu0 %v6666_v52  ;;  %2350 = vmatprep.subr.bf16.mxu1 %v6667_v0 }
 0x5b6   :  { %2310 = vmatpush1.bf16.msra.mxu0 %v6668_v62  ;;  %2351 = vmatpush1.bf16.msra.mxu1 %v6669_v6 }
 0x5b7   :  { %2311 = vmatprep.subr.bf16.mxu0 %v6670_v51  ;;  %2352 = vmatprep.subr.bf16.mxu1 %v6671_v58 }
 0x5ba   :  { %2312 = vmatpush1.bf16.msra.mxu0 %v6672_v59  ;;  %2353 = vmatpush1.bf16.msra.mxu1 %v6673_v2 }
 0x5bb   :  { %2313 = vmatprep.subr.bf16.mxu0 %v6674_v28  ;;  %2354 = vmatprep.subr.bf16.mxu1 %v6675_v61 }
 0x5be   :  { %2314 = vmatpush1.bf16.msra.mxu0 %v6676_v13  ;;  %2355 = vmatpush1.bf16.msra.mxu1 %v6677_v12  ;;  %v6687_v13 = vld [vmem:[#allocation51_spill] sm:$0xff] }
 0x5bf   :  { %2315 = vmatprep.subr.bf16.mxu0 %v6678_v30  ;;  %2356 = vmatprep.subr.bf16.mxu1 %v6679_v32 }
 0x5c2   :  { %2316 = vmatpush1.bf16.msra.mxu0 %v6680_v11  ;;  %2357 = vmatpush1.bf16.msra.mxu1 %v6681_v33 }
 0x5c3   :  { %2317 = vmatprep.subr.bf16.mxu0 %v6682_v23  ;;  %2358 = vmatprep.subr.bf16.mxu1 %v6683_v24 }
 0x5c6   :  { %2318 = vmatpush1.bf16.msra.mxu0 %v6684_v48  ;;  %2359 = vmatpush1.bf16.msra.mxu1 %v6685_v47 }
 0x5c7   :  { %2385 = vmatprep.subr.bf16.mxu0 %v6686_v49  ;;  %2426 = vmatprep.subr.bf16.mxu1 %v6687_v13 }
 0x63c   :  { %v2016_v12 = vpop.f32.mrb[40].mxu0  ;;  %v2057_v30 = vpop.f32.mrb[44].mxu1 }
 0x63d   :  { %v2018_v61 = vpop.f32.mrb[41].mxu0  ;;  %v2059_v32 = vpop.f32.mrb[45].mxu1 }
 0x63e   :  { %v2020_v28 = vpop.f32.mrb[42].mxu0  ;;  %v2061_v11 = vpop.f32.mrb[46].mxu1 }
 0x63f   :  { %v2021_v2 = vpop.f32.mrb[43].mxu0  ;;  %v2062_v33 = vpop.f32.mrb[47].mxu1 }
 0x65c   :  { %v2098_v59 = vpop.f32.mrb[44].mxu0  ;;  %v2139_v23 = vpop.f32.mrb[48].mxu1 }
 0x65d   :  { %v2099_v58 = vadd.f32 %v2098_v59, %v2016_v12  ;;  %v2140_v24 = vadd.f32 %v2139_v23, %v2057_v30  ;;  %v2100_v51 = vpop.f32.mrb[45].mxu0  ;;  %v2141_v48 = vpop.f32.mrb[49].mxu1 }
 0x65e   :  { %v2101_v6 = vadd.f32 %v2100_v51, %v2018_v61  ;;  %v2142_v47 = vadd.f32 %v2141_v48, %v2059_v32  ;;  %v2102_v62 = vpop.f32.mrb[46].mxu0  ;;  %v2143_v49 = vpop.f32.mrb[50].mxu1 }
 0x65f   :  { %v2146_v13 = vadd.f32 %v2099_v58, %v4933_v21  ;;  %v2103_v0 = vpop.f32.mrb[47].mxu0  ;;  %v2144_v52 = vpop.f32.mrb[51].mxu1  ;;  %v2148_v59 = vadd.f32 %v2140_v24, %v4948_v29 }
 0x660   :  { %v2147_v5 = vadd.f32 %v2101_v6, %v4937_v26  ;;  %v2149_v2 = vadd.f32 %v2142_v47, %v4941_v14 }
 0x661   :  { %v2150_v28 = vmul.f32 0.5, %v2146_v13  ;;  %v2152_v12 = vmul.f32 0.5, %v2148_v59 }
 0x662   :  { %v2151_v11 = vmul.f32 0.5, %v2147_v5 }
 0x663   :  { %3946 = vtanh.f32 %v2150_v28 }
 0x664   :  { %3948 = vtanh.f32 %v2151_v11 }
 0x665   :  { %3950 = vtanh.f32 %v2149_v2 }
 0x666   :  { %3952 = vtanh.f32 %v2152_v12 }
 0x66d   :  { %v3947_v51 = vpop.eup %3946 }
 0x66e   :  { %v2156_v61 = vmul.f32 0.5, %v3947_v51  ;;  %v3949_v62 = vpop.eup %3948 }
 0x66f   :  { %v2157_v58 = vmul.f32 0.5, %v3949_v62  ;;  %v3951_v0 = vpop.eup %3950 }
 0x670   :  { %v2159_v30 = vadd.f32 0.5, %v2156_v61  ;;  %v3953_v13 = vpop.eup %3952 }
 0x671   :  { %v2160_v52 = vadd.f32 0.5, %v2157_v58  ;;  %v2158_v24 = vmul.f32 0.5, %v3953_v13 }
 0x672   :  { %v2164_v32 = vmul.f32 %v3951_v0, %v2159_v30 }
 0x673   :  { %v2163_v6 = vmul.f32 %v2160_v52, %v5329_v37  ;;  %v2161_v61 = vadd.f32 0.5, %v2158_v24  ;;  %v2171_v52 = vld [vmem:[#allocation2 + $0x4] ss:$8 sm:$0xf] }
 0x675   :  { %v5517_v5 = vadd.f32 %v2164_v32, %v2163_v6 }
 0x677   :  { %3954 = vtanh.f32 %v5517_v5 }
 0x67c   :  { %v2206_v33 = vpop.f32.mrb[48].mxu0  ;;  %v2247_v23 = vpop.f32.mrb[52].mxu1 }
 0x67d   :  { %v2208_v48 = vpop.f32.mrb[49].mxu0  ;;  %v2249_v47 = vpop.f32.mrb[53].mxu1 }
 0x67e   :  { %v2258_v49 = vcombine.low %v2206_v33, %v2208_v48  ;;  %v2259_v28 = vcombine.low %v2247_v23, %v2249_v47  ;;  %v2210_v11 = vpop.f32.mrb[50].mxu0  ;;  %v2251_v2 = vpop.f32.mrb[54].mxu1 }
 0x67f   :  { %v2211_v59 = vpop.f32.mrb[51].mxu0  ;;  %v2252_v12 = vpop.f32.mrb[55].mxu1 }
 0x680   :  { %v2266_v51 = vrot.slane %v2258_v49, %v4750_v4  ;;  %v2273_v37 = vrot.slane %v2259_v28, %v4750_v4 }
 0x681   :  { %v3955_v62 = vpop.eup %3954 }
 0x682   :  { %v2274_v30 = vcombine.low %v2266_v51, %v2273_v37  ;;  %v2167_v58 = vmul.f32 %v3955_v62, %v2161_v61  ;;  %v6689_v37 = vld [vmem:[#allocation53_spill] sm:$0xff]  ;;  %v6690_v61 = vld [vmem:[#allocation54_spill] sm:$0xff]  ;;  %v6691_v62 = vld [vmem:[#allocation55_spill] sm:$0xff] }
 0x684   :  { %v2281_v0 = vrot.slane %v2274_v30, %v4750_v4  ;;  %2169 = vst [vmem:[#allocation3 + $0x3] sm:$0x1] %v2167_v58  ;;  %v6692_v30 = vld [vmem:[#allocation56_spill] sm:$0xff] }
 0x686   :  { %v2283_v32 = vadd.f32 %v2281_v0, %v2171_v52  ;;  %v6693_v0 = vld [vmem:[#allocation57_spill] sm:$0xff]  ;;  %v6694_v52 = vld [vmem:[#allocation59_spill] sm:$0xff] }
 0x688   :  { %v2284_v6 = vmul.f32 0.5, %v2283_v32  ;;  %v2289_v13 = vrot.slane %v2283_v32, 3  ;;  %v6695_v32 = vld [vmem:[#allocation60_spill] sm:$0xff] }
 0x68a   :  { %3956 = vtanh.f32 %v2284_v6  ;;  %v6696_v6 = vld [vmem:[#allocation61_spill] sm:$0xff] }
 0x68b   :  { %3958 = vtanh.f32 %v2289_v13  ;;  %v6697_v13 = vld [vmem:[#allocation62_spill] sm:$0xff] }
 0x694   :  { %v3957_v33 = vpop.eup %3956 }
 0x695   :  { %v2286_v23 = vmul.f32 0.5, %v3957_v33  ;;  %v3959_v49 = vpop.eup %3958  ;;  %v6698_v33 = vld [vmem:[#allocation63_spill] sm:$0xff] }
 0x697   :  { %v2287_v48 = vadd.f32 0.5, %v2286_v23  ;;  %v2168_v23 = vpack.c.bf16 %v2167_v58, %v2167_v58  ;;  %v5578_v58 = vld [vmem:[#allocation9 + $0x2c] ss:$16 sps:$4 sm:$0xff]  }
 0x698   :  { %6700 = vst [vmem:[#allocation25_spill] sm:$0xff] %v5578_v58 }
 0x699   :  { %v2293_v47 = vrot.slane %v2287_v48, 1  ;;  %v2296_v24 = vmul.f32 %v3959_v49, %v2287_v48  ;;  %v2299_v2 = vrot.slane %v2287_v48, 2  ;;  %v5563_v48 = vld [vmem:[#allocation9 + $0x4] ss:$16 sps:$4 sm:$0xff]   ;;  %v5569_v49 = vld [vmem:[#allocation9] ss:$16 sps:$4 sm:$0xff]  }
 0x69b   :  { %v2295_v28 = vmul.f32 %v2293_v47, %v5339_v8  ;;  %v6688_v8 = vld [vmem:[#allocation52_spill] sm:$0xff]  ;;  %v5566_v47 = vld [vmem:[#allocation9 + $0xc] ss:$16 sps:$4 sm:$0xff]  }
 0x69d   :  { %v5524_v11 = vadd.f32 %v2296_v24, %v2295_v28  ;;  %v5572_v28 = vld [vmem:[#allocation9 + $0x8] ss:$16 sps:$4 sm:$0xff]   ;;  %v5575_v24 = vld [vmem:[#allocation9 + $0x24] ss:$16 sps:$4 sm:$0xff]  }
 0x69e   :  { %6699 = vst [vmem:[#allocation24_spill] sm:$0xff] %v5575_v24 }
 0x69f   :  { %3960 = vtanh.f32 %v5524_v11 }
 0x6a9   :  { %v3961_v59 = vpop.eup %3960 }
 0x6aa   :  { %v2301_v12 = vmul.f32 %v3961_v59, %v2299_v2  ;;  %v5583_v2 = vld [vmem:[#allocation9 + $0x20] ss:$16 sps:$4 sm:$0xff]   ;;  %v5586_v59 = vld [vmem:[#allocation9 + $0x28] ss:$16 sps:$4 sm:$0xff]  }
 0x6ab   :  { %6701 = vst [vmem:[#allocation26_spill] sm:$0xff] %v5583_v2  ;;  %6702 = vst [vmem:[#allocation27_spill] sm:$0xff] %v5586_v59 }
 0x6ac   :  { %v5527_v51 = vpack.c.bf16 %v2301_v12, %v2301_v12  ;;  %v5589_v12 = vld [vmem:[#allocation9 + $0x44] ss:$16 sps:$4 sm:$0xff]  }
 0x6ad   :  { %6703 = vst [vmem:[#allocation28_spill] sm:$0xff] %v5589_v12 }
 0x6ae   :  { %2336 = vmatmul.mubr.bf16.vlgmr.msra.gmra.mrb[52].mxu0 %v5527_v51  ;;  %2377 = vmatmul.mubr.bf16.vlgmr.msra.gmra.mrb[56].mxu1 %v5527_v51 }
 0x6af   :  { %2386 = vmatpush1.bf16.msra.mxu0 %v5346_v17  ;;  %2427 = vmatpush1.bf16.msra.mxu1 %v5349_v46 }
 0x6b0   :  { %2387 = vmatprep.subr.bf16.mxu0 %v5352_v39  ;;  %2428 = vmatprep.subr.bf16.mxu1 %v5355_v44 }
 0x6b1   :  { %2417 = vmatprep.mubr.bf16.mxu0 %v6491_v1  ;;  %2458 = vmatprep.mubr.bf16.mxu1 %v6491_v1 }
 0x6b3   :  { %2388 = vmatpush1.bf16.msra.mxu0 %v5360_v43  ;;  %2429 = vmatpush1.bf16.msra.mxu1 %v5363_v42 }
 0x6b4   :  { %2389 = vmatprep.subr.bf16.mxu0 %v5366_v41  ;;  %2430 = vmatprep.subr.bf16.mxu1 %v5369_v38 }
 0x6b7   :  { %2390 = vmatpush1.bf16.msra.mxu0 %v5372_v60  ;;  %2431 = vmatpush1.bf16.msra.mxu1 %v5375_v45 }
 0x6b8   :  { %2391 = vmatprep.subr.bf16.mxu0 %v5378_v40  ;;  %2432 = vmatprep.subr.bf16.mxu1 %v5381_v35 }
 0x6bb   :  { %2392 = vmatpush1.bf16.msra.mxu0 %v5384_v36  ;;  %2433 = vmatpush1.bf16.msra.mxu1 %v5387_v55 }
 0x6bc   :  { %2393 = vmatprep.subr.bf16.mxu0 %v6688_v8  ;;  %2434 = vmatprep.subr.bf16.mxu1 %v6689_v37 }
 0x6bf   :  { %2394 = vmatpush1.bf16.msra.mxu0 %v6690_v61  ;;  %2435 = vmatpush1.bf16.msra.mxu1 %v6691_v62 }
 0x6c0   :  { %2395 = vmatprep.subr.bf16.mxu0 %v6692_v30  ;;  %2436 = vmatprep.subr.bf16.mxu1 %v6693_v0 }
 0x6c3   :  { %2396 = vmatpush1.bf16.msra.mxu0 %v6694_v52  ;;  %2437 = vmatpush1.bf16.msra.mxu1 %v6695_v32 }
 0x6c4   :  { %2397 = vmatprep.subr.bf16.mxu0 %v6696_v6  ;;  %2438 = vmatprep.subr.bf16.mxu1 %v6697_v13 }
 0x6c7   :  { %2398 = vmatpush1.bf16.msra.mxu0 %v6698_v33  ;;  %2439 = vmatpush1.bf16.msra.mxu1 %v5423_v50 }
 0x6c8   :  { %2399 = vmatprep.subr.bf16.mxu0 %v5426_v54  ;;  %2440 = vmatprep.subr.bf16.mxu1 %v5429_v19 }
 0x6cb   :  { %2400 = vmatpush1.bf16.msra.mxu0 %v5432_v9  ;;  %2441 = vmatpush1.bf16.msra.mxu1 %v5435_v7 }
 0x6cc   :  { %2493 = vmatprep.subr.bf16.mxu0 %v5563_v48  ;;  %2534 = vmatprep.subr.bf16.mxu1 %v5566_v47 }
 0x6ce   :  { %2418 = vmatmul.mubr.bf16.vlgmr.msra.gmra.mrb[56].mxu0 %v2168_v23  ;;  %2459 = vmatmul.mubr.bf16.vlgmr.msra.gmra.mrb[60].mxu1 %v2168_v23  ;;  %v5592_v23 = vld [vmem:[#allocation9 + $0x4c] ss:$16 sps:$4 sm:$0xff]  }
 0x6cf   :  { %2494 = vmatpush1.bf16.msra.mxu0 %v5569_v49  ;;  %2535 = vmatpush1.bf16.msra.mxu1 %v5572_v28  ;;  %6704 = vst [vmem:[#allocation29_spill] sm:$0xff] %v5592_v23 }
 0x6d0   :  { %2495 = vmatprep.subr.bf16.mxu0 %v5575_v24  ;;  %2536 = vmatprep.subr.bf16.mxu1 %v5578_v58  ;;  %v5595_v58 = vld [vmem:[#allocation9 + $0x40] ss:$16 sps:$4 sm:$0xff]   ;;  %v5598_v24 = vld [vmem:[#allocation9 + $0x48] ss:$16 sps:$4 sm:$0xff]  }
 0x6d1   :  { %2525 = vmatprep.mubr.bf16.mxu0 %v6491_v1  ;;  %2566 = vmatprep.mubr.bf16.mxu1 %v6491_v1  ;;  %6705 = vst [vmem:[#allocation30_spill] sm:$0xff] %v5595_v58  ;;  %6706 = vst [vmem:[#allocation31_spill] sm:$0xff] %v5598_v24 }
 0x6d3   :  { %2496 = vmatpush1.bf16.msra.mxu0 %v5583_v2  ;;  %2537 = vmatpush1.bf16.msra.mxu1 %v5586_v59  ;;  %v5601_v2 = vld [vmem:[#allocation9 + $0x64] ss:$16 sps:$4 sm:$0xff]   ;;  %v5604_v59 = vld [vmem:[#allocation9 + $0x6c] ss:$16 sps:$4 sm:$0xff]  }
 0x6d4   :  { %2497 = vmatprep.subr.bf16.mxu0 %v5589_v12  ;;  %2538 = vmatprep.subr.bf16.mxu1 %v5592_v23  ;;  %6707 = vst [vmem:[#allocation32_spill] sm:$0xff] %v5601_v2  ;;  %6708 = vst [vmem:[#allocation52_spill] sm:$0xff] %v5604_v59  ;;  %v5607_v12 = vld [vmem:[#allocation9 + $0x60] ss:$16 sps:$4 sm:$0xff]   ;;  %v5610_v23 = vld [vmem:[#allocation9 + $0x68] ss:$16 sps:$4 sm:$0xff]  }
 0x6d5   :  { %6709 = vst [vmem:[#allocation53_spill] sm:$0xff] %v5607_v12  ;;  %6710 = vst [vmem:[#allocation54_spill] sm:$0xff] %v5610_v23 }
 0x6d7   :  { %2498 = vmatpush1.bf16.msra.mxu0 %v5595_v58  ;;  %2539 = vmatpush1.bf16.msra.mxu1 %v5598_v24  ;;  %v5613_v58 = vld [vmem:[#allocation9 + $0x84] ss:$16 sps:$4 sm:$0xff]   ;;  %v5616_v24 = vld [vmem:[#allocation9 + $0x8c] ss:$16 sps:$4 sm:$0xff]  }
 0x6d8   :  { %2499 = vmatprep.subr.bf16.mxu0 %v5601_v2  ;;  %2540 = vmatprep.subr.bf16.mxu1 %v5604_v59  ;;  %6711 = vst [vmem:[#allocation55_spill] sm:$0xff] %v5613_v58  ;;  %6712 = vst [vmem:[#allocation56_spill] sm:$0xff] %v5616_v24  ;;  %v5619_v2 = vld [vmem:[#allocation9 + $0x80] ss:$16 sps:$4 sm:$0xff]   ;;  %v5622_v59 = vld [vmem:[#allocation9 + $0x88] ss:$16 sps:$4 sm:$0xff]  }
 0x6d9   :  { %6713 = vst [vmem:[#allocation57_spill] sm:$0xff] %v5619_v2  ;;  %6714 = vst [vmem:[#allocation59_spill] sm:$0xff] %v5622_v59 }
 0x6db   :  { %2500 = vmatpush1.bf16.msra.mxu0 %v5607_v12  ;;  %2541 = vmatpush1.bf16.msra.mxu1 %v5610_v23  ;;  %v5625_v12 = vld [vmem:[#allocation9 + $0xa4] ss:$16 sps:$4 sm:$0xff]   ;;  %v5628_v23 = vld [vmem:[#allocation9 + $0xac] ss:$16 sps:$4 sm:$0xff]  }
 0x6dc   :  { %2501 = vmatprep.subr.bf16.mxu0 %v5613_v58  ;;  %2542 = vmatprep.subr.bf16.mxu1 %v5616_v24  ;;  %6715 = vst [vmem:[#allocation60_spill] sm:$0xff] %v5625_v12  ;;  %6716 = vst [vmem:[#allocation61_spill] sm:$0xff] %v5628_v23  ;;  %v5631_v58 = vld [vmem:[#allocation9 + $0xa0] ss:$16 sps:$4 sm:$0xff]   ;;  %v5634_v24 = vld [vmem:[#allocation9 + $0xa8] ss:$16 sps:$4 sm:$0xff]  }
 0x6dd   :  { %6717 = vst [vmem:[#allocation62_spill] sm:$0xff] %v5631_v58  ;;  %6718 = vst [vmem:[#allocation63_spill] sm:$0xff] %v5634_v24 }
 0x6df   :  { %2502 = vmatpush1.bf16.msra.mxu0 %v5619_v2  ;;  %2543 = vmatpush1.bf16.msra.mxu1 %v5622_v59  ;;  %v5637_v2 = vld [vmem:[#allocation9 + $0xc4] ss:$16 sps:$4 sm:$0xff]   ;;  %v5640_v59 = vld [vmem:[#allocation9 + $0xcc] ss:$16 sps:$4 sm:$0xff]  }
 0x6e0   :  { %2503 = vmatprep.subr.bf16.mxu0 %v5625_v12  ;;  %2544 = vmatprep.subr.bf16.mxu1 %v5628_v23  ;;  %6719 = vst [vmem:[#allocation64_spill] sm:$0xff] %v5637_v2  ;;  %6720 = vst [vmem:[#allocation65_spill] sm:$0xff] %v5640_v59  ;;  %v5643_v12 = vld [vmem:[#allocation9 + $0xc0] ss:$16 sps:$4 sm:$0xff]   ;;  %v5647_v23 = vld [vmem:[#allocation9 + $0xe4] ss:$16 sps:$4 sm:$0xff]  }
 0x6e1   :  { %6721 = vst [vmem:[#allocation66_spill] sm:$0xff] %v5643_v12  ;;  %6722 = vst [vmem:[#allocation67_spill] sm:$0xff] %v5647_v23 }
 0x6e3   :  { %2504 = vmatpush1.bf16.msra.mxu0 %v5631_v58  ;;  %2545 = vmatpush1.bf16.msra.mxu1 %v5634_v24 }
 0x6e4   :  { %2505 = vmatprep.subr.bf16.mxu0 %v5637_v2  ;;  %2546 = vmatprep.subr.bf16.mxu1 %v5640_v59 }
 0x6e7   :  { %2506 = vmatpush1.bf16.msra.mxu0 %v5643_v12  ;;  %2547 = vmatpush1.bf16.msra.mxu1 %v5205_v10  ;;  %v6723_v10 = vld [vmem:[#allocation33_spill] sm:$0xff] }
 0x6e8   :  { %2507 = vmatprep.subr.bf16.mxu0 %v5647_v23  ;;  %2548 = vmatprep.subr.bf16.mxu1 %v5209_v18  ;;  %v6724_v18 = vld [vmem:[#allocation34_spill] sm:$0xff] }
 0x6eb   :  { %2508 = vmatpush1.bf16.msra.mxu0 %v5212_v22  ;;  %2549 = vmatpush1.bf16.msra.mxu1 %v5215_v20  ;;  %v6725_v22 = vld [vmem:[#allocation35_spill] sm:$0xff]  ;;  %v6726_v20 = vld [vmem:[#allocation36_spill] sm:$0xff] }
 0x6ec   :  { %2624 = vmatprep.subr.bf16.mxu0 %v5218_v25  ;;  %2665 = vmatprep.subr.bf16.mxu1 %v5221_v34  ;;  %v6727_v25 = vld [vmem:[#allocation37_spill] sm:$0xff]  ;;  %v6728_v34 = vld [vmem:[#allocation38_spill] sm:$0xff] }
 0x6ee   :  { %2526 = vmatmul.mubr.bf16.vlgmr.msra.gmra.mrb[60].mxu0 %v5527_v51  ;;  %2567 = vmatmul.mubr.bf16.vlgmr.msra.gmra.mrb[64].mxu1 %v5527_v51  ;;  %v6738_v51 = vld [vmem:[#allocation44_spill] sm:$0xff] }
 0x6ef   :  { %2625 = vmatpush1.bf16.msra.mxu0 %v6656_v56  ;;  %2666 = vmatpush1.bf16.msra.mxu1 %v6657_v15  ;;  %v6729_v56 = vld [vmem:[#allocation39_spill] sm:$0xff]  ;;  %v6730_v15 = vld [vmem:[#allocation40_spill] sm:$0xff] }
 0x6f0   :  { %2626 = vmatprep.subr.bf16.mxu0 %v6658_v16  ;;  %2667 = vmatprep.subr.bf16.mxu1 %v6659_v31  ;;  %v6731_v16 = vld [vmem:[#allocation41_spill] sm:$0xff]  ;;  %v6732_v31 = vld [vmem:[#allocation42_spill] sm:$0xff] }
 0x6f1   :  { %2656 = vmatprep.mubr.bf16.mxu0 %v6491_v1  ;;  %2697 = vmatprep.mubr.bf16.mxu1 %v6491_v1 }
 0x6f3   :  { %2627 = vmatpush1.bf16.msra.mxu0 %v6660_v27  ;;  %2668 = vmatpush1.bf16.msra.mxu1 %v6661_v63  ;;  %v6733_v27 = vld [vmem:[#allocation58_spill] sm:$0xff]  ;;  %v6734_v63 = vld [vmem:[#allocation21_spill] sm:$0xff] }
 0x6f4   :  { %2628 = vmatprep.subr.bf16.mxu0 %v6662_v53  ;;  %2669 = vmatprep.subr.bf16.mxu1 %v6663_v3  ;;  %v6735_v53 = vld [vmem:[#allocation22_spill] sm:$0xff]  ;;  %v6736_v3 = vld [vmem:[#allocation23_spill] sm:$0xff] }
 0x6f7   :  { %2629 = vmatpush1.bf16.msra.mxu0 %v6664_v57  ;;  %2670 = vmatpush1.bf16.msra.mxu1 %v6723_v10  ;;  %v6737_v57 = vld [vmem:[#allocation43_spill] sm:$0xff]  ;;  %v6739_v10 = vld [vmem:[#allocation45_spill] sm:$0xff] }
 0x6f8   :  { %2630 = vmatprep.subr.bf16.mxu0 %v6724_v18  ;;  %2671 = vmatprep.subr.bf16.mxu1 %v6725_v22  ;;  %v6740_v18 = vld [vmem:[#allocation46_spill] sm:$0xff]  ;;  %v6741_v22 = vld [vmem:[#allocation47_spill] sm:$0xff] }
 0x6fb   :  { %2631 = vmatpush1.bf16.msra.mxu0 %v6726_v20  ;;  %2672 = vmatpush1.bf16.msra.mxu1 %v6727_v25  ;;  %v6742_v20 = vld [vmem:[#allocation48_spill] sm:$0xff]  ;;  %v6743_v25 = vld [vmem:[#allocation49_spill] sm:$0xff] }
 0x6fc   :  { %2632 = vmatprep.subr.bf16.mxu0 %v6728_v34  ;;  %2673 = vmatprep.subr.bf16.mxu1 %v6729_v56  ;;  %v6744_v34 = vld [vmem:[#allocation50_spill] sm:$0xff]  ;;  %v6745_v56 = vld [vmem:[#allocation51_spill] sm:$0xff] }
 0x6ff   :  { %2633 = vmatpush1.bf16.msra.mxu0 %v6730_v15  ;;  %2674 = vmatpush1.bf16.msra.mxu1 %v6731_v16 }
 0x700   :  { %2634 = vmatprep.subr.bf16.mxu0 %v6732_v31  ;;  %2675 = vmatprep.subr.bf16.mxu1 %v6733_v27 }
 0x703   :  { %2635 = vmatpush1.bf16.msra.mxu0 %v6734_v63  ;;  %2676 = vmatpush1.bf16.msra.mxu1 %v6735_v53 }
 0x704   :  { %2636 = vmatprep.subr.bf16.mxu0 %v6736_v3  ;;  %2677 = vmatprep.subr.bf16.mxu1 %v6737_v57 }
 0x707   :  { %2637 = vmatpush1.bf16.msra.mxu0 %v6738_v51  ;;  %2678 = vmatpush1.bf16.msra.mxu1 %v6739_v10 }
 0x708   :  { %2638 = vmatprep.subr.bf16.mxu0 %v6740_v18  ;;  %2679 = vmatprep.subr.bf16.mxu1 %v6741_v22 }
 0x70b   :  { %2639 = vmatpush1.bf16.msra.mxu0 %v6742_v20  ;;  %2680 = vmatpush1.bf16.msra.mxu1 %v6743_v25 }
 0x70c   :  { %2706 = vmatprep.subr.bf16.mxu0 %v6744_v34  ;;  %2747 = vmatprep.subr.bf16.mxu1 %v6745_v56 }
 0x781   :  { %v2337_v15 = vpop.f32.mrb[52].mxu0  ;;  %v2378_v16 = vpop.f32.mrb[56].mxu1 }
 0x782   :  { %v2339_v31 = vpop.f32.mrb[53].mxu0  ;;  %v2380_v27 = vpop.f32.mrb[57].mxu1 }
 0x783   :  { %v2341_v63 = vpop.f32.mrb[54].mxu0  ;;  %v2382_v53 = vpop.f32.mrb[58].mxu1 }
 0x784   :  { %v2342_v3 = vpop.f32.mrb[55].mxu0  ;;  %v2383_v57 = vpop.f32.mrb[59].mxu1 }
 0x7a1   :  { %v2419_v51 = vpop.f32.mrb[56].mxu0  ;;  %v2460_v10 = vpop.f32.mrb[60].mxu1 }
 0x7a2   :  { %v2420_v18 = vadd.f32 %v2419_v51, %v2337_v15  ;;  %v2461_v22 = vadd.f32 %v2460_v10, %v2378_v16  ;;  %v2421_v23 = vpop.f32.mrb[57].mxu0  ;;  %v2462_v20 = vpop.f32.mrb[61].mxu1 }
 0x7a3   :  { %v2422_v12 = vadd.f32 %v2421_v23, %v2339_v31  ;;  %v2463_v25 = vadd.f32 %v2462_v20, %v2380_v27  ;;  %v2423_v59 = vpop.f32.mrb[58].mxu0  ;;  %v2464_v34 = vpop.f32.mrb[62].mxu1 }
 0x7a4   :  { %v2467_v56 = vadd.f32 %v2420_v18, %v4933_v21  ;;  %v2424_v2 = vpop.f32.mrb[59].mxu0  ;;  %v2465_v24 = vpop.f32.mrb[63].mxu1  ;;  %v2469_v15 = vadd.f32 %v2461_v22, %v4948_v29 }
 0x7a5   :  { %v2468_v58 = vadd.f32 %v2422_v12, %v4937_v26  ;;  %v2470_v3 = vadd.f32 %v2463_v25, %v4941_v14 }
 0x7a6   :  { %v2471_v63 = vmul.f32 0.5, %v2467_v56  ;;  %v2473_v16 = vmul.f32 0.5, %v2469_v15 }
 0x7a7   :  { %v2472_v53 = vmul.f32 0.5, %v2468_v58 }
 0x7a8   :  { %3962 = vtanh.f32 %v2471_v63 }
 0x7a9   :  { %3964 = vtanh.f32 %v2472_v53 }
 0x7aa   :  { %3966 = vtanh.f32 %v2470_v3 }
 0x7ab   :  { %3968 = vtanh.f32 %v2473_v16 }
 0x7b2   :  { %v3963_v23 = vpop.eup %3962 }
 0x7b3   :  { %v2477_v31 = vmul.f32 0.5, %v3963_v23  ;;  %v3965_v59 = vpop.eup %3964 }
 0x7b4   :  { %v2478_v57 = vmul.f32 0.5, %v3965_v59  ;;  %v3967_v2 = vpop.eup %3966 }
 0x7b5   :  { %v2480_v27 = vadd.f32 0.5, %v2477_v31  ;;  %v3969_v10 = vpop.eup %3968 }
 0x7b6   :  { %v2481_v24 = vadd.f32 0.5, %v2478_v57  ;;  %v2479_v22 = vmul.f32 0.5, %v3969_v10 }
 0x7b7   :  { %v2485_v51 = vmul.f32 %v3967_v2, %v2480_v27 }
 0x7b8   :  { %v2484_v12 = vmul.f32 %v2481_v24, %v5517_v5  ;;  %v2482_v31 = vadd.f32 0.5, %v2479_v22  ;;  %v2492_v24 = vld [vmem:[#allocation2 + $0x5] ss:$8 sm:$0xf] }
 0x7ba   :  { %v5696_v58 = vadd.f32 %v2485_v51, %v2484_v12 }
 0x7bc   :  { %3970 = vtanh.f32 %v5696_v58 }
 0x7c1   :  { %v2527_v18 = vpop.f32.mrb[60].mxu0  ;;  %v2568_v20 = vpop.f32.mrb[64].mxu1 }
 0x7c2   :  { %v2529_v25 = vpop.f32.mrb[61].mxu0  ;;  %v2570_v34 = vpop.f32.mrb[65].mxu1 }
 0x7c3   :  { %v2579_v56 = vcombine.low %v2527_v18, %v2529_v25  ;;  %v2580_v63 = vcombine.low %v2568_v20, %v2570_v34  ;;  %v2531_v53 = vpop.f32.mrb[62].mxu0  ;;  %v2572_v3 = vpop.f32.mrb[66].mxu1 }
 0x7c4   :  { %v2532_v15 = vpop.f32.mrb[63].mxu0  ;;  %v2573_v16 = vpop.f32.mrb[67].mxu1 }
 0x7c5   :  { %v2587_v23 = vrot.slane %v2579_v56, %v4750_v4  ;;  %v2594_v5 = vrot.slane %v2580_v63, %v4750_v4 }
 0x7c6   :  { %v3971_v59 = vpop.eup %3970 }
 0x7c7   :  { %v2595_v27 = vcombine.low %v2587_v23, %v2594_v5  ;;  %v2488_v57 = vmul.f32 %v3971_v59, %v2482_v31  ;;  %v5792_v5 = vld [vmem:[#allocation10] ss:$16 sps:$4 sm:$0xff]   ;;  %v5795_v31 = vld [vmem:[#allocation10 + $0x8] ss:$16 sps:$4 sm:$0xff]   ;;  %v5798_v59 = vld [vmem:[#allocation10 + $0x24] ss:$16 sps:$4 sm:$0xff]  }
 0x7c8   :  { %6770 = vst [vmem:[#allocation33_spill] sm:$0xff] %v5792_v5  ;;  %6771 = vst [vmem:[#allocation34_spill] sm:$0xff] %v5795_v31 }
 0x7c9   :  { %v2602_v2 = vrot.slane %v2595_v27, %v4750_v4  ;;  %2490 = vst [vmem:[#allocation3 + $0x4] sm:$0x1] %v2488_v57  ;;  %6772 = vst [vmem:[#allocation35_spill] sm:$0xff] %v5798_v59  ;;  %v5801_v27 = vld [vmem:[#allocation10 + $0x2c] ss:$16 sps:$4 sm:$0xff]  }
 0x7ca   :  { %6773 = vst [vmem:[#allocation36_spill] sm:$0xff] %v5801_v27 }
 0x7cb   :  { %v2604_v51 = vadd.f32 %v2602_v2, %v2492_v24  ;;  %v5809_v2 = vld [vmem:[#allocation10 + $0x28] ss:$16 sps:$4 sm:$0xff]   ;;  %v5812_v24 = vld [vmem:[#allocation10 + $0x44] ss:$16 sps:$4 sm:$0xff]  }
 0x7cc   :  { %6775 = vst [vmem:[#allocation38_spill] sm:$0xff] %v5809_v2  ;;  %6776 = vst [vmem:[#allocation39_spill] sm:$0xff] %v5812_v24 }
 0x7cd   :  { %v2605_v12 = vmul.f32 0.5, %v2604_v51  ;;  %v2610_v10 = vrot.slane %v2604_v51, 3  ;;  %v5815_v51 = vld [vmem:[#allocation10 + $0x4c] ss:$16 sps:$4 sm:$0xff]  }
 0x7ce   :  { %6777 = vst [vmem:[#allocation40_spill] sm:$0xff] %v5815_v51 }
 0x7cf   :  { %3972 = vtanh.f32 %v2605_v12  ;;  %v5818_v12 = vld [vmem:[#allocation10 + $0x40] ss:$16 sps:$4 sm:$0xff]  }
 0x7d0   :  { %3974 = vtanh.f32 %v2610_v10  ;;  %6778 = vst [vmem:[#allocation41_spill] sm:$0xff] %v5818_v12  ;;  %v5821_v10 = vld [vmem:[#allocation10 + $0x48] ss:$16 sps:$4 sm:$0xff]  }
 0x7d1   :  { %6779 = vst [vmem:[#allocation42_spill] sm:$0xff] %v5821_v10 }
 0x7d9   :  { %v3973_v18 = vpop.eup %3972 }
 0x7da   :  { %v2607_v20 = vmul.f32 0.5, %v3973_v18  ;;  %v3975_v56 = vpop.eup %3974  ;;  %v5824_v18 = vld [vmem:[#allocation10 + $0x64] ss:$16 sps:$4 sm:$0xff]  }
 0x7db   :  { %6780 = vst [vmem:[#allocation58_spill] sm:$0xff] %v5824_v18 }
 0x7dc   :  { %v2608_v25 = vadd.f32 0.5, %v2607_v20  ;;  %v5827_v20 = vld [vmem:[#allocation10 + $0x6c] ss:$16 sps:$4 sm:$0xff]  }
 0x7dd   :  { %6781 = vst [vmem:[#allocation21_spill] sm:$0xff] %v5827_v20 }
 0x7de   :  { %v2614_v34 = vrot.slane %v2608_v25, 1  ;;  %v2617_v22 = vmul.f32 %v3975_v56, %v2608_v25  ;;  %v2620_v3 = vrot.slane %v2608_v25, 2  ;;  %v5830_v25 = vld [vmem:[#allocation10 + $0x60] ss:$16 sps:$4 sm:$0xff]   ;;  %v5836_v56 = vld [vmem:[#allocation10 + $0x84] ss:$16 sps:$4 sm:$0xff]  }
 0x7df   :  { %6782 = vst [vmem:[#allocation22_spill] sm:$0xff] %v5830_v25  ;;  %6784 = vst [vmem:[#allocation43_spill] sm:$0xff] %v5836_v56 }
 0x7e0   :  { %v2616_v63 = vmul.f32 %v2614_v34, %v5524_v11  ;;  %v6764_v11 = vld [vmem:[#allocation62_spill] sm:$0xff]  ;;  %v5833_v34 = vld [vmem:[#allocation10 + $0x68] ss:$16 sps:$4 sm:$0xff]  }
 0x7e1   :  { %6783 = vst [vmem:[#allocation23_spill] sm:$0xff] %v5833_v34 }
 0x7e2   :  { %v5703_v53 = vadd.f32 %v2617_v22, %v2616_v63  ;;  %v5839_v63 = vld [vmem:[#allocation10 + $0x8c] ss:$16 sps:$4 sm:$0xff]   ;;  %v5842_v22 = vld [vmem:[#allocation10 + $0x80] ss:$16 sps:$4 sm:$0xff]  }
 0x7e3   :  { %6785 = vst [vmem:[#allocation44_spill] sm:$0xff] %v5839_v63  ;;  %6786 = vst [vmem:[#allocation45_spill] sm:$0xff] %v5842_v22 }
 0x7e4   :  { %3976 = vtanh.f32 %v5703_v53 }
 0x7ee   :  { %v3977_v15 = vpop.eup %3976 }
 0x7ef   :  { %v2622_v16 = vmul.f32 %v3977_v15, %v2620_v3  ;;  %v5845_v3 = vld [vmem:[#allocation10 + $0x88] ss:$16 sps:$4 sm:$0xff]   ;;  %v5848_v15 = vld [vmem:[#allocation10 + $0xa4] ss:$16 sps:$4 sm:$0xff]  }
 0x7f0   :  { %6787 = vst [vmem:[#allocation46_spill] sm:$0xff] %v5845_v3  ;;  %6788 = vst [vmem:[#allocation47_spill] sm:$0xff] %v5848_v15 }
 0x7f1   :  { %v5706_v23 = vpack.c.bf16 %v2622_v16, %v2622_v16  ;;  %v5851_v16 = vld [vmem:[#allocation10 + $0xac] ss:$16 sps:$4 sm:$0xff]  }
 0x7f2   :  { %6789 = vst [vmem:[#allocation48_spill] sm:$0xff] %v5851_v16 }
 0x7f3   :  { %2657 = vmatmul.mubr.bf16.vlgmr.msra.gmra.mrb[64].mxu0 %v5706_v23  ;;  %2698 = vmatmul.mubr.bf16.vlgmr.msra.gmra.mrb[68].mxu1 %v5706_v23 }
 0x7f4   :  { %2707 = vmatpush1.bf16.msra.mxu0 %v5346_v17  ;;  %2748 = vmatpush1.bf16.msra.mxu1 %v5349_v46  ;;  %v2489_v17 = vpack.c.bf16 %v2488_v57, %v2488_v57  ;;  %v6746_v46 = vld [vmem:[#allocation24_spill] sm:$0xff] }
 0x7f5   :  { %2708 = vmatprep.subr.bf16.mxu0 %v5352_v39  ;;  %2749 = vmatprep.subr.bf16.mxu1 %v5355_v44  ;;  %v6747_v39 = vld [vmem:[#allocation25_spill] sm:$0xff]  ;;  %v6748_v44 = vld [vmem:[#allocation26_spill] sm:$0xff] }
 0x7f6   :  { %2738 = vmatprep.mubr.bf16.mxu0 %v6491_v1  ;;  %2779 = vmatprep.mubr.bf16.mxu1 %v6491_v1  ;;  %v5806_v57 = vld [vmem:[#allocation10 + $0x20] ss:$16 sps:$4 sm:$0xff]  }
 0x7f7   :  { %6774 = vst [vmem:[#allocation37_spill] sm:$0xff] %v5806_v57 }
 0x7f8   :  { %2709 = vmatpush1.bf16.msra.mxu0 %v5360_v43  ;;  %2750 = vmatpush1.bf16.msra.mxu1 %v5363_v42  ;;  %v6749_v43 = vld [vmem:[#allocation27_spill] sm:$0xff]  ;;  %v6750_v42 = vld [vmem:[#allocation28_spill] sm:$0xff] }
 0x7f9   :  { %2710 = vmatprep.subr.bf16.mxu0 %v5366_v41  ;;  %2751 = vmatprep.subr.bf16.mxu1 %v5369_v38  ;;  %v6751_v41 = vld [vmem:[#allocation29_spill] sm:$0xff]  ;;  %v6752_v38 = vld [vmem:[#allocation30_spill] sm:$0xff] }
 0x7fc   :  { %2711 = vmatpush1.bf16.msra.mxu0 %v5372_v60  ;;  %2752 = vmatpush1.bf16.msra.mxu1 %v5375_v45  ;;  %v6753_v60 = vld [vmem:[#allocation31_spill] sm:$0xff]  ;;  %v6754_v45 = vld [vmem:[#allocation32_spill] sm:$0xff] }
 0x7fd   :  { %2712 = vmatprep.subr.bf16.mxu0 %v5378_v40  ;;  %2753 = vmatprep.subr.bf16.mxu1 %v5381_v35  ;;  %v6755_v40 = vld [vmem:[#allocation52_spill] sm:$0xff]  ;;  %v6756_v35 = vld [vmem:[#allocation53_spill] sm:$0xff] }
 0x800   :  { %2713 = vmatpush1.bf16.msra.mxu0 %v5384_v36  ;;  %2754 = vmatpush1.bf16.msra.mxu1 %v5387_v55  ;;  %v6757_v36 = vld [vmem:[#allocation54_spill] sm:$0xff]  ;;  %v6758_v55 = vld [vmem:[#allocation55_spill] sm:$0xff] }
 0x801   :  { %2714 = vmatprep.subr.bf16.mxu0 %v6688_v8  ;;  %2755 = vmatprep.subr.bf16.mxu1 %v6689_v37  ;;  %v6765_v8 = vld [vmem:[#allocation63_spill] sm:$0xff]  ;;  %v6766_v37 = vld [vmem:[#allocation64_spill] sm:$0xff] }
 0x804   :  { %2715 = vmatpush1.bf16.msra.mxu0 %v6690_v61  ;;  %2756 = vmatpush1.bf16.msra.mxu1 %v6691_v62  ;;  %v6767_v61 = vld [vmem:[#allocation65_spill] sm:$0xff]  ;;  %v6768_v62 = vld [vmem:[#allocation66_spill] sm:$0xff] }
 0x805   :  { %2716 = vmatprep.subr.bf16.mxu0 %v6692_v30  ;;  %2757 = vmatprep.subr.bf16.mxu1 %v6693_v0  ;;  %v5771_v30 = vld [vmem:[#allocation9 + $0xc8] ss:$16 sps:$4 sm:$0xff]  }
 0x806   :  { %v6769_v0 = vld [vmem:[#allocation67_spill] sm:$0xff] }
 0x808   :  { %2717 = vmatpush1.bf16.msra.mxu0 %v6694_v52  ;;  %2758 = vmatpush1.bf16.msra.mxu1 %v6695_v32  ;;  %v5775_v52 = vld [vmem:[#allocation9 + $0xec] ss:$16 sps:$4 sm:$0xff]   ;;  %v5778_v32 = vld [vmem:[#allocation9 + $0xe0] ss:$16 sps:$4 sm:$0xff]  }
 0x809   :  { %2718 = vmatprep.subr.bf16.mxu0 %v6696_v6  ;;  %2759 = vmatprep.subr.bf16.mxu1 %v6697_v13  ;;  %v5781_v6 = vld [vmem:[#allocation9 + $0xe8] ss:$16 sps:$4 sm:$0xff]   ;;  %v5784_v13 = vld [vmem:[#allocation10 + $0x4] ss:$16 sps:$4 sm:$0xff]  }
 0x80c   :  { %2719 = vmatpush1.bf16.msra.mxu0 %v6698_v33  ;;  %2760 = vmatpush1.bf16.msra.mxu1 %v5423_v50  ;;  %v6763_v50 = vld [vmem:[#allocation61_spill] sm:$0xff] }
 0x80d   :  { %2720 = vmatprep.subr.bf16.mxu0 %v5426_v54  ;;  %2761 = vmatprep.subr.bf16.mxu1 %v5429_v19  ;;  %v6759_v54 = vld [vmem:[#allocation56_spill] sm:$0xff]  ;;  %v6760_v19 = vld [vmem:[#allocation57_spill] sm:$0xff] }
 0x80e   :  { %v5787_v33 = vld [vmem:[#allocation10 + $0xc] ss:$16 sps:$4 sm:$0xff]  }
 0x810   :  { %2721 = vmatpush1.bf16.msra.mxu0 %v5432_v9  ;;  %2762 = vmatpush1.bf16.msra.mxu1 %v5435_v7  ;;  %v6761_v9 = vld [vmem:[#allocation59_spill] sm:$0xff]  ;;  %v6762_v7 = vld [vmem:[#allocation60_spill] sm:$0xff] }
 0x811   :  { %2814 = vmatprep.subr.bf16.mxu0 %v5563_v48  ;;  %2855 = vmatprep.subr.bf16.mxu1 %v5566_v47 }
 0x813   :  { %2739 = vmatmul.mubr.bf16.vlgmr.msra.gmra.mrb[68].mxu0 %v2489_v17  ;;  %2780 = vmatmul.mubr.bf16.vlgmr.msra.gmra.mrb[72].mxu1 %v2489_v17  ;;  %v5857_v17 = vld [vmem:[#allocation10 + $0xa8] ss:$16 sps:$4 sm:$0xff]  }
 0x814   :  { %2815 = vmatpush1.bf16.msra.mxu0 %v5569_v49  ;;  %2856 = vmatpush1.bf16.msra.mxu1 %v5572_v28  ;;  %6791 = vst [vmem:[#allocation50_spill] sm:$0xff] %v5857_v17 }
 0x815   :  { %2816 = vmatprep.subr.bf16.mxu0 %v6746_v46  ;;  %2857 = vmatprep.subr.bf16.mxu1 %v6747_v39 }
 0x816   :  { %2846 = vmatprep.mubr.bf16.mxu0 %v6491_v1  ;;  %2887 = vmatprep.mubr.bf16.mxu1 %v6491_v1 }
 0x818   :  { %2817 = vmatpush1.bf16.msra.mxu0 %v6748_v44  ;;  %2858 = vmatpush1.bf16.msra.mxu1 %v6749_v43 }
 0x819   :  { %2818 = vmatprep.subr.bf16.mxu0 %v6750_v42  ;;  %2859 = vmatprep.subr.bf16.mxu1 %v6751_v41 }
 0x81c   :  { %2819 = vmatpush1.bf16.msra.mxu0 %v6752_v38  ;;  %2860 = vmatpush1.bf16.msra.mxu1 %v6753_v60 }
 0x81d   :  { %2820 = vmatprep.subr.bf16.mxu0 %v6754_v45  ;;  %2861 = vmatprep.subr.bf16.mxu1 %v6755_v40 }
 0x820   :  { %2821 = vmatpush1.bf16.msra.mxu0 %v6756_v35  ;;  %2862 = vmatpush1.bf16.msra.mxu1 %v6757_v36 }
 0x821   :  { %2822 = vmatprep.subr.bf16.mxu0 %v6758_v55  ;;  %2863 = vmatprep.subr.bf16.mxu1 %v6759_v54 }
 0x824   :  { %2823 = vmatpush1.bf16.msra.mxu0 %v6760_v19  ;;  %2864 = vmatpush1.bf16.msra.mxu1 %v6761_v9 }
 0x825   :  { %2824 = vmatprep.subr.bf16.mxu0 %v6762_v7  ;;  %2865 = vmatprep.subr.bf16.mxu1 %v6763_v50 }
 0x828   :  { %2825 = vmatpush1.bf16.msra.mxu0 %v6764_v11  ;;  %2866 = vmatpush1.bf16.msra.mxu1 %v6765_v8 }
 0x829   :  { %2826 = vmatprep.subr.bf16.mxu0 %v6766_v37  ;;  %2867 = vmatprep.subr.bf16.mxu1 %v6767_v61 }
 0x82c   :  { %2827 = vmatpush1.bf16.msra.mxu0 %v6768_v62  ;;  %2868 = vmatpush1.bf16.msra.mxu1 %v5771_v30 }
 0x82d   :  { %2828 = vmatprep.subr.bf16.mxu0 %v6769_v0  ;;  %2869 = vmatprep.subr.bf16.mxu1 %v5775_v52 }
 0x830   :  { %2829 = vmatpush1.bf16.msra.mxu0 %v5778_v32  ;;  %2870 = vmatpush1.bf16.msra.mxu1 %v5781_v6 }
 0x831   :  { %2945 = vmatprep.subr.bf16.mxu0 %v5784_v13  ;;  %2986 = vmatprep.subr.bf16.mxu1 %v5787_v33 }
 0x833   :  { %2847 = vmatmul.mubr.bf16.vlgmr.msra.gmra.mrb[72].mxu0 %v5706_v23  ;;  %2888 = vmatmul.mubr.bf16.vlgmr.msra.gmra.mrb[76].mxu1 %v5706_v23  ;;  %v5854_v23 = vld [vmem:[#allocation10 + $0xa0] ss:$16 sps:$4 sm:$0xff]  }
 0x834   :  { %2946 = vmatpush1.bf16.msra.mxu0 %v5792_v5  ;;  %2987 = vmatpush1.bf16.msra.mxu1 %v5795_v31  ;;  %6790 = vst [vmem:[#allocation49_spill] sm:$0xff] %v5854_v23 }
 0x835   :  { %2947 = vmatprep.subr.bf16.mxu0 %v5798_v59  ;;  %2988 = vmatprep.subr.bf16.mxu1 %v5801_v27 }
 0x836   :  { %2977 = vmatprep.mubr.bf16.mxu0 %v6491_v1  ;;  %3018 = vmatprep.mubr.bf16.mxu1 %v6491_v1 }
 0x838   :  { %2948 = vmatpush1.bf16.msra.mxu0 %v5806_v57  ;;  %2989 = vmatpush1.bf16.msra.mxu1 %v5809_v2 }
 0x839   :  { %2949 = vmatprep.subr.bf16.mxu0 %v5812_v24  ;;  %2990 = vmatprep.subr.bf16.mxu1 %v5815_v51 }
 0x83c   :  { %2950 = vmatpush1.bf16.msra.mxu0 %v5818_v12  ;;  %2991 = vmatpush1.bf16.msra.mxu1 %v5821_v10 }
 0x83d   :  { %2951 = vmatprep.subr.bf16.mxu0 %v5824_v18  ;;  %2992 = vmatprep.subr.bf16.mxu1 %v5827_v20 }
 0x840   :  { %2952 = vmatpush1.bf16.msra.mxu0 %v5830_v25  ;;  %2993 = vmatpush1.bf16.msra.mxu1 %v5833_v34 }
 0x841   :  { %2953 = vmatprep.subr.bf16.mxu0 %v5836_v56  ;;  %2994 = vmatprep.subr.bf16.mxu1 %v5839_v63 }
 0x844   :  { %2954 = vmatpush1.bf16.msra.mxu0 %v5842_v22  ;;  %2995 = vmatpush1.bf16.msra.mxu1 %v5845_v3  ;;  %v5860_v22 = vld [vmem:[#allocation10 + $0xc4] ss:$16 sps:$4 sm:$0xff]   ;;  %v5863_v3 = vld [vmem:[#allocation10 + $0xcc] ss:$16 sps:$4 sm:$0xff]  }
 0x845   :  { %2955 = vmatprep.subr.bf16.mxu0 %v5848_v15  ;;  %2996 = vmatprep.subr.bf16.mxu1 %v5851_v16  ;;  %6792 = vst [vmem:[#allocation51_spill] sm:$0xff] %v5860_v22  ;;  %6793 = vst [vmem:[#allocation24_spill] sm:$0xff] %v5863_v3  ;;  %v5866_v15 = vld [vmem:[#allocation10 + $0xc0] ss:$16 sps:$4 sm:$0xff]   ;;  %v5869_v16 = vld [vmem:[#allocation10 + $0xc8] ss:$16 sps:$4 sm:$0xff]  }
 0x846   :  { %6794 = vst [vmem:[#allocation25_spill] sm:$0xff] %v5866_v15  ;;  %6795 = vst [vmem:[#allocation26_spill] sm:$0xff] %v5869_v16 }
 0x848   :  { %2956 = vmatpush1.bf16.msra.mxu0 %v5854_v23  ;;  %2997 = vmatpush1.bf16.msra.mxu1 %v5857_v17  ;;  %v5872_v23 = vld [vmem:[#allocation10 + $0xe4] ss:$16 sps:$4 sm:$0xff]   ;;  %v5875_v17 = vld [vmem:[#allocation10 + $0xec] ss:$16 sps:$4 sm:$0xff]  }
 0x849   :  { %2957 = vmatprep.subr.bf16.mxu0 %v5860_v22  ;;  %2998 = vmatprep.subr.bf16.mxu1 %v5863_v3  ;;  %6796 = vst [vmem:[#allocation27_spill] sm:$0xff] %v5872_v23  ;;  %6797 = vst [vmem:[#allocation28_spill] sm:$0xff] %v5875_v17  ;;  %v5878_v22 = vld [vmem:[#allocation10 + $0xe0] ss:$16 sps:$4 sm:$0xff]   ;;  %v5881_v3 = vld [vmem:[#allocation10 + $0xe8] ss:$16 sps:$4 sm:$0xff]  }
 0x84a   :  { %6798 = vst [vmem:[#allocation29_spill] sm:$0xff] %v5878_v22  ;;  %6799 = vst [vmem:[#allocation30_spill] sm:$0xff] %v5881_v3 }
 0x84c   :  { %2958 = vmatpush1.bf16.msra.mxu0 %v5866_v15  ;;  %2999 = vmatpush1.bf16.msra.mxu1 %v5869_v16  ;;  %v5884_v15 = vld [vmem:[#allocation12 + $0x4] ss:$16 sps:$4 sm:$0xff]   ;;  %v5887_v16 = vld [vmem:[#allocation12 + $0xc] ss:$16 sps:$4 sm:$0xff]  }
 0x84d   :  { %2959 = vmatprep.subr.bf16.mxu0 %v5872_v23  ;;  %3000 = vmatprep.subr.bf16.mxu1 %v5875_v17  ;;  %6800 = vst [vmem:[#allocation31_spill] sm:$0xff] %v5884_v15  ;;  %6801 = vst [vmem:[#allocation32_spill] sm:$0xff] %v5887_v16 }
 0x850   :  { %2960 = vmatpush1.bf16.msra.mxu0 %v5878_v22  ;;  %3001 = vmatpush1.bf16.msra.mxu1 %v5881_v3 }
 0x851   :  { %3027 = vmatprep.subr.bf16.mxu0 %v5884_v15  ;;  %3068 = vmatprep.subr.bf16.mxu1 %v5887_v16 }
 0x8c6   :  { %v2658_v23 = vpop.f32.mrb[64].mxu0  ;;  %v2699_v63 = vpop.f32.mrb[68].mxu1 }
 0x8c7   :  { %v2660_v56 = vpop.f32.mrb[65].mxu0  ;;  %v2701_v17 = vpop.f32.mrb[69].mxu1 }
 0x8c8   :  { %v2662_v34 = vpop.f32.mrb[66].mxu0  ;;  %v2703_v25 = vpop.f32.mrb[70].mxu1 }
 0x8c9   :  { %v2663_v20 = vpop.f32.mrb[67].mxu0  ;;  %v2704_v22 = vpop.f32.mrb[71].mxu1 }
 0x8e6   :  { %v2740_v18 = vpop.f32.mrb[68].mxu0  ;;  %v2781_v10 = vpop.f32.mrb[72].mxu1 }
 0x8e7   :  { %v2741_v12 = vadd.f32 %v2740_v18, %v2658_v23  ;;  %v2782_v3 = vadd.f32 %v2781_v10, %v2699_v63  ;;  %v2742_v51 = vpop.f32.mrb[69].mxu0  ;;  %v2783_v24 = vpop.f32.mrb[73].mxu1 }
 0x8e8   :  { %v2743_v2 = vadd.f32 %v2742_v51, %v2660_v56  ;;  %v2784_v15 = vadd.f32 %v2783_v24, %v2701_v17  ;;  %v2744_v57 = vpop.f32.mrb[70].mxu0  ;;  %v2785_v27 = vpop.f32.mrb[74].mxu1 }
 0x8e9   :  { %v2788_v16 = vadd.f32 %v2741_v12, %v4933_v21  ;;  %v2745_v59 = vpop.f32.mrb[71].mxu0  ;;  %v2786_v31 = vpop.f32.mrb[75].mxu1  ;;  %v2790_v10 = vadd.f32 %v2782_v3, %v4948_v29 }
 0x8ea   :  { %v2789_v5 = vadd.f32 %v2743_v2, %v4937_v26  ;;  %v2791_v20 = vadd.f32 %v2784_v15, %v4941_v14 }
 0x8eb   :  { %v2792_v34 = vmul.f32 0.5, %v2788_v16  ;;  %v2794_v18 = vmul.f32 0.5, %v2790_v10 }
 0x8ec   :  { %v2793_v25 = vmul.f32 0.5, %v2789_v5 }
 0x8ed   :  { %3978 = vtanh.f32 %v2792_v34 }
 0x8ee   :  { %3980 = vtanh.f32 %v2793_v25 }
 0x8ef   :  { %3982 = vtanh.f32 %v2791_v20 }
 0x8f0   :  { %3984 = vtanh.f32 %v2794_v18 }
 0x8f7   :  { %v3979_v51 = vpop.eup %3978 }
 0x8f8   :  { %v2798_v24 = vmul.f32 0.5, %v3979_v51  ;;  %v3981_v57 = vpop.eup %3980 }
 0x8f9   :  { %v2799_v12 = vmul.f32 0.5, %v3981_v57  ;;  %v3983_v59 = vpop.eup %3982 }
 0x8fa   :  { %v2801_v27 = vadd.f32 0.5, %v2798_v24  ;;  %v3985_v63 = vpop.eup %3984 }
 0x8fb   :  { %v2802_v31 = vadd.f32 0.5, %v2799_v12  ;;  %v2800_v3 = vmul.f32 0.5, %v3985_v63 }
 0x8fc   :  { %v2806_v56 = vmul.f32 %v3983_v59, %v2801_v27 }
 0x8fd   :  { %v2805_v2 = vmul.f32 %v2802_v31, %v5696_v58  ;;  %v2803_v24 = vadd.f32 0.5, %v2800_v3  ;;  %v2813_v31 = vld [vmem:[#allocation2 + $0x6] ss:$8 sm:$0xf] }
 0x8ff   :  { %v5895_v5 = vadd.f32 %v2806_v56, %v2805_v2 }
 0x901   :  { %3986 = vtanh.f32 %v5895_v5 }
 0x906   :  { %v2848_v22 = vpop.f32.mrb[72].mxu0  ;;  %v2889_v15 = vpop.f32.mrb[76].mxu1 }
 0x907   :  { %v2850_v16 = vpop.f32.mrb[73].mxu0  ;;  %v2891_v23 = vpop.f32.mrb[77].mxu1 }
 0x908   :  { %v2900_v17 = vcombine.low %v2848_v22, %v2850_v16  ;;  %v2901_v34 = vcombine.low %v2889_v15, %v2891_v23  ;;  %v2852_v25 = vpop.f32.mrb[74].mxu0  ;;  %v2893_v20 = vpop.f32.mrb[78].mxu1 }
 0x909   :  { %v2853_v10 = vpop.f32.mrb[75].mxu0  ;;  %v2894_v18 = vpop.f32.mrb[79].mxu1 }
 0x90a   :  { %v2908_v51 = vrot.slane %v2900_v17, %v4750_v4  ;;  %v2915_v58 = vrot.slane %v2901_v34, %v4750_v4 }
 0x90b   :  { %v3987_v57 = vpop.eup %3986 }
 0x90c   :  { %v2916_v27 = vcombine.low %v2908_v51, %v2915_v58  ;;  %v5900_v12 = vmul.f32 %v3987_v57, %v2803_v24  ;;  %v5912_v58 = vld [vmem:[#allocation12] ss:$16 sps:$4 sm:$0xff]   ;;  %v5915_v24 = vld [vmem:[#allocation12 + $0x8] ss:$16 sps:$4 sm:$0xff]   ;;  %v5921_v57 = vld [vmem:[#allocation12 + $0x2c] ss:$16 sps:$4 sm:$0xff]  }
 0x90e   :  { %v2923_v59 = vrot.slane %v2916_v27, %v4750_v4  ;;  %2811 = vst [vmem:[#allocation3 + $0x5] sm:$0x1] %v5900_v12  ;;  %v5926_v27 = vld [vmem:[#allocation12 + $0x20] ss:$16 sps:$4 sm:$0xff]  }
 0x910   :  { %v2925_v56 = vadd.f32 %v2923_v59, %v2813_v31  ;;  %v5929_v59 = vld [vmem:[#allocation12 + $0x28] ss:$16 sps:$4 sm:$0xff]   ;;  %v5932_v31 = vld [vmem:[#allocation12 + $0x44] ss:$16 sps:$4 sm:$0xff]  }
 0x912   :  { %v2926_v2 = vmul.f32 0.5, %v2925_v56  ;;  %v2931_v63 = vrot.slane %v2925_v56, 3  ;;  %v5935_v56 = vld [vmem:[#allocation12 + $0x4c] ss:$16 sps:$4 sm:$0xff]  }
 0x914   :  { %3988 = vtanh.f32 %v2926_v2  ;;  %v5938_v2 = vld [vmem:[#allocation12 + $0x40] ss:$16 sps:$4 sm:$0xff]  }
 0x915   :  { %3990 = vtanh.f32 %v2931_v63  ;;  %v5941_v63 = vld [vmem:[#allocation12 + $0x48] ss:$16 sps:$4 sm:$0xff]  }
 0x91e   :  { %v3989_v22 = vpop.eup %3988 }
 0x91f   :  { %v2928_v15 = vmul.f32 0.5, %v3989_v22  ;;  %v3991_v17 = vpop.eup %3990  ;;  %v5944_v22 = vld [vmem:[#allocation12 + $0x64] ss:$16 sps:$4 sm:$0xff]  }
 0x921   :  { %v2929_v16 = vadd.f32 0.5, %v2928_v15  ;;  %v5947_v15 = vld [vmem:[#allocation12 + $0x6c] ss:$16 sps:$4 sm:$0xff]  }
 0x923   :  { %v2935_v23 = vrot.slane %v2929_v16, 1  ;;  %v2938_v34 = vmul.f32 %v3991_v17, %v2929_v16  ;;  %v2941_v20 = vrot.slane %v2929_v16, 2  ;;  %v5950_v16 = vld [vmem:[#allocation12 + $0x60] ss:$16 sps:$4 sm:$0xff]   ;;  %v5956_v17 = vld [vmem:[#allocation12 + $0x84] ss:$16 sps:$4 sm:$0xff]  }
 0x924   :  { %6802 = vst [vmem:[#allocation52_spill] sm:$0xff] %v5956_v17 }
 0x925   :  { %v2937_v3 = vmul.f32 %v2935_v23, %v5703_v53  ;;  %v5918_v53 = vld [vmem:[#allocation12 + $0x24] ss:$16 sps:$4 sm:$0xff]   ;;  %v5953_v23 = vld [vmem:[#allocation12 + $0x68] ss:$16 sps:$4 sm:$0xff]  }
 0x927   :  { %v5905_v25 = vadd.f32 %v2938_v34, %v2937_v3  ;;  %v5959_v3 = vld [vmem:[#allocation12 + $0x8c] ss:$16 sps:$4 sm:$0xff]   ;;  %v5962_v34 = vld [vmem:[#allocation12 + $0x80] ss:$16 sps:$4 sm:$0xff]  }
 0x928   :  { %6803 = vst [vmem:[#allocation53_spill] sm:$0xff] %v5959_v3  ;;  %6804 = vst [vmem:[#allocation54_spill] sm:$0xff] %v5962_v34 }
 0x929   :  { %3992 = vtanh.f32 %v5905_v25 }
 0x933   :  { %v3993_v10 = vpop.eup %3992 }
 0x934   :  { %v2943_v18 = vmul.f32 %v3993_v10, %v2941_v20  ;;  %v5965_v20 = vld [vmem:[#allocation12 + $0x88] ss:$16 sps:$4 sm:$0xff]   ;;  %v5968_v10 = vld [vmem:[#allocation12 + $0xa4] ss:$16 sps:$4 sm:$0xff]  }
 0x935   :  { %6805 = vst [vmem:[#allocation55_spill] sm:$0xff] %v5965_v20  ;;  %6806 = vst [vmem:[#allocation56_spill] sm:$0xff] %v5968_v10 }
 0x936   :  { %v5908_v51 = vpack.c.bf16 %v2943_v18, %v2943_v18  ;;  %v5971_v18 = vld [vmem:[#allocation12 + $0xac] ss:$16 sps:$4 sm:$0xff]  }
 0x937   :  { %6807 = vst [vmem:[#allocation57_spill] sm:$0xff] %v5971_v18 }
 0x938   :  { %2978 = vmatmul.mubr.bf16.vlgmr.msra.gmra.mrb[76].mxu0 %v5908_v51  ;;  %3019 = vmatmul.mubr.bf16.vlgmr.msra.gmra.mrb[80].mxu1 %v5908_v51 }
 0x939   :  { %3028 = vmatpush1.bf16.msra.mxu0 %v5912_v58  ;;  %3069 = vmatpush1.bf16.msra.mxu1 %v5915_v24 }
 0x93a   :  { %3029 = vmatprep.subr.bf16.mxu0 %v5918_v53  ;;  %3070 = vmatprep.subr.bf16.mxu1 %v5921_v57 }
 0x93b   :  { %3059 = vmatprep.mubr.bf16.mxu0 %v6491_v1  ;;  %3100 = vmatprep.mubr.bf16.mxu1 %v6491_v1 }
 0x93d   :  { %3030 = vmatpush1.bf16.msra.mxu0 %v5926_v27  ;;  %3071 = vmatpush1.bf16.msra.mxu1 %v5929_v59 }
 0x93e   :  { %3031 = vmatprep.subr.bf16.mxu0 %v5932_v31  ;;  %3072 = vmatprep.subr.bf16.mxu1 %v5935_v56 }
 0x941   :  { %3032 = vmatpush1.bf16.msra.mxu0 %v5938_v2  ;;  %3073 = vmatpush1.bf16.msra.mxu1 %v5941_v63 }
 0x942   :  { %3033 = vmatprep.subr.bf16.mxu0 %v5944_v22  ;;  %3074 = vmatprep.subr.bf16.mxu1 %v5947_v15 }
 0x945   :  { %3034 = vmatpush1.bf16.msra.mxu0 %v5950_v16  ;;  %3075 = vmatpush1.bf16.msra.mxu1 %v5953_v23 }
 0x946   :  { %3035 = vmatprep.subr.bf16.mxu0 %v5956_v17  ;;  %3076 = vmatprep.subr.bf16.mxu1 %v5959_v3  ;;  %v5974_v17 = vld [vmem:[#allocation12 + $0xa0] ss:$16 sps:$4 sm:$0xff]   ;;  %v5977_v3 = vld [vmem:[#allocation12 + $0xa8] ss:$16 sps:$4 sm:$0xff]  }
 0x947   :  { %6808 = vst [vmem:[#allocation59_spill] sm:$0xff] %v5974_v17  ;;  %6809 = vst [vmem:[#allocation60_spill] sm:$0xff] %v5977_v3 }
 0x949   :  { %3036 = vmatpush1.bf16.msra.mxu0 %v5962_v34  ;;  %3077 = vmatpush1.bf16.msra.mxu1 %v5965_v20  ;;  %v5980_v34 = vld [vmem:[#allocation12 + $0xc4] ss:$16 sps:$4 sm:$0xff]   ;;  %v5983_v20 = vld [vmem:[#allocation12 + $0xcc] ss:$16 sps:$4 sm:$0xff]  }
 0x94a   :  { %3037 = vmatprep.subr.bf16.mxu0 %v5968_v10  ;;  %3078 = vmatprep.subr.bf16.mxu1 %v5971_v18  ;;  %6810 = vst [vmem:[#allocation61_spill] sm:$0xff] %v5980_v34  ;;  %6811 = vst [vmem:[#allocation62_spill] sm:$0xff] %v5983_v20  ;;  %v5986_v10 = vld [vmem:[#allocation12 + $0xc0] ss:$16 sps:$4 sm:$0xff]   ;;  %v5989_v18 = vld [vmem:[#allocation12 + $0xc8] ss:$16 sps:$4 sm:$0xff]  }
 0x94b   :  { %6812 = vst [vmem:[#allocation63_spill] sm:$0xff] %v5986_v10 }
 0x94d   :  { %3038 = vmatpush1.bf16.msra.mxu0 %v5974_v17  ;;  %3079 = vmatpush1.bf16.msra.mxu1 %v5977_v3  ;;  %v5992_v17 = vld [vmem:[#allocation12 + $0xe4] ss:$16 sps:$4 sm:$0xff]   ;;  %v5995_v3 = vld [vmem:[#allocation12 + $0xec] ss:$16 sps:$4 sm:$0xff]  }
 0x94e   :  { %3039 = vmatprep.subr.bf16.mxu0 %v5980_v34  ;;  %3080 = vmatprep.subr.bf16.mxu1 %v5983_v20  ;;  %v5998_v34 = vld [vmem:[#allocation12 + $0xe0] ss:$16 sps:$4 sm:$0xff]   ;;  %v6001_v20 = vld [vmem:[#allocation12 + $0xe8] ss:$16 sps:$4 sm:$0xff]  }
 0x951   :  { %3040 = vmatpush1.bf16.msra.mxu0 %v5986_v10  ;;  %3081 = vmatpush1.bf16.msra.mxu1 %v5989_v18  ;;  %v2810_v10 = vpack.c.bf16 %v5900_v12, %v5900_v12 }
 0x952   :  { %3041 = vmatprep.subr.bf16.mxu0 %v5992_v17  ;;  %3082 = vmatprep.subr.bf16.mxu1 %v5995_v3 }
 0x955   :  { %3042 = vmatpush1.bf16.msra.mxu0 %v5998_v34  ;;  %3083 = vmatpush1.bf16.msra.mxu1 %v6001_v20 }
 0x956   :  { %3135 = vmatprep.subr.bf16.mxu0 %v5563_v48  ;;  %3176 = vmatprep.subr.bf16.mxu1 %v5566_v47  ;;  %v6813_v48 = vld [vmem:[#allocation33_spill] sm:$0xff]  ;;  %v6814_v47 = vld [vmem:[#allocation34_spill] sm:$0xff] }
 0x958   :  { %3060 = vmatmul.mubr.bf16.vlgmr.msra.gmra.mrb[80].mxu0 %v2810_v10  ;;  %3101 = vmatmul.mubr.bf16.vlgmr.msra.gmra.mrb[84].mxu1 %v2810_v10 }
 0x959   :  { %3136 = vmatpush1.bf16.msra.mxu0 %v5569_v49  ;;  %3177 = vmatpush1.bf16.msra.mxu1 %v5572_v28  ;;  %v6815_v49 = vld [vmem:[#allocation35_spill] sm:$0xff]  ;;  %v6816_v28 = vld [vmem:[#allocation36_spill] sm:$0xff] }
 0x95a   :  { %3137 = vmatprep.subr.bf16.mxu0 %v6746_v46  ;;  %3178 = vmatprep.subr.bf16.mxu1 %v6747_v39  ;;  %v6817_v46 = vld [vmem:[#allocation37_spill] sm:$0xff]  ;;  %v6818_v39 = vld [vmem:[#allocation38_spill] sm:$0xff] }
 0x95b   :  { %3167 = vmatprep.mubr.bf16.mxu0 %v6491_v1  ;;  %3208 = vmatprep.mubr.bf16.mxu1 %v6491_v1 }
 0x95d   :  { %3138 = vmatpush1.bf16.msra.mxu0 %v6748_v44  ;;  %3179 = vmatpush1.bf16.msra.mxu1 %v6749_v43  ;;  %v6819_v44 = vld [vmem:[#allocation39_spill] sm:$0xff]  ;;  %v6820_v43 = vld [vmem:[#allocation40_spill] sm:$0xff] }
 0x95e   :  { %3139 = vmatprep.subr.bf16.mxu0 %v6750_v42  ;;  %3180 = vmatprep.subr.bf16.mxu1 %v6751_v41  ;;  %v6821_v42 = vld [vmem:[#allocation41_spill] sm:$0xff]  ;;  %v6822_v41 = vld [vmem:[#allocation42_spill] sm:$0xff] }
 0x961   :  { %3140 = vmatpush1.bf16.msra.mxu0 %v6752_v38  ;;  %3181 = vmatpush1.bf16.msra.mxu1 %v6753_v60  ;;  %v6823_v38 = vld [vmem:[#allocation58_spill] sm:$0xff]  ;;  %v6824_v60 = vld [vmem:[#allocation21_spill] sm:$0xff] }
 0x962   :  { %3141 = vmatprep.subr.bf16.mxu0 %v6754_v45  ;;  %3182 = vmatprep.subr.bf16.mxu1 %v6755_v40  ;;  %v6825_v45 = vld [vmem:[#allocation22_spill] sm:$0xff]  ;;  %v6826_v40 = vld [vmem:[#allocation23_spill] sm:$0xff] }
 0x965   :  { %3142 = vmatpush1.bf16.msra.mxu0 %v6756_v35  ;;  %3183 = vmatpush1.bf16.msra.mxu1 %v6757_v36  ;;  %v6827_v35 = vld [vmem:[#allocation43_spill] sm:$0xff]  ;;  %v6828_v36 = vld [vmem:[#allocation44_spill] sm:$0xff] }
 0x966   :  { %3143 = vmatprep.subr.bf16.mxu0 %v6758_v55  ;;  %3184 = vmatprep.subr.bf16.mxu1 %v6759_v54  ;;  %v6829_v55 = vld [vmem:[#allocation45_spill] sm:$0xff]  ;;  %v6830_v54 = vld [vmem:[#allocation46_spill] sm:$0xff] }
 0x969   :  { %3144 = vmatpush1.bf16.msra.mxu0 %v6760_v19  ;;  %3185 = vmatpush1.bf16.msra.mxu1 %v6761_v9  ;;  %v6831_v19 = vld [vmem:[#allocation47_spill] sm:$0xff]  ;;  %v6832_v9 = vld [vmem:[#allocation48_spill] sm:$0xff] }
 0x96a   :  { %3145 = vmatprep.subr.bf16.mxu0 %v6762_v7  ;;  %3186 = vmatprep.subr.bf16.mxu1 %v6763_v50  ;;  %v6833_v7 = vld [vmem:[#allocation49_spill] sm:$0xff]  ;;  %v6834_v50 = vld [vmem:[#allocation50_spill] sm:$0xff] }
 0x96d   :  { %3146 = vmatpush1.bf16.msra.mxu0 %v6764_v11  ;;  %3187 = vmatpush1.bf16.msra.mxu1 %v6765_v8  ;;  %v6835_v11 = vld [vmem:[#allocation51_spill] sm:$0xff]  ;;  %v6836_v8 = vld [vmem:[#allocation24_spill] sm:$0xff] }
 0x96e   :  { %3147 = vmatprep.subr.bf16.mxu0 %v6766_v37  ;;  %3188 = vmatprep.subr.bf16.mxu1 %v6767_v61  ;;  %v6837_v37 = vld [vmem:[#allocation25_spill] sm:$0xff]  ;;  %v6838_v61 = vld [vmem:[#allocation26_spill] sm:$0xff] }
 0x971   :  { %3148 = vmatpush1.bf16.msra.mxu0 %v6768_v62  ;;  %3189 = vmatpush1.bf16.msra.mxu1 %v5771_v30  ;;  %v6839_v62 = vld [vmem:[#allocation27_spill] sm:$0xff]  ;;  %v6840_v30 = vld [vmem:[#allocation28_spill] sm:$0xff] }
 0x972   :  { %3149 = vmatprep.subr.bf16.mxu0 %v6769_v0  ;;  %3190 = vmatprep.subr.bf16.mxu1 %v5775_v52  ;;  %v6841_v0 = vld [vmem:[#allocation29_spill] sm:$0xff]  ;;  %v6842_v52 = vld [vmem:[#allocation30_spill] sm:$0xff] }
 0x975   :  { %3150 = vmatpush1.bf16.msra.mxu0 %v5778_v32  ;;  %3191 = vmatpush1.bf16.msra.mxu1 %v5781_v6  ;;  %v6843_v32 = vld [vmem:[#allocation31_spill] sm:$0xff]  ;;  %v6844_v6 = vld [vmem:[#allocation32_spill] sm:$0xff] }
 0x976   :  { %3266 = vmatprep.subr.bf16.mxu0 %v5784_v13  ;;  %3307 = vmatprep.subr.bf16.mxu1 %v5787_v33 }
 0x978   :  { %3168 = vmatmul.mubr.bf16.vlgmr.msra.gmra.mrb[84].mxu0 %v5908_v51  ;;  %3209 = vmatmul.mubr.bf16.vlgmr.msra.gmra.mrb[88].mxu1 %v5908_v51 }
 0x979   :  { %3267 = vmatpush1.bf16.msra.mxu0 %v6813_v48  ;;  %3308 = vmatpush1.bf16.msra.mxu1 %v6814_v47 }
 0x97a   :  { %3268 = vmatprep.subr.bf16.mxu0 %v6815_v49  ;;  %3309 = vmatprep.subr.bf16.mxu1 %v6816_v28 }
 0x97b   :  { %3298 = vmatprep.mubr.bf16.mxu0 %v6491_v1  ;;  %3339 = vmatprep.mubr.bf16.mxu1 %v6491_v1 }
 0x97d   :  { %3269 = vmatpush1.bf16.msra.mxu0 %v6817_v46  ;;  %3310 = vmatpush1.bf16.msra.mxu1 %v6818_v39 }
 0x97e   :  { %3270 = vmatprep.subr.bf16.mxu0 %v6819_v44  ;;  %3311 = vmatprep.subr.bf16.mxu1 %v6820_v43 }
 0x981   :  { %3271 = vmatpush1.bf16.msra.mxu0 %v6821_v42  ;;  %3312 = vmatpush1.bf16.msra.mxu1 %v6822_v41 }
 0x982   :  { %3272 = vmatprep.subr.bf16.mxu0 %v6823_v38  ;;  %3313 = vmatprep.subr.bf16.mxu1 %v6824_v60 }
 0x985   :  { %3273 = vmatpush1.bf16.msra.mxu0 %v6825_v45  ;;  %3314 = vmatpush1.bf16.msra.mxu1 %v6826_v40 }
 0x986   :  { %3274 = vmatprep.subr.bf16.mxu0 %v6827_v35  ;;  %3315 = vmatprep.subr.bf16.mxu1 %v6828_v36 }
 0x989   :  { %3275 = vmatpush1.bf16.msra.mxu0 %v6829_v55  ;;  %3316 = vmatpush1.bf16.msra.mxu1 %v6830_v54 }
 0x98a   :  { %3276 = vmatprep.subr.bf16.mxu0 %v6831_v19  ;;  %3317 = vmatprep.subr.bf16.mxu1 %v6832_v9 }
 0x98d   :  { %3277 = vmatpush1.bf16.msra.mxu0 %v6833_v7  ;;  %3318 = vmatpush1.bf16.msra.mxu1 %v6834_v50 }
 0x98e   :  { %3278 = vmatprep.subr.bf16.mxu0 %v6835_v11  ;;  %3319 = vmatprep.subr.bf16.mxu1 %v6836_v8 }
 0x991   :  { %3279 = vmatpush1.bf16.msra.mxu0 %v6837_v37  ;;  %3320 = vmatpush1.bf16.msra.mxu1 %v6838_v61 }
 0x992   :  { %3280 = vmatprep.subr.bf16.mxu0 %v6839_v62  ;;  %3321 = vmatprep.subr.bf16.mxu1 %v6840_v30 }
 0x995   :  { %3281 = vmatpush1.bf16.msra.mxu0 %v6841_v0  ;;  %3322 = vmatpush1.bf16.msra.mxu1 %v6842_v52 }
 0x996   :  { %3348 = vmatprep.subr.bf16.mxu0 %v6843_v32  ;;  %3389 = vmatprep.subr.bf16.mxu1 %v6844_v6 }
 0xa0b   :  { %v2979_v13 = vpop.f32.mrb[76].mxu0  ;;  %v3020_v33 = vpop.f32.mrb[80].mxu1 }
 0xa0c   :  { %v2981_v12 = vpop.f32.mrb[77].mxu0  ;;  %v3022_v51 = vpop.f32.mrb[81].mxu1 }
 0xa0d   :  { %v2983_v10 = vpop.f32.mrb[78].mxu0  ;;  %v3024_v48 = vpop.f32.mrb[82].mxu1 }
 0xa0e   :  { %v2984_v47 = vpop.f32.mrb[79].mxu0  ;;  %v3025_v49 = vpop.f32.mrb[83].mxu1 }
 0xa2b   :  { %v3061_v28 = vpop.f32.mrb[80].mxu0  ;;  %v3102_v46 = vpop.f32.mrb[84].mxu1 }
 0xa2c   :  { %v3062_v39 = vadd.f32 %v3061_v28, %v2979_v13  ;;  %v3103_v44 = vadd.f32 %v3102_v46, %v3020_v33  ;;  %v3063_v43 = vpop.f32.mrb[81].mxu0  ;;  %v3104_v42 = vpop.f32.mrb[85].mxu1 }
 0xa2d   :  { %v3064_v41 = vadd.f32 %v3063_v43, %v2981_v12  ;;  %v3105_v38 = vadd.f32 %v3104_v42, %v3022_v51  ;;  %v3065_v60 = vpop.f32.mrb[82].mxu0  ;;  %v3106_v45 = vpop.f32.mrb[86].mxu1 }
 0xa2e   :  { %v3109_v40 = vadd.f32 %v3062_v39, %v4933_v21  ;;  %v3066_v35 = vpop.f32.mrb[83].mxu0  ;;  %v3107_v36 = vpop.f32.mrb[87].mxu1  ;;  %v3111_v7 = vadd.f32 %v3103_v44, %v4948_v29 }
 0xa2f   :  { %v3110_v55 = vadd.f32 %v3064_v41, %v4937_v26  ;;  %v3112_v9 = vadd.f32 %v3105_v38, %v4941_v14 }
 0xa30   :  { %v3113_v54 = vmul.f32 0.5, %v3109_v40  ;;  %v3115_v50 = vmul.f32 0.5, %v3111_v7  ;;  %v3134_v40 = vld [vmem:[#allocation2 + $0x7] ss:$8 sm:$0xf] }
 0xa31   :  { %v3114_v19 = vmul.f32 0.5, %v3110_v55 }
 0xa32   :  { %3994 = vtanh.f32 %v3113_v54 }
 0xa33   :  { %3996 = vtanh.f32 %v3114_v19 }
 0xa34   :  { %3998 = vtanh.f32 %v3112_v9 }
 0xa35   :  { %4000 = vtanh.f32 %v3115_v50 }
 0xa3c   :  { %v3995_v11 = vpop.eup %3994 }
 0xa3d   :  { %v3119_v8 = vmul.f32 0.5, %v3995_v11  ;;  %v3997_v37 = vpop.eup %3996 }
 0xa3e   :  { %v3120_v62 = vmul.f32 0.5, %v3997_v37  ;;  %v3999_v30 = vpop.eup %3998 }
 0xa3f   :  { %v3122_v61 = vadd.f32 0.5, %v3119_v8  ;;  %v4001_v13 = vpop.eup %4000 }
 0xa40   :  { %v3123_v0 = vadd.f32 0.5, %v3120_v62  ;;  %v3121_v51 = vmul.f32 0.5, %v4001_v13 }
 0xa41   :  { %v3127_v52 = vmul.f32 %v3999_v30, %v3122_v61 }
 0xa42   :  { %v3126_v32 = vmul.f32 %v3123_v0, %v5895_v5  ;;  %v3124_v42 = vadd.f32 0.5, %v3121_v51 }
 0xa44   :  { %v6083_v6 = vadd.f32 %v3127_v52, %v3126_v32 }
 0xa46   :  { %4002 = vtanh.f32 %v6083_v6 }
 0xa4b   :  { %v3169_v33 = vpop.f32.mrb[84].mxu0  ;;  %v3210_v12 = vpop.f32.mrb[88].mxu1 }
 0xa4c   :  { %v3171_v10 = vpop.f32.mrb[85].mxu0  ;;  %v3212_v48 = vpop.f32.mrb[89].mxu1 }
 0xa4d   :  { %v3221_v47 = vcombine.low %v3169_v33, %v3171_v10  ;;  %v3222_v49 = vcombine.low %v3210_v12, %v3212_v48  ;;  %v3173_v28 = vpop.f32.mrb[86].mxu0  ;;  %v3214_v46 = vpop.f32.mrb[90].mxu1 }
 0xa4e   :  { %v3174_v39 = vpop.f32.mrb[87].mxu0  ;;  %v3215_v44 = vpop.f32.mrb[91].mxu1 }
 0xa4f   :  { %v3229_v43 = vrot.slane %v3221_v47, %v4750_v4  ;;  %v3236_v5 = vrot.slane %v3222_v49, %v4750_v4 }
 0xa50   :  { %v4003_v41 = vpop.eup %4002 }
 0xa51   :  { %v3237_v38 = vcombine.low %v3229_v43, %v3236_v5  ;;  %v3130_v60 = vmul.f32 %v4003_v41, %v3124_v42 }
 0xa53   :  { %v3244_v45 = vrot.slane %v3237_v38, %v4750_v4  ;;  %3132 = vst [vmem:[#allocation3 + $0x6] sm:$0x1] %v3130_v60 }
 0xa55   :  { %v3246_v35 = vadd.f32 %v3244_v45, %v3134_v40 }
 0xa57   :  { %v3247_v36 = vmul.f32 0.5, %v3246_v35  ;;  %v3252_v55 = vrot.slane %v3246_v35, 3 }
 0xa59   :  { %4004 = vtanh.f32 %v3247_v36 }
 0xa5a   :  { %4006 = vtanh.f32 %v3252_v55 }
 0xa63   :  { %v4005_v54 = vpop.eup %4004 }
 0xa64   :  { %v3249_v19 = vmul.f32 0.5, %v4005_v54  ;;  %v4007_v50 = vpop.eup %4006 }
 0xa66   :  { %v3250_v9 = vadd.f32 0.5, %v3249_v19 }
 0xa68   :  { %v3256_v7 = vrot.slane %v3250_v9, 1  ;;  %v3259_v8 = vmul.f32 %v4007_v50, %v3250_v9  ;;  %v3262_v61 = vrot.slane %v3250_v9, 2 }
 0xa6a   :  { %v3258_v11 = vmul.f32 %v3256_v7, %v5905_v25  ;;  %v6846_v25 = vld [vmem:[#allocation53_spill] sm:$0xff] }
 0xa6c   :  { %v3260_v37 = vadd.f32 %v3259_v8, %v3258_v11 }
 0xa6e   :  { %4008 = vtanh.f32 %v3260_v37 }
 0xa78   :  { %v4009_v62 = vpop.eup %4008 }
 0xa79   :  { %v3264_v4 = vmul.f32 %v4009_v62, %v3262_v61 }
 0xa7b   :  { %v3265_v30 = vpack.c.bf16 %v3264_v4, %v3264_v4 }
 0xa7d   :  { %3299 = vmatmul.mubr.bf16.vlgmr.msra.gmra.mrb[88].mxu0 %v3265_v30  ;;  %3340 = vmatmul.mubr.bf16.vlgmr.msra.gmra.mrb[92].mxu1 %v3265_v30 }
 0xa7e   :  { %3349 = vmatpush1.bf16.msra.mxu0 %v5912_v58  ;;  %3390 = vmatpush1.bf16.msra.mxu1 %v5915_v24  ;;  %v6847_v58 = vld [vmem:[#allocation54_spill] sm:$0xff]  ;;  %v6848_v24 = vld [vmem:[#allocation55_spill] sm:$0xff] }
 0xa7f   :  { %3350 = vmatprep.subr.bf16.mxu0 %v5918_v53  ;;  %3391 = vmatprep.subr.bf16.mxu1 %v5921_v57  ;;  %v6849_v53 = vld [vmem:[#allocation56_spill] sm:$0xff]  ;;  %v6850_v57 = vld [vmem:[#allocation57_spill] sm:$0xff] }
 0xa80   :  { %3380 = vmatprep.mubr.bf16.mxu0 %v6491_v1  ;;  %3421 = vmatprep.mubr.bf16.mxu1 %v6491_v1  ;;  %v6845_v1 = vld [vmem:[#allocation52_spill] sm:$0xff] }
 0xa82   :  { %3351 = vmatpush1.bf16.msra.mxu0 %v5926_v27  ;;  %3392 = vmatpush1.bf16.msra.mxu1 %v5929_v59  ;;  %v6851_v27 = vld [vmem:[#allocation59_spill] sm:$0xff]  ;;  %v6852_v59 = vld [vmem:[#allocation60_spill] sm:$0xff] }
 0xa83   :  { %3352 = vmatprep.subr.bf16.mxu0 %v5932_v31  ;;  %3393 = vmatprep.subr.bf16.mxu1 %v5935_v56  ;;  %v6853_v31 = vld [vmem:[#allocation61_spill] sm:$0xff]  ;;  %v6854_v56 = vld [vmem:[#allocation62_spill] sm:$0xff] }
 0xa86   :  { %3353 = vmatpush1.bf16.msra.mxu0 %v5938_v2  ;;  %3394 = vmatpush1.bf16.msra.mxu1 %v5941_v63  ;;  %v6855_v2 = vld [vmem:[#allocation63_spill] sm:$0xff]  ;;  %v3131_v63 = vpack.c.bf16 %v3130_v60, %v3130_v60 }
 0xa87   :  { %3354 = vmatprep.subr.bf16.mxu0 %v5944_v22  ;;  %3395 = vmatprep.subr.bf16.mxu1 %v5947_v15  ;;  %v6856_v22 = vmov 0.0   ;;  %v3884_v15 = vld [vmem:[#allocation13] sm:$0xff]  }
 0xa8a   :  { %3355 = vmatpush1.bf16.msra.mxu0 %v5950_v16  ;;  %3396 = vmatpush1.bf16.msra.mxu1 %v5953_v23  ;;  %v3885_v16 = vld [vmem:[#allocation13 + $0x8] sm:$0xff]   ;;  %v3886_v23 = vld [vmem:[#allocation13 + $0x10] sm:$0xff]  }
 0xa8b   :  { %3356 = vmatprep.subr.bf16.mxu0 %v6845_v1  ;;  %3397 = vmatprep.subr.bf16.mxu1 %v6846_v25 }
 0xa8e   :  { %3357 = vmatpush1.bf16.msra.mxu0 %v6847_v58  ;;  %3398 = vmatpush1.bf16.msra.mxu1 %v6848_v24  ;;  %v3687_v58 = vld [vmem:[%s6159_s8] ss:$0 sm:$0xff] }
 0xa8f   :  { %3358 = vmatprep.subr.bf16.mxu0 %v6849_v53  ;;  %3399 = vmatprep.subr.bf16.mxu1 %v6850_v57 }
 0xa92   :  { %3359 = vmatpush1.bf16.msra.mxu0 %v6851_v27  ;;  %3400 = vmatpush1.bf16.msra.mxu1 %v6852_v59 }
 0xa93   :  { %3360 = vmatprep.subr.bf16.mxu0 %v6853_v31  ;;  %3401 = vmatprep.subr.bf16.mxu1 %v6854_v56 }
 0xa96   :  { %3361 = vmatpush1.bf16.msra.mxu0 %v6855_v2  ;;  %3402 = vmatpush1.bf16.msra.mxu1 %v5989_v18  ;;  %v3891_v18 = vld [vmem:[#allocation13 + $0x38] sm:$0xff]  }
 0xa97   :  { %3362 = vmatprep.subr.bf16.mxu0 %v5992_v17  ;;  %3403 = vmatprep.subr.bf16.mxu1 %v5995_v3  ;;  %v3887_v17 = vld [vmem:[#allocation13 + $0x18] sm:$0xff]   ;;  %v3888_v3 = vld [vmem:[#allocation13 + $0x20] sm:$0xff]  }
 0xa9a   :  { %3363 = vmatpush1.bf16.msra.mxu0 %v5998_v34  ;;  %3404 = vmatpush1.bf16.msra.mxu1 %v6001_v20  ;;  %v3889_v34 = vld [vmem:[#allocation13 + $0x28] sm:$0xff]   ;;  %v3890_v20 = vld [vmem:[#allocation13 + $0x30] sm:$0xff]  }
 0xa9b   :  { %3705 = vmatprep.subr.bf16.mxu0 %v6856_v22 }
 0xa9d   :  { %3381 = vmatmul.mubr.bf16.vlgmr.msra.gmra.mrb[92].mxu0 %v3131_v63  ;;  %3422 = vmatmul.mubr.bf16.vlgmr.msra.gmra.mrb[96].mxu1 %v3131_v63 }
 0xa9e   :  { %3706 = vmatpush3.bf16.msra.mxu0 %v3884_v15  ;;  %3721 = vmatprep.mubr.msk.bf16.mxu0 %vm4391_vm1, %v6856_v22 }
 0xa9f   :  { %3707 = vmatprep.subr.bf16.mxu0 %v6856_v22 }
 0xaa2   :  { %3708 = vmatpush3.bf16.msra.mxu0 %v3885_v16 }
 0xaa3   :  { %3709 = vmatprep.subr.bf16.mxu0 %v6856_v22 }
 0xaa6   :  { %3710 = vmatpush3.bf16.msra.mxu0 %v3886_v23 }
 0xaa7   :  { %3711 = vmatprep.subr.bf16.mxu0 %v6856_v22 }
 0xaaa   :  { %3712 = vmatpush3.bf16.msra.mxu0 %v3887_v17 }
 0xaab   :  { %3713 = vmatprep.subr.bf16.mxu0 %v6856_v22 }
 0xaae   :  { %3714 = vmatpush3.bf16.msra.mxu0 %v3888_v3 }
 0xaaf   :  { %3715 = vmatprep.subr.bf16.mxu0 %v6856_v22 }
 0xab2   :  { %3716 = vmatpush3.bf16.msra.mxu0 %v3889_v34 }
 0xab3   :  { %3717 = vmatprep.subr.bf16.mxu0 %v6856_v22 }
 0xab6   :  { %3718 = vmatpush3.bf16.msra.mxu0 %v3890_v20 }
 0xab7   :  { %3719 = vmatprep.subr.bf16.mxu0 %v6856_v22 }
 0xaba   :  { %3720 = vmatpush3.bf16.msra.mxu0 %v3891_v18 }
 0xb50   :  { %v3300_v0 = vpop.f32.mrb[88].mxu0  ;;  %v3341_v52 = vpop.f32.mrb[92].mxu1 }
 0xb51   :  { %v3302_v32 = vpop.f32.mrb[89].mxu0  ;;  %v3343_v13 = vpop.f32.mrb[93].mxu1 }
 0xb52   :  { %v3304_v33 = vpop.f32.mrb[90].mxu0  ;;  %v3345_v12 = vpop.f32.mrb[94].mxu1 }
 0xb53   :  { %v3305_v51 = vpop.f32.mrb[91].mxu0  ;;  %v3346_v10 = vpop.f32.mrb[95].mxu1 }
 0xb70   :  { %v3382_v48 = vpop.f32.mrb[92].mxu0  ;;  %v3423_v47 = vpop.f32.mrb[96].mxu1 }
 0xb71   :  { %v3383_v49 = vadd.f32 %v3382_v48, %v3300_v0  ;;  %v3424_v28 = vadd.f32 %v3423_v47, %v3341_v52  ;;  %v3384_v46 = vpop.f32.mrb[93].mxu0  ;;  %v3425_v39 = vpop.f32.mrb[97].mxu1 }
 0xb72   :  { %v3385_v44 = vadd.f32 %v3384_v46, %v3302_v32  ;;  %v3426_v43 = vadd.f32 %v3425_v39, %v3343_v13  ;;  %v3386_v5 = vpop.f32.mrb[94].mxu0  ;;  %v3427_v42 = vpop.f32.mrb[98].mxu1 }
 0xb73   :  { %v3430_v41 = vadd.f32 %v3383_v49, %v4933_v21  ;;  %v3387_v38 = vpop.f32.mrb[95].mxu0  ;;  %v3428_v60 = vpop.f32.mrb[99].mxu1  ;;  %v3432_v55 = vadd.f32 %v3424_v28, %v4948_v29 }
 0xb74   :  { %v3431_v45 = vadd.f32 %v3385_v44, %v4937_v26  ;;  %v3433_v36 = vadd.f32 %v3426_v43, %v4941_v14 }
 0xb75   :  { %v3434_v40 = vmul.f32 0.5, %v3430_v41  ;;  %v3436_v54 = vmul.f32 0.5, %v3432_v55 }
 0xb76   :  { %v3435_v35 = vmul.f32 0.5, %v3431_v45 }
 0xb77   :  { %4010 = vtanh.f32 %v3434_v40 }
 0xb78   :  { %4012 = vtanh.f32 %v3435_v35 }
 0xb79   :  { %4014 = vtanh.f32 %v3433_v36 }
 0xb7a   :  { %4016 = vtanh.f32 %v3436_v54 }
 0xb81   :  { %v4011_v19 = vpop.eup %4010 }
 0xb82   :  { %v3440_v9 = vmul.f32 0.5, %v4011_v19  ;;  %v4013_v7 = vpop.eup %4012 }
 0xb83   :  { %v3441_v21 = vmul.f32 0.5, %v4013_v7  ;;  %v4015_v11 = vpop.eup %4014 }
 0xb84   :  { %v3443_v50 = vadd.f32 0.5, %v3440_v9  ;;  %v4017_v62 = vpop.eup %4016 }
 0xb85   :  { %v3444_v8 = vadd.f32 0.5, %v3441_v21  ;;  %v3442_v14 = vmul.f32 0.5, %v4017_v62 }
 0xb86   :  { %v3448_v37 = vmul.f32 %v4015_v11, %v3443_v50 }
 0xb87   :  { %v3447_v26 = vmul.f32 %v3444_v8, %v6083_v6  ;;  %v3445_v4 = vadd.f32 0.5, %v3442_v14 }
 0xb89   :  { %v3449_v61 = vadd.f32 %v3448_v37, %v3447_v26 }
 0xb8b   :  { %4018 = vtanh.f32 %v3449_v61 }
 0xb95   :  { %v4019_v30 = vpop.eup %4018 }
 0xb96   :  { %v3451_v1 = vmul.f32 %v4019_v30, %v3445_v4 }
 0xb98   :  { %3452 = vst [vmem:[#allocation3 + $0x7] sm:$0x1] %v3451_v1 }
 0xb9f   :  { %v3453_v29 = vld [vmem:[#allocation3] sm:$0xff] }
 0xba0   :  { %v3454_v25 = vpack.c.bf16 %v3453_v29, %v3453_v29 }
 0xba2   :  { %3722 = vmatmul.mubr.bf16.vlgmr.msra.gmra.mrb[96].mxu0 %v3454_v25 }
 0xc75   :  { %v3560_v24 = vpop.f32.mrb[96].mxu0 }
 0xc76   :  { %v3561_v53 = vadd.f32 %v3687_v58, %v3560_v24  ;;  %v3723_v57 = vpop.f32.mrb[97].mxu0 }
 0xc77   :  { %v3563_v27 = vpop.f32.mrb[98].mxu0 }
 0xc78   :  { %v3566_v6 = vmul.f32 0.5, %v3561_v53  ;;  %v3724_v59 = vpop.f32.mrb[99].mxu0 }
 0xc7a   :  { %4020 = vtanh.f32 %v3566_v6 }
 0xc84   :  { %v4021_v31 = vpop.eup %4020 }
 0xc85   :  { %v3568_v56 = vmul.f32 0.5, %v4021_v31 }
 0xc87   :  { %v3569_v2 = vadd.f32 0.5, %v3568_v56 }
 0xc89   :  { %3570 = vst [vmem:[#allocation15] sm:$0xff] %v3569_v2 }
 0xc8a   :  { %4357 = shalt.err (!%p4354_p10)
}
 0xc8b   :  { %s4358_s23 = scalar_lea.hbm %s6160_s9, 128 }
 0xc8c   :  { %p4359_p11 = scmp.ne.s32.totalorder %s6160_s9, %s4358_s23  ;;  %p4362_p12 = scmp.lt.u32.totalorder %s4358_s23, %s6160_s9 }
 0xc8e   :  { %p4364_p13 = pnand %p4362_p12, %p4359_p11 }
 0xc90   :  { %4367 = shalt.err (!%p4364_p13)
}
 0xc91   :  { %3580 = dma.vmem_to_hbm [thread:$0]  %s3578_s19, 128, %s6160_s9, [#allocation6]  }
 0xc92   :  { %4376 = dma.done.wait [#allocation6], 128  }
 0xc93   :  { %4377 = vsyncadd [#allocation6], 4294967168 }
 0xc94   :  { %3584 = vsyncpa [#allocation5], 1 }
 0xc95   :  { %3585 = vsyncpa [#allocation8], 1 }
 0xc96   :  { %3586 = vsyncpa [#allocation11], 1 }
 0xc97   :  { %3587 = vsyncpa [#allocation14], 1 }
 0xc98   :  { %3588 = vsyncpa [#allocation6], 1 }

</bundles_post_ra>
